<compile_context>
chip_gen: v7x
topology: tpu7x:2x2x1
jax: 0.10.0
libtpu: 0.0.40
codegen_flags: <defaults>
</compile_context>

<pallas_src>
import functools

import numpy as np

import jax
import jax.numpy as jnp
from jax import lax
from jax.experimental import pallas as pl
from jax.experimental.pallas import tpu as pltpu


# --------------------------- in-kernel helpers ---------------------------

def _conv_taps(scr_ref, x, bt):
    """Write x into the halo scratch and return the 3 conv-tap views.

    Scratch rows [0, bt) = zero halo (position -1), [bt, bt+rows) = x,
    [bt+rows, 2*bt+rows) = zero halo (position L).  With length-major rows
    (row = l*bt + b) a +-1 temporal shift is a +-bt row offset, so tap k of a
    kernel-size-3 conv is the static slice starting at k*bt.
    """
    rows, cin = x.shape
    zeros = jnp.zeros((bt, cin), jnp.bfloat16)
    scr_ref[0:bt, 0:cin] = zeros
    scr_ref[bt + rows:2 * bt + rows, 0:cin] = zeros
    scr_ref[bt:bt + rows, 0:cin] = x.astype(jnp.bfloat16)
    return [scr_ref[k * bt:k * bt + rows, 0:cin] for k in range(3)]


def _conv1d_k3(scr_ref, x, w_ref, b, bt, relu):
    """Conv1d(kernel=3, stride=1, padding=1): 3 accumulating bf16 MXU dots."""
    taps = _conv_taps(scr_ref, x, bt)
    y = b                                               # (1, Cout) f32
    for k in range(3):
        y = y + jnp.dot(taps[k], w_ref[k],              # (rows, cin) x (cin, Cout)
                        preferred_element_type=jnp.float32)
    if relu:
        y = jnp.maximum(y, 0.0)
    return y


def _conv1d_k3_t(scr_ref, x, wt_ref, b_t, bt):
    """Final Conv1d with transposed output (Cout, rows) -> lane-dense store."""
    taps = _conv_taps(scr_ref, x, bt)
    y = b_t                                             # (Cout, 1) f32
    for k in range(3):
        # (Cout, cin) x (rows, cin) contracted on cin -> (Cout, rows)
        y = y + lax.dot_general(wt_ref[k], taps[k],
                                (((1,), (1,)), ((), ())),
                                preferred_element_type=jnp.float32)
    return y


def _maxpool2(x, even_ref, odd_ref):
    """MaxPool1d(2): f32 max of even/odd position-row selections (MXU)."""
    xb = x.astype(jnp.bfloat16)
    e = jnp.dot(even_ref[...], xb, preferred_element_type=jnp.float32)
    o = jnp.dot(odd_ref[...], xb, preferred_element_type=jnp.float32)
    return jnp.maximum(e, o)


def _ae_kernel(x_ref,
               ew1_ref, eb1_ref, ew2_ref, eb2_ref, efc_w_ref, efc_b_ref,
               dfc_w_ref, dfc_b_ref, dw1_ref, db1_ref, dw2t_ref, db2_ref,
               pin_ref, p1e_ref, p1o_ref, p2e_ref, p2o_ref, u1_ref, u2_ref,
               out_ref, scr_ref, *, bt, l4, h1):
    # (bt*L, C) batch-major rows -> length-major rows (row = l*bt + b) with one
    # 0/1 permutation matmul on the (otherwise idle) MXU.
    x = jnp.dot(pin_ref[...], x_ref[...].astype(jnp.bfloat16),
                preferred_element_type=jnp.float32)                    # (L*bt, C)

    # ----- encoder -----
    h = _conv1d_k3(scr_ref, x, ew1_ref, eb1_ref[...], bt, relu=True)   # (L*bt, h0)
    h = _maxpool2(h, p1e_ref, p1o_ref)                                 # (L/2*bt, h0)
    h = _conv1d_k3(scr_ref, h, ew2_ref, eb2_ref[...], bt, relu=True)   # (L/2*bt, h1)
    h = _maxpool2(h, p2e_ref, p2o_ref)                                 # (L/4*bt, h1)

    # encoder FC: accumulate over the l4 position blocks (K = h1 each).
    lat = efc_b_ref[...]                                               # (1, latent)
    for l in range(l4):
        lat = lat + jnp.dot(h[l * bt:(l + 1) * bt, :].astype(jnp.bfloat16),
                            efc_w_ref[l],
                            preferred_element_type=jnp.float32)        # (bt, latent)

    # ----- decoder -----
    df = (jnp.dot(lat.astype(jnp.bfloat16), dfc_w_ref[...],
                  preferred_element_type=jnp.float32)
          + dfc_b_ref[...])                                            # (bt, l4*h1)
    d = jnp.concatenate(
        [df[:, l * h1:(l + 1) * h1] for l in range(l4)], axis=0)       # (l4*bt, h1)

    d = jnp.dot(u1_ref[...], d.astype(jnp.bfloat16),
                preferred_element_type=jnp.float32)                    # x2 upsample
    d = _conv1d_k3(scr_ref, d, dw1_ref, db1_ref[...], bt, relu=True)   # (L/2*bt, h0)
    d = jnp.dot(u2_ref[...], d.astype(jnp.bfloat16),
                preferred_element_type=jnp.float32)                    # x2 upsample

    # Final conv emitted transposed: (C, L*bt) -> unmasked lane-dense stores.
    out_ref[0] = _conv1d_k3_t(scr_ref, d, dw2t_ref, db2_ref[...], bt)


# ---------------------- host-built 0/1 selector matrices -----------------

def _perm_bm_to_lm(L, bt):
    """(L*bt, bt*L) matrix mapping batch-major rows (b*L+l) -> length-major (l*bt+b)."""
    rows = np.arange(L * bt)
    cols = (rows % bt) * L + rows // bt
    m = np.zeros((L * bt, bt * L), np.float32)
    m[rows, cols] = 1.0
    return jnp.asarray(m, dtype=jnp.bfloat16)


def _pool_selectors(n_out_pos, bt):
    """Even/odd position-row selectors for MaxPool1d(2) on length-major rows."""
    rows = np.arange(n_out_pos * bt)
    p, b = rows // bt, rows % bt
    even = np.zeros((n_out_pos * bt, 2 * n_out_pos * bt), np.float32)
    odd = np.zeros_like(even)
    even[rows, (2 * p) * bt + b] = 1.0
    odd[rows, (2 * p + 1) * bt + b] = 1.0
    return jnp.asarray(even, jnp.bfloat16), jnp.asarray(odd, jnp.bfloat16)


def _upsample_select(n_in_pos, bt):
    """(2*n_in_pos*bt, n_in_pos*bt) duplication matrix: nearest upsample x2."""
    rows = np.arange(2 * n_in_pos * bt)
    p, b = rows // bt, rows % bt
    m = np.zeros((2 * n_in_pos * bt, n_in_pos * bt), np.float32)
    m[rows, (p // 2) * bt + b] = 1.0
    return jnp.asarray(m, jnp.bfloat16)


# ------------------------------- wrapper --------------------------------

def time_series_conv_ae(x, kparams, *, batch_tile=16):
    B, L, C = x.shape
    assert L % 4 == 0
    bt = min(batch_tile, B)
    assert bt % 8 == 0, ("batch tile must stay sublane-aligned", bt)
    assert B % bt == 0, (B, bt)
    nblk = B // bt
    l4 = L // 4
    h0 = kparams[0].shape[2]            # ew1 is (3, C, h0)
    h1 = kparams[2].shape[2]            # ew2 is (3, h0, h1)

    # Native layout in; contiguous reshape -> no extra HBM relayout pass.
    x_rows = x.reshape(B * L, C)

    sel = (_perm_bm_to_lm(L, bt),
           *_pool_selectors(L // 2, bt), *_pool_selectors(L // 4, bt),
           _upsample_select(L // 4, bt), _upsample_select(L // 2, bt))
    operands = tuple(kparams) + sel

    in_specs = [pl.BlockSpec((bt * L, C), lambda i: (i, 0))]
    for p in operands:
        in_specs.append(pl.BlockSpec(p.shape, lambda i, nd=p.ndim: (0,) * nd))

    out = pl.pallas_call(
        functools.partial(_ae_kernel, bt=bt, l4=l4, h1=h1),
        out_shape=jax.ShapeDtypeStruct((nblk, C, L * bt), jnp.float32),
        grid=(nblk,),
        in_specs=in_specs,
        out_specs=pl.BlockSpec((1, C, L * bt), lambda i: (i, 0, 0)),
        scratch_shapes=[pltpu.VMEM((L * bt + 2 * bt, max(C, h0, h1)),
                                   jnp.bfloat16)],
        compiler_params=pltpu.CompilerParams(
            dimension_semantics=("parallel",),
            vmem_limit_bytes=32 * 1024 * 1024),
    )(x_rows, *operands)

    # Undo the in-kernel transpose: (nblk, C, L, bt) -> (B, L, C).
    out = out.reshape(nblk, C, L, bt)
    return jnp.transpose(out, (0, 3, 2, 1)).reshape(B, L, C)


# --------------------- parameters (PyTorch-shaped) -----------------------

def init_params(key, seq_len, n_channels, latent_dim, hidden_dims):
    h0, h1 = hidden_dims
    L4 = seq_len // 4
    keys = jax.random.split(key, 12)

    def rnd(k, shape, scale=0.1):
        return (scale * jax.random.normal(k, shape)).astype(jnp.float32)

    return dict(
        ew1=rnd(keys[0], (h0, n_channels, 3)), eb1=rnd(keys[1], (h0,)),
        ew2=rnd(keys[2], (h1, h0, 3)), eb2=rnd(keys[3], (h1,)),
        efc_w=rnd(keys[4], (latent_dim, h1 * L4)), efc_b=rnd(keys[5], (latent_dim,)),
        dfc_w=rnd(keys[6], (h1 * L4, latent_dim)), dfc_b=rnd(keys[7], (h1 * L4,)),
        dw1=rnd(keys[8], (h0, h1, 3)), db1=rnd(keys[9], (h0,)),
        dw2=rnd(keys[10], (n_channels, h0, 3)), db2=rnd(keys[11], (n_channels,)),
    )


def to_kernel_params(p, seq_len, latent_dim, hidden_dims):
    """Glue: re-layout PyTorch-shaped params for the length-major bf16 kernel."""
    h0, h1 = hidden_dims
    L4 = seq_len // 4
    bf16 = jnp.bfloat16

    def cw(w):   # Conv1d weight (Cout, Cin, 3) -> (3, Cin, Cout), per-tap slabs
        return jnp.transpose(w, (2, 1, 0)).astype(bf16)

    def cwt(w):  # final conv, transposed-output form: (3, Cout, Cin)
        return jnp.transpose(w, (2, 0, 1)).astype(bf16)

    # encoder FC: torch column index is c*L4 + l  ->  kernel [l, c, :]
    efc_w = jnp.transpose(p["efc_w"].reshape(latent_dim, h1, L4),
                          (2, 1, 0)).astype(bf16)                  # (L4, h1, latent)
    # decoder FC: torch row index is c*L4 + l  ->  kernel column index l*h1 + c
    dfc_w = jnp.transpose(p["dfc_w"].reshape(h1, L4, latent_dim),
                          (1, 0, 2)).reshape(L4 * h1, latent_dim).T.astype(bf16)
    dfc_b = p["dfc_b"].reshape(h1, L4).T.reshape(1, L4 * h1)

    return (
        cw(p["ew1"]), p["eb1"].reshape(1, -1),
        cw(p["ew2"]), p["eb2"].reshape(1, -1),
        efc_w, p["efc_b"].reshape(1, -1),
        dfc_w, dfc_b,
        cw(p["dw1"]), p["db1"].reshape(1, -1),
        cwt(p["dw2"]), p["db2"].reshape(-1, 1),
    )


# -------------------- pure-JAX reference (PyTorch semantics) -------------

def reference_forward(x, p, hidden_dims):
    B, L, _ = x.shape
    h0, h1 = hidden_dims
    HI = lax.Precision.HIGHEST

    def conv1d_ncl(t, w, b):
        Lx = t.shape[2]
        tp = jnp.pad(t, ((0, 0), (0, 0), (1, 1)))
        y = sum(jnp.einsum("bcl,oc->bol", tp[:, :, k:k + Lx], w[:, :, k],
                           precision=HI) for k in range(3))
        return y + b[None, :, None]

    h = jnp.transpose(x, (0, 2, 1))                    # (B, n_ch, L)
    h = jnp.maximum(conv1d_ncl(h, p["ew1"], p["eb1"]), 0.0)
    h = jnp.max(h.reshape(B, h0, L // 2, 2), axis=-1)
    h = jnp.maximum(conv1d_ncl(h, p["ew2"], p["eb2"]), 0.0)
    h = jnp.max(h.reshape(B, h1, L // 4, 2), axis=-1)
    flat = h.reshape(B, -1)
    lat = jnp.dot(flat, p["efc_w"].T, precision=HI) + p["efc_b"]
    d = jnp.dot(lat, p["dfc_w"].T, precision=HI) + p["dfc_b"]
    d = d.reshape(B, h1, L // 4)
    d = jnp.repeat(d, 2, axis=-1)
    d = jnp.maximum(conv1d_ncl(d, p["dw1"], p["db1"]), 0.0)
    d = jnp.repeat(d, 2, axis=-1)
    d = conv1d_ncl(d, p["dw2"], p["db2"])
    return jnp.transpose(d, (0, 2, 1))                 # (B, L, n_ch)


# --------------------------------- main ----------------------------------

if __name__ == "__main__":
    B, seq_len, n_channels = 64, 16, 4      # 4 batch tiles of 16 -> 4 grid steps
    latent_dim = 32
    hidden_dims = [16, 32]

    key = jax.random.PRNGKey(0)
    k_x, k_p = jax.random.split(key)
    x = jax.random.normal(k_x, (B, seq_len, n_channels), dtype=jnp.float32)

    params = init_params(k_p, seq_len, n_channels, latent_dim, hidden_dims)
    kparams = to_kernel_params(params, seq_len, latent_dim, hidden_dims)

    out = time_series_conv_ae(x, kparams, batch_tile=16)
    out = jax.block_until_ready(out)

    ref = reference_forward(x, params, hidden_dims)
    assert out.shape == (B, seq_len, n_channels), out.shape
    # bf16 MXU operands with f32 accumulation -> slightly looser tolerance.
    max_err = float(jnp.max(jnp.abs(out - ref)))
    assert max_err < 2e-2, f"max abs error {max_err}"

    print("KERNEL_OK")
</pallas_src>

<mosaic_0001>
module attributes {stable_mosaic.version = 11 : i64} {
  func.func @_ae_kernel(%arg0: i32, %arg1: memref<256x4xf32, #tpu.memory_space<vmem>>, %arg2: memref<3x4x16xbf16, #tpu.memory_space<vmem>>, %arg3: memref<1x16xf32, #tpu.memory_space<vmem>>, %arg4: memref<3x16x32xbf16, #tpu.memory_space<vmem>>, %arg5: memref<1x32xf32, #tpu.memory_space<vmem>>, %arg6: memref<4x32x32xbf16, #tpu.memory_space<vmem>>, %arg7: memref<1x32xf32, #tpu.memory_space<vmem>>, %arg8: memref<32x128xbf16, #tpu.memory_space<vmem>>, %arg9: memref<1x128xf32, #tpu.memory_space<vmem>>, %arg10: memref<3x32x16xbf16, #tpu.memory_space<vmem>>, %arg11: memref<1x16xf32, #tpu.memory_space<vmem>>, %arg12: memref<3x4x16xbf16, #tpu.memory_space<vmem>>, %arg13: memref<4x1xf32, #tpu.memory_space<vmem>>, %arg14: memref<256x256xbf16, #tpu.memory_space<vmem>>, %arg15: memref<128x256xbf16, #tpu.memory_space<vmem>>, %arg16: memref<128x256xbf16, #tpu.memory_space<vmem>>, %arg17: memref<64x128xbf16, #tpu.memory_space<vmem>>, %arg18: memref<64x128xbf16, #tpu.memory_space<vmem>>, %arg19: memref<128x64xbf16, #tpu.memory_space<vmem>>, %arg20: memref<256x128xbf16, #tpu.memory_space<vmem>>, %arg21: memref<1x4x256xf32, #tpu.memory_space<vmem>>, %arg22: memref<288x32xbf16, #tpu.memory_space<vmem>>) attributes {dimension_semantics = [#tpu.dimension_semantics<parallel>], iteration_bounds = array<i64: 4>, scalar_prefetch = 0 : i64, scratch_operands = 1 : i64, tpu.core_type = #tpu.core_type<tc>, window_params = [{transform_indices = @transform_0, window_bounds = array<i64: 256, 4>}, {pipeline_mode = #tpu.pipeline_mode<synchronous>, transform_indices = @transform_1, window_bounds = array<i64: 3, 4, 16>}, {pipeline_mode = #tpu.pipeline_mode<synchronous>, transform_indices = @transform_2, window_bounds = array<i64: 1, 16>}, {pipeline_mode = #tpu.pipeline_mode<synchronous>, transform_indices = @transform_3, window_bounds = array<i64: 3, 16, 32>}, {pipeline_mode = #tpu.pipeline_mode<synchronous>, transform_indices = @transform_4, window_bounds = array<i64: 1, 32>}, {pipeline_mode = #tpu.pipeline_mode<synchronous>, transform_indices = @transform_5, window_bounds = array<i64: 4, 32, 32>}, {pipeline_mode = #tpu.pipeline_mode<synchronous>, transform_indices = @transform_6, window_bounds = array<i64: 1, 32>}, {pipeline_mode = #tpu.pipeline_mode<synchronous>, transform_indices = @transform_7, window_bounds = array<i64: 32, 128>}, {pipeline_mode = #tpu.pipeline_mode<synchronous>, transform_indices = @transform_8, window_bounds = array<i64: 1, 128>}, {pipeline_mode = #tpu.pipeline_mode<synchronous>, transform_indices = @transform_9, window_bounds = array<i64: 3, 32, 16>}, {pipeline_mode = #tpu.pipeline_mode<synchronous>, transform_indices = @transform_10, window_bounds = array<i64: 1, 16>}, {pipeline_mode = #tpu.pipeline_mode<synchronous>, transform_indices = @transform_11, window_bounds = array<i64: 3, 4, 16>}, {pipeline_mode = #tpu.pipeline_mode<synchronous>, transform_indices = @transform_12, window_bounds = array<i64: 4, 1>}, {pipeline_mode = #tpu.pipeline_mode<synchronous>, transform_indices = @transform_13, window_bounds = array<i64: 256, 256>}, {pipeline_mode = #tpu.pipeline_mode<synchronous>, transform_indices = @transform_14, window_bounds = array<i64: 128, 256>}, {pipeline_mode = #tpu.pipeline_mode<synchronous>, transform_indices = @transform_15, window_bounds = array<i64: 128, 256>}, {pipeline_mode = #tpu.pipeline_mode<synchronous>, transform_indices = @transform_16, window_bounds = array<i64: 64, 128>}, {pipeline_mode = #tpu.pipeline_mode<synchronous>, transform_indices = @transform_17, window_bounds = array<i64: 64, 128>}, {pipeline_mode = #tpu.pipeline_mode<synchronous>, transform_indices = @transform_18, window_bounds = array<i64: 128, 64>}, {pipeline_mode = #tpu.pipeline_mode<synchronous>, transform_indices = @transform_19, window_bounds = array<i64: 256, 128>}, {transform_indices = @transform_20, window_bounds = array<i64: 1, 4, 256>}]} {
    %c0 = arith.constant 0 : index
    %c0_0 = arith.constant 0 : index
    %0 = vector.load %arg14[%c0, %c0_0] : memref<256x256xbf16, #tpu.memory_space<vmem>>, vector<256x256xbf16>
    %c0_1 = arith.constant 0 : index
    %c0_2 = arith.constant 0 : index
    %1 = vector.load %arg1[%c0_1, %c0_2] : memref<256x4xf32, #tpu.memory_space<vmem>>, vector<256x4xf32>
    %2 = arith.truncf %1 : vector<256x4xf32> to vector<256x4xbf16>
    %cst = arith.constant dense<0.000000e+00> : vector<256x4xf32>
    %3 = tpu.matmul %0, %2, %cst {dimension_numbers = #tpu.dot_dimension_numbers<[1], [0], [0], [1], [0, 0, 1, 1], [], []>} : vector<256x256xbf16>, vector<256x4xbf16>, vector<256x4xf32> -> vector<256x4xf32>
    %c0_3 = arith.constant 0 : index
    %c0_4 = arith.constant 0 : index
    %4 = vector.load %arg3[%c0_3, %c0_4] : memref<1x16xf32, #tpu.memory_space<vmem>>, vector<1x16xf32>
    %cst_5 = arith.constant 0.000000e+00 : bf16
    %5 = vector.broadcast %cst_5 : bf16 to vector<16x4xbf16>
    %c0_6 = arith.constant 0 : index
    %c0_7 = arith.constant 0 : index
    %6 = vector.load %arg22[%c0_6, %c0_7] : memref<288x32xbf16, #tpu.memory_space<vmem>>, vector<16x4xbf16>
    tpu.vector_store %arg22[%c0_6, %c0_7], %5 {strides = array<i32>} : memref<288x32xbf16, #tpu.memory_space<vmem>>, vector<16x4xbf16>,
    %c272 = arith.constant 272 : index
    %c0_8 = arith.constant 0 : index
    %7 = vector.load %arg22[%c272, %c0_8] : memref<288x32xbf16, #tpu.memory_space<vmem>>, vector<16x4xbf16>
    tpu.vector_store %arg22[%c272, %c0_8], %5 {strides = array<i32>} : memref<288x32xbf16, #tpu.memory_space<vmem>>, vector<16x4xbf16>,
    %8 = arith.truncf %3 : vector<256x4xf32> to vector<256x4xbf16>
    %c16 = arith.constant 16 : index
    %c0_9 = arith.constant 0 : index
    %9 = vector.load %arg22[%c16, %c0_9] : memref<288x32xbf16, #tpu.memory_space<vmem>>, vector<256x4xbf16>
    tpu.vector_store %arg22[%c16, %c0_9], %8 {strides = array<i32>} : memref<288x32xbf16, #tpu.memory_space<vmem>>, vector<256x4xbf16>,
    %c0_10 = arith.constant 0 : index
    %c0_11 = arith.constant 0 : index
    %10 = vector.load %arg22[%c0_10, %c0_11] : memref<288x32xbf16, #tpu.memory_space<vmem>>, vector<256x4xbf16>
    %c16_12 = arith.constant 16 : index
    %c0_13 = arith.constant 0 : index
    %11 = vector.load %arg22[%c16_12, %c0_13] : memref<288x32xbf16, #tpu.memory_space<vmem>>, vector<256x4xbf16>
    %c32 = arith.constant 32 : index
    %c0_14 = arith.constant 0 : index
    %12 = vector.load %arg22[%c32, %c0_14] : memref<288x32xbf16, #tpu.memory_space<vmem>>, vector<256x4xbf16>
    %c0_15 = arith.constant 0 : index
    %c0_16 = arith.constant 0 : index
    %c0_17 = arith.constant 0 : index
    %13 = vector.load %arg2[%c0_15, %c0_16, %c0_17] : memref<3x4x16xbf16, #tpu.memory_space<vmem>>, vector<1x4x16xbf16>
    %14 = vector.shape_cast %13 : vector<1x4x16xbf16> to vector<4x16xbf16>
    %cst_18 = arith.constant dense<0.000000e+00> : vector<256x16xf32>
    %15 = tpu.matmul %10, %14, %cst_18 {dimension_numbers = #tpu.dot_dimension_numbers<[1], [0], [0], [1], [0, 0, 1, 1], [], []>} : vector<256x4xbf16>, vector<4x16xbf16>, vector<256x16xf32> -> vector<256x16xf32>
    %16 = vector.broadcast %4 : vector<1x16xf32> to vector<256x16xf32>
    %17 = arith.addf %16, %15 : vector<256x16xf32>
    %c1 = arith.constant 1 : index
    %c0_19 = arith.constant 0 : index
    %c0_20 = arith.constant 0 : index
    %18 = vector.load %arg2[%c1, %c0_19, %c0_20] : memref<3x4x16xbf16, #tpu.memory_space<vmem>>, vector<1x4x16xbf16>
    %19 = vector.shape_cast %18 : vector<1x4x16xbf16> to vector<4x16xbf16>
    %cst_21 = arith.constant dense<0.000000e+00> : vector<256x16xf32>
    %20 = tpu.matmul %11, %19, %cst_21 {dimension_numbers = #tpu.dot_dimension_numbers<[1], [0], [0], [1], [0, 0, 1, 1], [], []>} : vector<256x4xbf16>, vector<4x16xbf16>, vector<256x16xf32> -> vector<256x16xf32>
    %21 = arith.addf %17, %20 : vector<256x16xf32>
    %c2 = arith.constant 2 : index
    %c0_22 = arith.constant 0 : index
    %c0_23 = arith.constant 0 : index
    %22 = vector.load %arg2[%c2, %c0_22, %c0_23] : memref<3x4x16xbf16, #tpu.memory_space<vmem>>, vector<1x4x16xbf16>
    %23 = vector.shape_cast %22 : vector<1x4x16xbf16> to vector<4x16xbf16>
    %cst_24 = arith.constant dense<0.000000e+00> : vector<256x16xf32>
    %24 = tpu.matmul %12, %23, %cst_24 {dimension_numbers = #tpu.dot_dimension_numbers<[1], [0], [0], [1], [0, 0, 1, 1], [], []>} : vector<256x4xbf16>, vector<4x16xbf16>, vector<256x16xf32> -> vector<256x16xf32>
    %25 = arith.addf %21, %24 : vector<256x16xf32>
    %cst_25 = arith.constant 0.000000e+00 : f32
    %26 = vector.broadcast %cst_25 : f32 to vector<256x16xf32>
    %27 = arith.maximumf %25, %26 : vector<256x16xf32>
    %28 = arith.truncf %27 : vector<256x16xf32> to vector<256x16xbf16>
    %c0_26 = arith.constant 0 : index
    %c0_27 = arith.constant 0 : index
    %29 = vector.load %arg15[%c0_26, %c0_27] : memref<128x256xbf16, #tpu.memory_space<vmem>>, vector<128x256xbf16>
    %cst_28 = arith.constant dense<0.000000e+00> : vector<128x16xf32>
    %30 = tpu.matmul %29, %28, %cst_28 {dimension_numbers = #tpu.dot_dimension_numbers<[1], [0], [0], [1], [0, 0, 1, 1], [], []>} : vector<128x256xbf16>, vector<256x16xbf16>, vector<128x16xf32> -> vector<128x16xf32>
    %c0_29 = arith.constant 0 : index
    %c0_30 = arith.constant 0 : index
    %31 = vector.load %arg16[%c0_29, %c0_30] : memref<128x256xbf16, #tpu.memory_space<vmem>>, vector<128x256xbf16>
    %cst_31 = arith.constant dense<0.000000e+00> : vector<128x16xf32>
    %32 = tpu.matmul %31, %28, %cst_31 {dimension_numbers = #tpu.dot_dimension_numbers<[1], [0], [0], [1], [0, 0, 1, 1], [], []>} : vector<128x256xbf16>, vector<256x16xbf16>, vector<128x16xf32> -> vector<128x16xf32>
    %33 = arith.maximumf %30, %32 : vector<128x16xf32>
    %c0_32 = arith.constant 0 : index
    %c0_33 = arith.constant 0 : index
    %34 = vector.load %arg5[%c0_32, %c0_33] : memref<1x32xf32, #tpu.memory_space<vmem>>, vector<1x32xf32>
    %cst_34 = arith.constant 0.000000e+00 : bf16
    %35 = vector.broadcast %cst_34 : bf16 to vector<16x16xbf16>
    %c0_35 = arith.constant 0 : index
    %c0_36 = arith.constant 0 : index
    %36 = vector.load %arg22[%c0_35, %c0_36] : memref<288x32xbf16, #tpu.memory_space<vmem>>, vector<16x16xbf16>
    tpu.vector_store %arg22[%c0_35, %c0_36], %35 {strides = array<i32>} : memref<288x32xbf16, #tpu.memory_space<vmem>>, vector<16x16xbf16>,
    %c144 = arith.constant 144 : index
    %c0_37 = arith.constant 0 : index
    %37 = vector.load %arg22[%c144, %c0_37] : memref<288x32xbf16, #tpu.memory_space<vmem>>, vector<16x16xbf16>
    tpu.vector_store %arg22[%c144, %c0_37], %35 {strides = array<i32>} : memref<288x32xbf16, #tpu.memory_space<vmem>>, vector<16x16xbf16>,
    %38 = arith.truncf %33 : vector<128x16xf32> to vector<128x16xbf16>
    %c16_38 = arith.constant 16 : index
    %c0_39 = arith.constant 0 : index
    %39 = vector.load %arg22[%c16_38, %c0_39] : memref<288x32xbf16, #tpu.memory_space<vmem>>, vector<128x16xbf16>
    tpu.vector_store %arg22[%c16_38, %c0_39], %38 {strides = array<i32>} : memref<288x32xbf16, #tpu.memory_space<vmem>>, vector<128x16xbf16>,
    %c0_40 = arith.constant 0 : index
    %c0_41 = arith.constant 0 : index
    %40 = vector.load %arg22[%c0_40, %c0_41] : memref<288x32xbf16, #tpu.memory_space<vmem>>, vector<128x16xbf16>
    %c16_42 = arith.constant 16 : index
    %c0_43 = arith.constant 0 : index
    %41 = vector.load %arg22[%c16_42, %c0_43] : memref<288x32xbf16, #tpu.memory_space<vmem>>, vector<128x16xbf16>
    %c32_44 = arith.constant 32 : index
    %c0_45 = arith.constant 0 : index
    %42 = vector.load %arg22[%c32_44, %c0_45] : memref<288x32xbf16, #tpu.memory_space<vmem>>, vector<128x16xbf16>
    %c0_46 = arith.constant 0 : index
    %c0_47 = arith.constant 0 : index
    %c0_48 = arith.constant 0 : index
    %43 = vector.load %arg4[%c0_46, %c0_47, %c0_48] : memref<3x16x32xbf16, #tpu.memory_space<vmem>>, vector<1x16x32xbf16>
    %44 = vector.shape_cast %43 : vector<1x16x32xbf16> to vector<16x32xbf16>
    %cst_49 = arith.constant dense<0.000000e+00> : vector<128x32xf32>
    %45 = tpu.matmul %40, %44, %cst_49 {dimension_numbers = #tpu.dot_dimension_numbers<[1], [0], [0], [1], [0, 0, 1, 1], [], []>} : vector<128x16xbf16>, vector<16x32xbf16>, vector<128x32xf32> -> vector<128x32xf32>
    %46 = vector.broadcast %34 : vector<1x32xf32> to vector<128x32xf32>
    %47 = arith.addf %46, %45 : vector<128x32xf32>
    %c1_50 = arith.constant 1 : index
    %c0_51 = arith.constant 0 : index
    %c0_52 = arith.constant 0 : index
    %48 = vector.load %arg4[%c1_50, %c0_51, %c0_52] : memref<3x16x32xbf16, #tpu.memory_space<vmem>>, vector<1x16x32xbf16>
    %49 = vector.shape_cast %48 : vector<1x16x32xbf16> to vector<16x32xbf16>
    %cst_53 = arith.constant dense<0.000000e+00> : vector<128x32xf32>
    %50 = tpu.matmul %41, %49, %cst_53 {dimension_numbers = #tpu.dot_dimension_numbers<[1], [0], [0], [1], [0, 0, 1, 1], [], []>} : vector<128x16xbf16>, vector<16x32xbf16>, vector<128x32xf32> -> vector<128x32xf32>
    %51 = arith.addf %47, %50 : vector<128x32xf32>
    %c2_54 = arith.constant 2 : index
    %c0_55 = arith.constant 0 : index
    %c0_56 = arith.constant 0 : index
    %52 = vector.load %arg4[%c2_54, %c0_55, %c0_56] : memref<3x16x32xbf16, #tpu.memory_space<vmem>>, vector<1x16x32xbf16>
    %53 = vector.shape_cast %52 : vector<1x16x32xbf16> to vector<16x32xbf16>
    %cst_57 = arith.constant dense<0.000000e+00> : vector<128x32xf32>
    %54 = tpu.matmul %42, %53, %cst_57 {dimension_numbers = #tpu.dot_dimension_numbers<[1], [0], [0], [1], [0, 0, 1, 1], [], []>} : vector<128x16xbf16>, vector<16x32xbf16>, vector<128x32xf32> -> vector<128x32xf32>
    %55 = arith.addf %51, %54 : vector<128x32xf32>
    %cst_58 = arith.constant 0.000000e+00 : f32
    %56 = vector.broadcast %cst_58 : f32 to vector<128x32xf32>
    %57 = arith.maximumf %55, %56 : vector<128x32xf32>
    %58 = arith.truncf %57 : vector<128x32xf32> to vector<128x32xbf16>
    %c0_59 = arith.constant 0 : index
    %c0_60 = arith.constant 0 : index
    %59 = vector.load %arg17[%c0_59, %c0_60] : memref<64x128xbf16, #tpu.memory_space<vmem>>, vector<64x128xbf16>
    %cst_61 = arith.constant dense<0.000000e+00> : vector<64x32xf32>
    %60 = tpu.matmul %59, %58, %cst_61 {dimension_numbers = #tpu.dot_dimension_numbers<[1], [0], [0], [1], [0, 0, 1, 1], [], []>} : vector<64x128xbf16>, vector<128x32xbf16>, vector<64x32xf32> -> vector<64x32xf32>
    %c0_62 = arith.constant 0 : index
    %c0_63 = arith.constant 0 : index
    %61 = vector.load %arg18[%c0_62, %c0_63] : memref<64x128xbf16, #tpu.memory_space<vmem>>, vector<64x128xbf16>
    %cst_64 = arith.constant dense<0.000000e+00> : vector<64x32xf32>
    %62 = tpu.matmul %61, %58, %cst_64 {dimension_numbers = #tpu.dot_dimension_numbers<[1], [0], [0], [1], [0, 0, 1, 1], [], []>} : vector<64x128xbf16>, vector<128x32xbf16>, vector<64x32xf32> -> vector<64x32xf32>
    %63 = arith.maximumf %60, %62 : vector<64x32xf32>
    %c0_65 = arith.constant 0 : index
    %c0_66 = arith.constant 0 : index
    %64 = vector.load %arg7[%c0_65, %c0_66] : memref<1x32xf32, #tpu.memory_space<vmem>>, vector<1x32xf32>
    %65 = vector.extract_strided_slice %63 {offsets = [0, 0], sizes = [16, 32], strides = [1, 1]} : vector<64x32xf32> to vector<16x32xf32>
    %66 = arith.truncf %65 : vector<16x32xf32> to vector<16x32xbf16>
    %c0_67 = arith.constant 0 : index
    %c0_68 = arith.constant 0 : index
    %c0_69 = arith.constant 0 : index
    %67 = vector.load %arg6[%c0_67, %c0_68, %c0_69] : memref<4x32x32xbf16, #tpu.memory_space<vmem>>, vector<1x32x32xbf16>
    %68 = vector.shape_cast %67 : vector<1x32x32xbf16> to vector<32x32xbf16>
    %cst_70 = arith.constant dense<0.000000e+00> : vector<16x32xf32>
    %69 = tpu.matmul %66, %68, %cst_70 {dimension_numbers = #tpu.dot_dimension_numbers<[1], [0], [0], [1], [0, 0, 1, 1], [], []>} : vector<16x32xbf16>, vector<32x32xbf16>, vector<16x32xf32> -> vector<16x32xf32>
    %70 = vector.broadcast %64 : vector<1x32xf32> to vector<16x32xf32>
    %71 = arith.addf %70, %69 : vector<16x32xf32>
    %72 = vector.extract_strided_slice %63 {offsets = [16, 0], sizes = [16, 32], strides = [1, 1]} : vector<64x32xf32> to vector<16x32xf32>
    %73 = arith.truncf %72 : vector<16x32xf32> to vector<16x32xbf16>
    %c1_71 = arith.constant 1 : index
    %c0_72 = arith.constant 0 : index
    %c0_73 = arith.constant 0 : index
    %74 = vector.load %arg6[%c1_71, %c0_72, %c0_73] : memref<4x32x32xbf16, #tpu.memory_space<vmem>>, vector<1x32x32xbf16>
    %75 = vector.shape_cast %74 : vector<1x32x32xbf16> to vector<32x32xbf16>
    %cst_74 = arith.constant dense<0.000000e+00> : vector<16x32xf32>
    %76 = tpu.matmul %73, %75, %cst_74 {dimension_numbers = #tpu.dot_dimension_numbers<[1], [0], [0], [1], [0, 0, 1, 1], [], []>} : vector<16x32xbf16>, vector<32x32xbf16>, vector<16x32xf32> -> vector<16x32xf32>
    %77 = arith.addf %71, %76 : vector<16x32xf32>
    %78 = vector.extract_strided_slice %63 {offsets = [32, 0], sizes = [16, 32], strides = [1, 1]} : vector<64x32xf32> to vector<16x32xf32>
    %79 = arith.truncf %78 : vector<16x32xf32> to vector<16x32xbf16>
    %c2_75 = arith.constant 2 : index
    %c0_76 = arith.constant 0 : index
    %c0_77 = arith.constant 0 : index
    %80 = vector.load %arg6[%c2_75, %c0_76, %c0_77] : memref<4x32x32xbf16, #tpu.memory_space<vmem>>, vector<1x32x32xbf16>
    %81 = vector.shape_cast %80 : vector<1x32x32xbf16> to vector<32x32xbf16>
    %cst_78 = arith.constant dense<0.000000e+00> : vector<16x32xf32>
    %82 = tpu.matmul %79, %81, %cst_78 {dimension_numbers = #tpu.dot_dimension_numbers<[1], [0], [0], [1], [0, 0, 1, 1], [], []>} : vector<16x32xbf16>, vector<32x32xbf16>, vector<16x32xf32> -> vector<16x32xf32>
    %83 = arith.addf %77, %82 : vector<16x32xf32>
    %84 = vector.extract_strided_slice %63 {offsets = [48, 0], sizes = [16, 32], strides = [1, 1]} : vector<64x32xf32> to vector<16x32xf32>
    %85 = arith.truncf %84 : vector<16x32xf32> to vector<16x32xbf16>
    %c3 = arith.constant 3 : index
    %c0_79 = arith.constant 0 : index
    %c0_80 = arith.constant 0 : index
    %86 = vector.load %arg6[%c3, %c0_79, %c0_80] : memref<4x32x32xbf16, #tpu.memory_space<vmem>>, vector<1x32x32xbf16>
    %87 = vector.shape_cast %86 : vector<1x32x32xbf16> to vector<32x32xbf16>
    %cst_81 = arith.constant dense<0.000000e+00> : vector<16x32xf32>
    %88 = tpu.matmul %85, %87, %cst_81 {dimension_numbers = #tpu.dot_dimension_numbers<[1], [0], [0], [1], [0, 0, 1, 1], [], []>} : vector<16x32xbf16>, vector<32x32xbf16>, vector<16x32xf32> -> vector<16x32xf32>
    %89 = arith.addf %83, %88 : vector<16x32xf32>
    %90 = arith.truncf %89 : vector<16x32xf32> to vector<16x32xbf16>
    %c0_82 = arith.constant 0 : index
    %c0_83 = arith.constant 0 : index
    %91 = vector.load %arg8[%c0_82, %c0_83] : memref<32x128xbf16, #tpu.memory_space<vmem>>, vector<32x128xbf16>
    %cst_84 = arith.constant dense<0.000000e+00> : vector<16x128xf32>
    %92 = tpu.matmul %90, %91, %cst_84 {dimension_numbers = #tpu.dot_dimension_numbers<[1], [0], [0], [1], [0, 0, 1, 1], [], []>} : vector<16x32xbf16>, vector<32x128xbf16>, vector<16x128xf32> -> vector<16x128xf32>
    %c0_85 = arith.constant 0 : index
    %c0_86 = arith.constant 0 : index
    %93 = vector.load %arg9[%c0_85, %c0_86] : memref<1x128xf32, #tpu.memory_space<vmem>>, vector<1x128xf32>
    %94 = vector.broadcast %93 : vector<1x128xf32> to vector<16x128xf32>
    %95 = arith.addf %92, %94 : vector<16x128xf32>
    %96 = vector.extract_strided_slice %95 {offsets = [0, 0], sizes = [16, 32], strides = [1, 1]} : vector<16x128xf32> to vector<16x32xf32>
    %97 = vector.extract_strided_slice %95 {offsets = [0, 32], sizes = [16, 32], strides = [1, 1]} : vector<16x128xf32> to vector<16x32xf32>
    %98 = vector.extract_strided_slice %95 {offsets = [0, 64], sizes = [16, 32], strides = [1, 1]} : vector<16x128xf32> to vector<16x32xf32>
    %99 = vector.extract_strided_slice %95 {offsets = [0, 96], sizes = [16, 32], strides = [1, 1]} : vector<16x128xf32> to vector<16x32xf32>
    %100 = tpu.concatenate %96, %97, %98, %99 in 0 : vector<16x32xf32>, vector<16x32xf32>, vector<16x32xf32>, vector<16x32xf32> -> vector<64x32xf32>
    %c0_87 = arith.constant 0 : index
    %c0_88 = arith.constant 0 : index
    %101 = vector.load %arg19[%c0_87, %c0_88] : memref<128x64xbf16, #tpu.memory_space<vmem>>, vector<128x64xbf16>
    %102 = arith.truncf %100 : vector<64x32xf32> to vector<64x32xbf16>
    %cst_89 = arith.constant dense<0.000000e+00> : vector<128x32xf32>
    %103 = tpu.matmul %101, %102, %cst_89 {dimension_numbers = #tpu.dot_dimension_numbers<[1], [0], [0], [1], [0, 0, 1, 1], [], []>} : vector<128x64xbf16>, vector<64x32xbf16>, vector<128x32xf32> -> vector<128x32xf32>
    %c0_90 = arith.constant 0 : index
    %c0_91 = arith.constant 0 : index
    %104 = vector.load %arg11[%c0_90, %c0_91] : memref<1x16xf32, #tpu.memory_space<vmem>>, vector<1x16xf32>
    %cst_92 = arith.constant 0.000000e+00 : bf16
    %105 = vector.broadcast %cst_92 : bf16 to vector<16x32xbf16>
    %c0_93 = arith.constant 0 : index
    %c0_94 = arith.constant 0 : index
    %106 = vector.load %arg22[%c0_93, %c0_94] : memref<288x32xbf16, #tpu.memory_space<vmem>>, vector<16x32xbf16>
    tpu.vector_store %arg22[%c0_93, %c0_94], %105 {strides = array<i32>} : memref<288x32xbf16, #tpu.memory_space<vmem>>, vector<16x32xbf16>,
    %c144_95 = arith.constant 144 : index
    %c0_96 = arith.constant 0 : index
    %107 = vector.load %arg22[%c144_95, %c0_96] : memref<288x32xbf16, #tpu.memory_space<vmem>>, vector<16x32xbf16>
    tpu.vector_store %arg22[%c144_95, %c0_96], %105 {strides = array<i32>} : memref<288x32xbf16, #tpu.memory_space<vmem>>, vector<16x32xbf16>,
    %108 = arith.truncf %103 : vector<128x32xf32> to vector<128x32xbf16>
    %c16_97 = arith.constant 16 : index
    %c0_98 = arith.constant 0 : index
    %109 = vector.load %arg22[%c16_97, %c0_98] : memref<288x32xbf16, #tpu.memory_space<vmem>>, vector<128x32xbf16>
    tpu.vector_store %arg22[%c16_97, %c0_98], %108 {strides = array<i32>} : memref<288x32xbf16, #tpu.memory_space<vmem>>, vector<128x32xbf16>,
    %c0_99 = arith.constant 0 : index
    %c0_100 = arith.constant 0 : index
    %110 = vector.load %arg22[%c0_99, %c0_100] : memref<288x32xbf16, #tpu.memory_space<vmem>>, vector<128x32xbf16>
    %c16_101 = arith.constant 16 : index
    %c0_102 = arith.constant 0 : index
    %111 = vector.load %arg22[%c16_101, %c0_102] : memref<288x32xbf16, #tpu.memory_space<vmem>>, vector<128x32xbf16>
    %c32_103 = arith.constant 32 : index
    %c0_104 = arith.constant 0 : index
    %112 = vector.load %arg22[%c32_103, %c0_104] : memref<288x32xbf16, #tpu.memory_space<vmem>>, vector<128x32xbf16>
    %c0_105 = arith.constant 0 : index
    %c0_106 = arith.constant 0 : index
    %c0_107 = arith.constant 0 : index
    %113 = vector.load %arg10[%c0_105, %c0_106, %c0_107] : memref<3x32x16xbf16, #tpu.memory_space<vmem>>, vector<1x32x16xbf16>
    %114 = vector.shape_cast %113 : vector<1x32x16xbf16> to vector<32x16xbf16>
    %cst_108 = arith.constant dense<0.000000e+00> : vector<128x16xf32>
    %115 = tpu.matmul %110, %114, %cst_108 {dimension_numbers = #tpu.dot_dimension_numbers<[1], [0], [0], [1], [0, 0, 1, 1], [], []>} : vector<128x32xbf16>, vector<32x16xbf16>, vector<128x16xf32> -> vector<128x16xf32>
    %116 = vector.broadcast %104 : vector<1x16xf32> to vector<128x16xf32>
    %117 = arith.addf %116, %115 : vector<128x16xf32>
    %c1_109 = arith.constant 1 : index
    %c0_110 = arith.constant 0 : index
    %c0_111 = arith.constant 0 : index
    %118 = vector.load %arg10[%c1_109, %c0_110, %c0_111] : memref<3x32x16xbf16, #tpu.memory_space<vmem>>, vector<1x32x16xbf16>
    %119 = vector.shape_cast %118 : vector<1x32x16xbf16> to vector<32x16xbf16>
    %cst_112 = arith.constant dense<0.000000e+00> : vector<128x16xf32>
    %120 = tpu.matmul %111, %119, %cst_112 {dimension_numbers = #tpu.dot_dimension_numbers<[1], [0], [0], [1], [0, 0, 1, 1], [], []>} : vector<128x32xbf16>, vector<32x16xbf16>, vector<128x16xf32> -> vector<128x16xf32>
    %121 = arith.addf %117, %120 : vector<128x16xf32>
    %c2_113 = arith.constant 2 : index
    %c0_114 = arith.constant 0 : index
    %c0_115 = arith.constant 0 : index
    %122 = vector.load %arg10[%c2_113, %c0_114, %c0_115] : memref<3x32x16xbf16, #tpu.memory_space<vmem>>, vector<1x32x16xbf16>
    %123 = vector.shape_cast %122 : vector<1x32x16xbf16> to vector<32x16xbf16>
    %cst_116 = arith.constant dense<0.000000e+00> : vector<128x16xf32>
    %124 = tpu.matmul %112, %123, %cst_116 {dimension_numbers = #tpu.dot_dimension_numbers<[1], [0], [0], [1], [0, 0, 1, 1], [], []>} : vector<128x32xbf16>, vector<32x16xbf16>, vector<128x16xf32> -> vector<128x16xf32>
    %125 = arith.addf %121, %124 : vector<128x16xf32>
    %cst_117 = arith.constant 0.000000e+00 : f32
    %126 = vector.broadcast %cst_117 : f32 to vector<128x16xf32>
    %127 = arith.maximumf %125, %126 : vector<128x16xf32>
    %c0_118 = arith.constant 0 : index
    %c0_119 = arith.constant 0 : index
    %128 = vector.load %arg20[%c0_118, %c0_119] : memref<256x128xbf16, #tpu.memory_space<vmem>>, vector<256x128xbf16>
    %129 = arith.truncf %127 : vector<128x16xf32> to vector<128x16xbf16>
    %cst_120 = arith.constant dense<0.000000e+00> : vector<256x16xf32>
    %130 = tpu.matmul %128, %129, %cst_120 {dimension_numbers = #tpu.dot_dimension_numbers<[1], [0], [0], [1], [0, 0, 1, 1], [], []>} : vector<256x128xbf16>, vector<128x16xbf16>, vector<256x16xf32> -> vector<256x16xf32>
    %c0_121 = arith.constant 0 : index
    %c0_122 = arith.constant 0 : index
    %131 = vector.load %arg13[%c0_121, %c0_122] : memref<4x1xf32, #tpu.memory_space<vmem>>, vector<4x1xf32>
    %cst_123 = arith.constant 0.000000e+00 : bf16
    %132 = vector.broadcast %cst_123 : bf16 to vector<16x16xbf16>
    %c0_124 = arith.constant 0 : index
    %c0_125 = arith.constant 0 : index
    %133 = vector.load %arg22[%c0_124, %c0_125] : memref<288x32xbf16, #tpu.memory_space<vmem>>, vector<16x16xbf16>
    tpu.vector_store %arg22[%c0_124, %c0_125], %132 {strides = array<i32>} : memref<288x32xbf16, #tpu.memory_space<vmem>>, vector<16x16xbf16>,
    %c272_126 = arith.constant 272 : index
    %c0_127 = arith.constant 0 : index
    %134 = vector.load %arg22[%c272_126, %c0_127] : memref<288x32xbf16, #tpu.memory_space<vmem>>, vector<16x16xbf16>
    tpu.vector_store %arg22[%c272_126, %c0_127], %132 {strides = array<i32>} : memref<288x32xbf16, #tpu.memory_space<vmem>>, vector<16x16xbf16>,
    %135 = arith.truncf %130 : vector<256x16xf32> to vector<256x16xbf16>
    %c16_128 = arith.constant 16 : index
    %c0_129 = arith.constant 0 : index
    %136 = vector.load %arg22[%c16_128, %c0_129] : memref<288x32xbf16, #tpu.memory_space<vmem>>, vector<256x16xbf16>
    tpu.vector_store %arg22[%c16_128, %c0_129], %135 {strides = array<i32>} : memref<288x32xbf16, #tpu.memory_space<vmem>>, vector<256x16xbf16>,
    %c0_130 = arith.constant 0 : index
    %c0_131 = arith.constant 0 : index
    %137 = vector.load %arg22[%c0_130, %c0_131] : memref<288x32xbf16, #tpu.memory_space<vmem>>, vector<256x16xbf16>
    %c16_132 = arith.constant 16 : index
    %c0_133 = arith.constant 0 : index
    %138 = vector.load %arg22[%c16_132, %c0_133] : memref<288x32xbf16, #tpu.memory_space<vmem>>, vector<256x16xbf16>
    %c32_134 = arith.constant 32 : index
    %c0_135 = arith.constant 0 : index
    %139 = vector.load %arg22[%c32_134, %c0_135] : memref<288x32xbf16, #tpu.memory_space<vmem>>, vector<256x16xbf16>
    %c0_136 = arith.constant 0 : index
    %c0_137 = arith.constant 0 : index
    %c0_138 = arith.constant 0 : index
    %140 = vector.load %arg12[%c0_136, %c0_137, %c0_138] : memref<3x4x16xbf16, #tpu.memory_space<vmem>>, vector<1x4x16xbf16>
    %141 = vector.shape_cast %140 : vector<1x4x16xbf16> to vector<4x16xbf16>
    %cst_139 = arith.constant dense<0.000000e+00> : vector<4x256xf32>
    %142 = tpu.matmul %141, %137, %cst_139 {dimension_numbers = #tpu.dot_dimension_numbers<[1], [1], [0], [0], [0, 0, 1, 0], [], []>} : vector<4x16xbf16>, vector<256x16xbf16>, vector<4x256xf32> -> vector<4x256xf32>
    %143 = vector.broadcast %131 : vector<4x1xf32> to vector<4x256xf32>
    %144 = arith.addf %143, %142 : vector<4x256xf32>
    %c1_140 = arith.constant 1 : index
    %c0_141 = arith.constant 0 : index
    %c0_142 = arith.constant 0 : index
    %145 = vector.load %arg12[%c1_140, %c0_141, %c0_142] : memref<3x4x16xbf16, #tpu.memory_space<vmem>>, vector<1x4x16xbf16>
    %146 = vector.shape_cast %145 : vector<1x4x16xbf16> to vector<4x16xbf16>
    %cst_143 = arith.constant dense<0.000000e+00> : vector<4x256xf32>
    %147 = tpu.matmul %146, %138, %cst_143 {dimension_numbers = #tpu.dot_dimension_numbers<[1], [1], [0], [0], [0, 0, 1, 0], [], []>} : vector<4x16xbf16>, vector<256x16xbf16>, vector<4x256xf32> -> vector<4x256xf32>
    %148 = arith.addf %144, %147 : vector<4x256xf32>
    %c2_144 = arith.constant 2 : index
    %c0_145 = arith.constant 0 : index
    %c0_146 = arith.constant 0 : index
    %149 = vector.load %arg12[%c2_144, %c0_145, %c0_146] : memref<3x4x16xbf16, #tpu.memory_space<vmem>>, vector<1x4x16xbf16>
    %150 = vector.shape_cast %149 : vector<1x4x16xbf16> to vector<4x16xbf16>
    %cst_147 = arith.constant dense<0.000000e+00> : vector<4x256xf32>
    %151 = tpu.matmul %150, %139, %cst_147 {dimension_numbers = #tpu.dot_dimension_numbers<[1], [1], [0], [0], [0, 0, 1, 0], [], []>} : vector<4x16xbf16>, vector<256x16xbf16>, vector<4x256xf32> -> vector<4x256xf32>
    %152 = arith.addf %148, %151 : vector<4x256xf32>
    %c0_148 = arith.constant 0 : index
    %c0_149 = arith.constant 0 : index
    %c0_150 = arith.constant 0 : index
    %153 = vector.load %arg21[%c0_148, %c0_149, %c0_150] : memref<1x4x256xf32, #tpu.memory_space<vmem>>, vector<1x4x256xf32>
    %154 = vector.shape_cast %153 : vector<1x4x256xf32> to vector<4x256xf32>
    %155 = vector.shape_cast %152 : vector<4x256xf32> to vector<1x4x256xf32>
    tpu.vector_store %arg21[%c0_148, %c0_149, %c0_150], %155 {strides = array<i32>} : memref<1x4x256xf32, #tpu.memory_space<vmem>>, vector<1x4x256xf32>,
    return
  }
  func.func @transform_0(%arg0: i32) -> (i32, i32) {
    %c0_i32 = arith.constant 0 : i32
    %c0_i32_0 = arith.constant 0 : i32
    return %arg0, %c0_i32 : i32, i32
  }
  func.func @transform_1(%arg0: i32) -> (i32, i32, i32) {
    %c0_i32 = arith.constant 0 : i32
    %c0_i32_0 = arith.constant 0 : i32
    %c0_i32_1 = arith.constant 0 : i32
    %c0_i32_2 = arith.constant 0 : i32
    return %c0_i32, %c0_i32_0, %c0_i32_1 : i32, i32, i32
  }
  func.func @transform_2(%arg0: i32) -> (i32, i32) {
    %c0_i32 = arith.constant 0 : i32
    %c0_i32_0 = arith.constant 0 : i32
    %c0_i32_1 = arith.constant 0 : i32
    return %c0_i32, %c0_i32_0 : i32, i32
  }
  func.func @transform_3(%arg0: i32) -> (i32, i32, i32) {
    %c0_i32 = arith.constant 0 : i32
    %c0_i32_0 = arith.constant 0 : i32
    %c0_i32_1 = arith.constant 0 : i32
    %c0_i32_2 = arith.constant 0 : i32
    return %c0_i32, %c0_i32_0, %c0_i32_1 : i32, i32, i32
  }
  func.func @transform_4(%arg0: i32) -> (i32, i32) {
    %c0_i32 = arith.constant 0 : i32
    %c0_i32_0 = arith.constant 0 : i32
    %c0_i32_1 = arith.constant 0 : i32
    return %c0_i32, %c0_i32_0 : i32, i32
  }
  func.func @transform_5(%arg0: i32) -> (i32, i32, i32) {
    %c0_i32 = arith.constant 0 : i32
    %c0_i32_0 = arith.constant 0 : i32
    %c0_i32_1 = arith.constant 0 : i32
    %c0_i32_2 = arith.constant 0 : i32
    return %c0_i32, %c0_i32_0, %c0_i32_1 : i32, i32, i32
  }
  func.func @transform_6(%arg0: i32) -> (i32, i32) {
    %c0_i32 = arith.constant 0 : i32
    %c0_i32_0 = arith.constant 0 : i32
    %c0_i32_1 = arith.constant 0 : i32
    return %c0_i32, %c0_i32_0 : i32, i32
  }
  func.func @transform_7(%arg0: i32) -> (i32, i32) {
    %c0_i32 = arith.constant 0 : i32
    %c0_i32_0 = arith.constant 0 : i32
    %c0_i32_1 = arith.constant 0 : i32
    return %c0_i32, %c0_i32_0 : i32, i32
  }
  func.func @transform_8(%arg0: i32) -> (i32, i32) {
    %c0_i32 = arith.constant 0 : i32
    %c0_i32_0 = arith.constant 0 : i32
    %c0_i32_1 = arith.constant 0 : i32
    return %c0_i32, %c0_i32_0 : i32, i32
  }
  func.func @transform_9(%arg0: i32) -> (i32, i32, i32) {
    %c0_i32 = arith.constant 0 : i32
    %c0_i32_0 = arith.constant 0 : i32
    %c0_i32_1 = arith.constant 0 : i32
    %c0_i32_2 = arith.constant 0 : i32
    return %c0_i32, %c0_i32_0, %c0_i32_1 : i32, i32, i32
  }
  func.func @transform_10(%arg0: i32) -> (i32, i32) {
    %c0_i32 = arith.constant 0 : i32
    %c0_i32_0 = arith.constant 0 : i32
    %c0_i32_1 = arith.constant 0 : i32
    return %c0_i32, %c0_i32_0 : i32, i32
  }
  func.func @transform_11(%arg0: i32) -> (i32, i32, i32) {
    %c0_i32 = arith.constant 0 : i32
    %c0_i32_0 = arith.constant 0 : i32
    %c0_i32_1 = arith.constant 0 : i32
    %c0_i32_2 = arith.constant 0 : i32
    return %c0_i32, %c0_i32_0, %c0_i32_1 : i32, i32, i32
  }
  func.func @transform_12(%arg0: i32) -> (i32, i32) {
    %c0_i32 = arith.constant 0 : i32
    %c0_i32_0 = arith.constant 0 : i32
    %c0_i32_1 = arith.constant 0 : i32
    return %c0_i32, %c0_i32_0 : i32, i32
  }
  func.func @transform_13(%arg0: i32) -> (i32, i32) {
    %c0_i32 = arith.constant 0 : i32
    %c0_i32_0 = arith.constant 0 : i32
    %c0_i32_1 = arith.constant 0 : i32
    return %c0_i32, %c0_i32_0 : i32, i32
  }
  func.func @transform_14(%arg0: i32) -> (i32, i32) {
    %c0_i32 = arith.constant 0 : i32
    %c0_i32_0 = arith.constant 0 : i32
    %c0_i32_1 = arith.constant 0 : i32
    return %c0_i32, %c0_i32_0 : i32, i32
  }
  func.func @transform_15(%arg0: i32) -> (i32, i32) {
    %c0_i32 = arith.constant 0 : i32
    %c0_i32_0 = arith.constant 0 : i32
    %c0_i32_1 = arith.constant 0 : i32
    return %c0_i32, %c0_i32_0 : i32, i32
  }
  func.func @transform_16(%arg0: i32) -> (i32, i32) {
    %c0_i32 = arith.constant 0 : i32
    %c0_i32_0 = arith.constant 0 : i32
    %c0_i32_1 = arith.constant 0 : i32
    return %c0_i32, %c0_i32_0 : i32, i32
  }
  func.func @transform_17(%arg0: i32) -> (i32, i32) {
    %c0_i32 = arith.constant 0 : i32
    %c0_i32_0 = arith.constant 0 : i32
    %c0_i32_1 = arith.constant 0 : i32
    return %c0_i32, %c0_i32_0 : i32, i32
  }
  func.func @transform_18(%arg0: i32) -> (i32, i32) {
    %c0_i32 = arith.constant 0 : i32
    %c0_i32_0 = arith.constant 0 : i32
    %c0_i32_1 = arith.constant 0 : i32
    return %c0_i32, %c0_i32_0 : i32, i32
  }
  func.func @transform_19(%arg0: i32) -> (i32, i32) {
    %c0_i32 = arith.constant 0 : i32
    %c0_i32_0 = arith.constant 0 : i32
    %c0_i32_1 = arith.constant 0 : i32
    return %c0_i32, %c0_i32_0 : i32, i32
  }
  func.func @transform_20(%arg0: i32) -> (i32, i32, i32) {
    %c0_i32 = arith.constant 0 : i32
    %c0_i32_0 = arith.constant 0 : i32
    %c0_i32_1 = arith.constant 0 : i32
    return %arg0, %c0_i32, %c0_i32_0 : i32, i32, i32
  }
}

</mosaic_0001>

<bundles_post_ra>
// kernel: tpu_custom_call.1
= control target key start
LH: loop header
LB: loop body
LE: loop exit
PB: predicated region body
PF: predicated region fallthrough
CT: control target
= control target key end

     0   :  { %s7208_s0 = inlined_call_operand.vmem [shape: f32[1024,4], index: 0, kind: input, shape index: {}]   ;;  %s7209_s1 = inlined_call_operand.vmem [shape: bf16[3,4,16], index: 1, kind: input, shape index: {}]   ;;  %s7210_s2 = inlined_call_operand.vmem [shape: f32[1,16], index: 2, kind: input, shape index: {}]   ;;  %s7211_s3 = inlined_call_operand.vmem [shape: bf16[3,16,32], index: 3, kind: input, shape index: {}]   ;;  %s7212_s4 = inlined_call_operand.vmem [shape: f32[1,32], index: 4, kind: input, shape index: {}]   ;;  %s7213_s5 = inlined_call_operand.vmem [shape: bf16[4,32,32], index: 5, kind: input, shape index: {}]   ;;  %s7214_s6 = inlined_call_operand.vmem [shape: f32[1,32], index: 6, kind: input, shape index: {}]   ;;  %s7215_s7 = inlined_call_operand.vmem [shape: bf16[32,128], index: 7, kind: input, shape index: {}]   ;;  %s7216_s8 = inlined_call_operand.vmem [shape: f32[1,128], index: 8, kind: input, shape index: {}]   ;;  %s7217_s9 = inlined_call_operand.vmem [shape: bf16[3,32,16], index: 9, kind: input, shape index: {}]   ;;  %s7218_s10 = inlined_call_operand.vmem [shape: f32[1,16], index: 10, kind: input, shape index: {}]   ;;  %s7219_s11 = inlined_call_operand.vmem [shape: bf16[3,4,16], index: 11, kind: input, shape index: {}]   ;;  %s7220_s12 = inlined_call_operand.vmem [shape: f32[4,1], index: 12, kind: input, shape index: {}]   ;;  %s7221_s13 = inlined_call_operand.vmem [shape: bf16[256,256], index: 13, kind: input, shape index: {}]   ;;  %s7222_s14 = inlined_call_operand.vmem [shape: bf16[128,256], index: 14, kind: input, shape index: {}]   ;;  %s7223_s15 = inlined_call_operand.vmem [shape: bf16[128,256], index: 15, kind: input, shape index: {}]   ;;  %s7224_s16 = inlined_call_operand.vmem [shape: bf16[64,128], index: 16, kind: input, shape index: {}]   ;;  %s7225_s17 = inlined_call_operand.vmem [shape: bf16[64,128], index: 17, kind: input, shape index: {}]   ;;  %s7226_s18 = inlined_call_operand.vmem [shape: bf16[128,64], index: 18, kind: input, shape index: {}]   ;;  %s7227_s19 = inlined_call_operand.vmem [shape: bf16[256,128], index: 19, kind: input, shape index: {}]   ;;  %s7228_s20 = inlined_call_operand.hbm [shape: f32[4,4,256], index: 20, kind: output, shape index: {}]  }
   0x1   :  { %7235 = sst [smem:[#allocation10_spill]] %s7208_s0 }
   0x2   :  { %7236 = sst [smem:[#allocation11_spill]] %s7209_s1 }
   0x3   :  { %7237 = sst [smem:[#allocation12_spill]] %s7210_s2 }
   0x4   :  { %7238 = sst [smem:[#allocation13_spill]] %s7211_s3 }
   0x5   :  { %7239 = sst [smem:[#allocation14_spill]] %s7212_s4 }
   0x6   :  { %7240 = sst [smem:[#allocation15_spill]] %s7213_s5 }
   0x7   :  { %7241 = sst [smem:[#allocation16_spill]] %s7221_s13 }
   0x8   :  { %7242 = sst [smem:[#allocation17_spill]] %s7222_s14 }
   0x9   :  { %25 = vsyncpa [#allocation4], 0 }
   0xa   :  { %27 = vsyncpa [#allocation4 + $0x1], 0  ;;  %s6235_s1 = smov 0   ;;  %s6237_s22 = smov 0  }
   0xb   :  { %s6239_s23 = smov 0   ;;  %s6241_s24 = smov 0  }
   0xc LB: > { %7243 = sst [smem:[#allocation6_spill]] %s6117_s23  ;;  %s6256_s2 = sadd.s32 4294967295, %s6121_s24   ;;  %s6121_s24 = sphi %s6241_s24, %s7258_s24   ;;  %s6117_s23 = sphi %s6239_s23, %s7260_s23   ;;  %s6113_s22 = sphi %s6237_s22, %s7262_s22   ;;  %s6109_s1 = sphi %s6235_s1, %s7261_s1  }
   0xd   : > { %s4481_s25 = sadd.s32 4294967294, %s6121_s24   ;;  %s6260_s3 = sadd.s32 1, %s6121_s24  }
   0xe   : > { %7244 = sst [smem:[#allocation7_spill]] %s6260_s3  ;;  %s465_s26 = sadd.s32 1, %s6117_s23 }
   0xf   : > { %s462_s27 = ssub.s32 %s6121_s24, %s6260_s3  ;;  %p475_p0 = scmp.ne.s32.totalorder %s6117_s23, %s6113_s22 }
  0x10   : > { %p463_p1 = scmp.eq.s32.totalorder %s462_s27, 0  ;;  %p476_p2 = scmp.eq.s32.totalorder %s6256_s2, 3 }
  0x11   : > { %p481_p3 = scmp.ne.s32.totalorder %s6113_s22, %s6109_s1  ;;  %p482_p4 = scmp.eq.s32.totalorder %s4481_s25, 3 }
  0x12   : > { %s6271_s28 = scalar_select %p463_p1, %s6117_s23, %s465_s26  }
  0x13   : > { %p6273_p5 = por %p476_p2, %p475_p0  ;;  %p6277_p6 = por %p482_p4, %p481_p3 }
  0x14   : > { %7245 = sst [smem:[#allocation8_spill]] %s6271_s28  ;;  %p4484_p7 = scmp.ge.s32.totalorder %s6121_s24, 1 }
  0x15   : > { %s7247_s29 = scalar_select %p6277_p6, 1, 0 }
  0x16   : > { %p566_p8 = scmp.lt.s32.totalorder %s6121_s24, 5 }
  0x17   : > { %7248 = sst [smem:[#allocation9_spill]] %s7247_s29 }
  0x18   : > { %p567_p9 = pnand %p4484_p7, %p566_p8 }
  0x19   : > { %s4486_s30 = sshll.u32 (!%p567_p9), %s6256_s2, 5  ;;  %s7249_s13 = sld [smem:[#allocation16_spill]] (!%p567_p9)  ;;  %vm1033_vm0 = vcmask (!%p567_p9), 31744   ;;  %vm1135_vm1 = vcmask (!%p567_p9), 1041408   ;;  %vm2191_vm2 = vcmask (!%p567_p9), 130048   ;;  %vm2865_vm3 = vcmask (!%p567_p9), 261120  }
  0x1a   : > { %570 = sbr.rel (%p567_p9) target bundleno = 3469 (0xd8d), region = 100  ;;  %p625_p10 = scmp.lt.s32.totalorder (!%p567_p9), %s4486_s30, 127  ;;  %vm6125_vm4 = vmmov (!%p567_p9), 0   ;;  %vm3258_vm5 = vcmask (!%p567_p9), 523264  }
  0x1b   : > { %s7250_s28 = sld [smem:[#allocation10_spill]] (!%p567_p9)  ;;  %s7252_s14 = sld [smem:[#allocation17_spill]] (!%p567_p9) }
  0x1c   : > { %s7253_s26 = sld [smem:[#allocation12_spill]] (!%p567_p9)  ;;  %s7256_s5 = sld [smem:[#allocation15_spill]] (!%p567_p9) }
  0x1d   : > { %s6128_s21 = smov (!%p567_p9), 64   ;;  %s621_s29 = sand.u32 (!%p567_p9), 1, %s6113_s22  }
  0x1f   : > { %v5914_v0 = vld [vmem:[%s7249_s13 + $0x4] ss:$8 sps:$4 sm:$0xff] (!%p567_p9)   ;;  %v5912_v49 = vld [vmem:[%s7249_s13] ss:$8 sps:$4 sm:$0xff] (!%p567_p9)   ;;  %v5915_v50 = vld [vmem:[%s7249_s13 + $0x14] ss:$8 sps:$4 sm:$0xff] (!%p567_p9)  }
  0x20   : > { %903 = vmatprep.mubr.bf16.mxu0 (!%p567_p9), %v5914_v0  ;;  %v5917_v51 = vld [vmem:[%s7249_s13 + $0x10] ss:$8 sps:$4 sm:$0xff] (!%p567_p9)   ;;  %v5918_v52 = vld [vmem:[%s7249_s13 + $0x24] ss:$8 sps:$4 sm:$0xff] (!%p567_p9)   ;;  %v5920_v53 = vld [vmem:[%s7249_s13 + $0x20] ss:$8 sps:$4 sm:$0xff] (!%p567_p9)  }
  0x21   : > { %s7264_s30 = smov (!%p625_p10, %s4486_s30), 127  ;;  %v5921_v54 = vld [vmem:[%s7249_s13 + $0x34] ss:$8 sps:$4 sm:$0xff]   ;;  %v5923_v55 = vld [vmem:[%s7249_s13 + $0x30] ss:$8 sps:$4 sm:$0xff]  }
  0x22   : > { %s4487_s25 = sshll.u32 %s7264_s30, 3  ;;  %v5924_v56 = vld [vmem:[%s7249_s13 + $0x44] ss:$8 sps:$4 sm:$0xff]   ;;  %v5926_v57 = vld [vmem:[%s7249_s13 + $0x40] ss:$8 sps:$4 sm:$0xff]   ;;  %s7255_s30 = sld [smem:[#allocation14_spill]] }
  0x23   : > { %s6290_s23 = scalar_lea.vmem %s7250_s28, %s4487_s25  ;;  %v5927_v58 = vld [vmem:[%s7249_s13 + $0x54] ss:$8 sps:$4 sm:$0xff]   ;;  %v5929_v59 = vld [vmem:[%s7249_s13 + $0x50] ss:$8 sps:$4 sm:$0xff]   ;;  %v5930_v60 = vld [vmem:[%s7249_s13 + $0x64] ss:$8 sps:$4 sm:$0xff]  }
  0x24   : > { %v679_v1 = vld [vmem:[%s6290_s23 + $0x80] sm:$0xff]  ;;  %v680_v2 = vld [vmem:[%s6290_s23 + $0x88] sm:$0xff]  ;;  %v681_v6 = vld [vmem:[%s6290_s23 + $0x90] sm:$0xff]  ;;  %s7251_s25 = sld [smem:[#allocation11_spill]]  ;;  %s6126_s28 = smov 32  }
  0x25   : > { %v663_v3 = vld [vmem:[%s6290_s23] sm:$0xff]  ;;  %v703_v4 = vpack.c.bf16 %v680_v2, %v679_v1  ;;  %v664_v5 = vld [vmem:[%s6290_s23 + $0x8] sm:$0xff]  ;;  %v682_v7 = vld [vmem:[%s6290_s23 + $0x98] sm:$0xff] }
  0x26   : > { %v695_v8 = vpack.c.bf16 %v664_v5, %v663_v3  ;;  %v704_v9 = vpack.c.bf16 %v682_v7, %v681_v6  ;;  %v665_v10 = vld [vmem:[%s6290_s23 + $0x10] sm:$0xff]  ;;  %v666_v11 = vld [vmem:[%s6290_s23 + $0x18] sm:$0xff]  ;;  %v683_v12 = vld [vmem:[%s6290_s23 + $0xa0] sm:$0xff] }
  0x27   : > { %4754 = vmatprep.subr.bf16.mxu0 %v703_v4  ;;  %v684_v13 = vld [vmem:[%s6290_s23 + $0xa8] sm:$0xff]  ;;  %v696_v14 = vpack.c.bf16 %v666_v11, %v665_v10  ;;  %v667_v16 = vld [vmem:[%s6290_s23 + $0x20] sm:$0xff]  ;;  %v685_v18 = vld [vmem:[%s6290_s23 + $0xb0] sm:$0xff] }
  0x28   : > { %4755 = vmatpush3.bf16.msra.mxu0 %v695_v8  ;;  %v705_v15 = vpack.c.bf16 %v684_v13, %v683_v12  ;;  %v668_v17 = vld [vmem:[%s6290_s23 + $0x28] sm:$0xff]  ;;  %v686_v19 = vld [vmem:[%s6290_s23 + $0xb8] sm:$0xff]  ;;  %v669_v22 = vld [vmem:[%s6290_s23 + $0x30] sm:$0xff] }
  0x29   : > { %4756 = vmatprep.subr.bf16.mxu0 %v704_v9  ;;  %v697_v20 = vpack.c.bf16 %v668_v17, %v667_v16  ;;  %v706_v21 = vpack.c.bf16 %v686_v19, %v685_v18  ;;  %v670_v23 = vld [vmem:[%s6290_s23 + $0x38] sm:$0xff]  ;;  %v687_v24 = vld [vmem:[%s6290_s23 + $0xc0] sm:$0xff]  ;;  %v688_v25 = vld [vmem:[%s6290_s23 + $0xc8] sm:$0xff]  ;;  %v6123_v9 = vmov 0  }
  0x2a   : > { %v698_v26 = vpack.c.bf16 %v670_v23, %v669_v22  ;;  %v671_v27 = vld [vmem:[%s6290_s23 + $0x40] sm:$0xff]  ;;  %v672_v28 = vld [vmem:[%s6290_s23 + $0x48] sm:$0xff]  ;;  %v707_v29 = vpack.c.bf16 %v688_v25, %v687_v24  ;;  %v689_v30 = vld [vmem:[%s6290_s23 + $0xd0] sm:$0xff]  ;;  %1034 = vst.msk [vmem:[#allocation2] sm:$0xff] %vm1033_vm0, %v6123_v9  ;;  %5910 = vset.pattern.permute.xlu1 %v6123_v9  ;;  %5911 = vset.pattern.permute.xlu0 %v6123_v9 }
  0x2b   : > { %v690_v31 = vld [vmem:[%s6290_s23 + $0xd8] sm:$0xff]  ;;  %v699_v32 = vpack.c.bf16 %v672_v28, %v671_v27  ;;  %v673_v33 = vld [vmem:[%s6290_s23 + $0x50] sm:$0xff]  ;;  %v691_v36 = vld [vmem:[%s6290_s23 + $0xe0] sm:$0xff]  ;;  %1035 = vst.msk [vmem:[#allocation2 + $0x88] sm:$0xff] %vm1033_vm0, %v6123_v9 }
  0x2c   : > { %4757 = vmatpush3.bf16.msra.mxu0 %v696_v14  ;;  %v674_v34 = vld [vmem:[%s6290_s23 + $0x58] sm:$0xff]  ;;  %v708_v35 = vpack.c.bf16 %v690_v31, %v689_v30  ;;  %v692_v37 = vld [vmem:[%s6290_s23 + $0xe8] sm:$0xff]  ;;  %v675_v39 = vld [vmem:[%s6290_s23 + $0x60] sm:$0xff] }
  0x2d   : > { %4758 = vmatprep.subr.bf16.mxu0 %v705_v15  ;;  %v700_v38 = vpack.c.bf16 %v674_v34, %v673_v33  ;;  %v676_v40 = vld [vmem:[%s6290_s23 + $0x68] sm:$0xff]  ;;  %v709_v41 = vpack.c.bf16 %v692_v37, %v691_v36  ;;  %v693_v42 = vld [vmem:[%s6290_s23 + $0xf0] sm:$0xff]  ;;  %v694_v43 = vld [vmem:[%s6290_s23 + $0xf8] sm:$0xff] }
  0x2e   : > { %v701_v44 = vpack.c.bf16 %v676_v40, %v675_v39  ;;  %v677_v45 = vld [vmem:[%s6290_s23 + $0x70] sm:$0xff]  ;;  %v678_v46 = vld [vmem:[%s6290_s23 + $0x78] sm:$0xff]  ;;  %v710_v47 = vpack.c.bf16 %v694_v43, %v693_v42  ;;  %v5932_v61 = vld [vmem:[%s7249_s13 + $0x60] ss:$8 sps:$4 sm:$0xff]  }
  0x2f   : > { %v702_v48 = vpack.c.bf16 %v678_v46, %v677_v45  ;;  %v5933_v62 = vld [vmem:[%s7249_s13 + $0x74] ss:$8 sps:$4 sm:$0xff]   ;;  %v5935_v63 = vld [vmem:[%s7249_s13 + $0x70] ss:$8 sps:$4 sm:$0xff]   ;;  %v5936_v0 = vld [vmem:[%s7249_s13 + $0x84] ss:$8 sps:$4 sm:$0xff]  }
  0x30   : > { %4759 = vmatpush3.bf16.msra.mxu0 %v697_v20  ;;  %v5938_v1 = vld [vmem:[%s7249_s13 + $0x80] ss:$8 sps:$4 sm:$0xff]   ;;  %v5939_v2 = vld [vmem:[%s7249_s13 + $0x94] ss:$8 sps:$4 sm:$0xff]   ;;  %v5941_v3 = vld [vmem:[%s7249_s13 + $0x90] ss:$8 sps:$4 sm:$0xff]  }
  0x31   : > { %4760 = vmatprep.subr.bf16.mxu0 %v706_v21  ;;  %v5942_v4 = vld [vmem:[%s7249_s13 + $0xa4] ss:$8 sps:$4 sm:$0xff]   ;;  %v5944_v5 = vld [vmem:[%s7249_s13 + $0xa0] ss:$8 sps:$4 sm:$0xff]   ;;  %v5945_v6 = vld [vmem:[%s7249_s13 + $0xb4] ss:$8 sps:$4 sm:$0xff]  }
  0x32   : > { %v5947_v7 = vld [vmem:[%s7249_s13 + $0xb0] ss:$8 sps:$4 sm:$0xff]   ;;  %v5948_v8 = vld [vmem:[%s7249_s13 + $0xc4] ss:$8 sps:$4 sm:$0xff]   ;;  %v5950_v10 = vld [vmem:[%s7249_s13 + $0xc0] ss:$8 sps:$4 sm:$0xff]  }
  0x33   : > { %v5951_v11 = vld [vmem:[%s7249_s13 + $0xd4] ss:$8 sps:$4 sm:$0xff]   ;;  %v1086_v12 = vld [vmem:[%s7251_s25] sm:$0x3]  ;;  %v5953_v15 = vld [vmem:[%s7249_s13 + $0xd0] ss:$8 sps:$4 sm:$0xff]  }
  0x34   : > { %4761 = vmatpush3.bf16.msra.mxu0 %v698_v26  ;;  %5823 = vmatprep.subr.msk.bf16.mxu1 %vm1135_vm1, %v1086_v12  ;;  %v1137_v13 = vsel %vm1135_vm1, %v1086_v12, 0  ;;  %v1068_v14 = vld [vmem:[#allocation2] sm:$0xff]  ;;  %v5957_v18 = vld [vmem:[%s7249_s13 + $0xf4] ss:$8 sps:$4 sm:$0xff]   ;;  %v5959_v19 = vld [vmem:[%s7249_s13 + $0xf0] ss:$8 sps:$4 sm:$0xff]  }
  0x35   : > { %4762 = vmatprep.subr.bf16.mxu0 %v707_v29  ;;  %5232 = vmatpush3.bf16.msra.mxu1 %v1137_v13  ;;  %2192 = vst.msk [vmem:[#allocation2] sm:$0xff] %vm2191_vm2, %v6123_v9  ;;  %v5954_v16 = vld [vmem:[%s7249_s13 + $0xe4] ss:$8 sps:$4 sm:$0xff]   ;;  %v5956_v17 = vld [vmem:[%s7249_s13 + $0xe0] ss:$8 sps:$4 sm:$0xff]   ;;  %s4753_s13 = sshll.u32 %s6256_s2, 7 }
  0x36   : > { %5233 = vmatprep.mubr.msk.bf16.mxu1 %vm1033_vm0, %v1068_v14  ;;  %v4537_v20 = vld [vmem:[%s7251_s25 + $0x2] sm:$0x3]  ;;  %s6129_s2 = smov [#allocation3]  }
  0x37   : > { %5824 = vmatprep.subr.msk.bf16.mxu1 %vm1135_vm1, %v4537_v20 }
  0x38   : > { %4763 = vmatpush3.bf16.msra.mxu0 %v699_v32 }
  0x39   : > { %4764 = vmatprep.subr.bf16.mxu0 %v708_v35  ;;  %v1344_v35 = vsel %vm1135_vm1, %v4537_v20, 0 }
  0x3c   : > { %4765 = vmatpush3.bf16.msra.mxu0 %v700_v38 }
  0x3d   : > { %4766 = vmatprep.subr.bf16.mxu0 %v709_v41 }
  0x40   : > { %4767 = vmatpush3.bf16.msra.mxu0 %v701_v44 }
  0x41   : > { %4768 = vmatprep.subr.bf16.mxu0 %v710_v47 }
  0x44   : > { %4769 = vmatpush3.bf16.msra.mxu0 %v702_v48 }
  0x47   : > { %904 = vmatmul.mubr.bf16.vlgmr.msra.gmra.mrb[0].mxu0 %v5912_v49 }
  0x48   : > { %911 = vmatprep.mubr.bf16.mxu0 %v5915_v50 }
  0x4f   : > { %912 = vmatmul.mubr.bf16.gmra.mrb[4].mxu0 %v5917_v51 }
  0x50   : > { %919 = vmatprep.mubr.bf16.mxu0 %v5918_v52 }
  0x57   : > { %920 = vmatmul.mubr.bf16.gmra.mrb[8].mxu0 %v5920_v53 }
  0x58   : > { %927 = vmatprep.mubr.bf16.mxu0 %v5921_v54 }
  0x5f   : > { %928 = vmatmul.mubr.bf16.gmra.mrb[12].mxu0 %v5923_v55 }
  0x60   : > { %935 = vmatprep.mubr.bf16.mxu0 %v5924_v56 }
  0x67   : > { %936 = vmatmul.mubr.bf16.gmra.mrb[16].mxu0 %v5926_v57 }
  0x68   : > { %943 = vmatprep.mubr.bf16.mxu0 %v5927_v58 }
  0x6f   : > { %944 = vmatmul.mubr.bf16.gmra.mrb[20].mxu0 %v5929_v59 }
  0x70   : > { %951 = vmatprep.mubr.bf16.mxu0 %v5930_v60 }
  0x77   : > { %952 = vmatmul.mubr.bf16.gmra.mrb[24].mxu0 %v5932_v61 }
  0x78   : > { %959 = vmatprep.mubr.bf16.mxu0 %v5933_v62  ;;  %v6460_v62 = vld [vmem:[%s7251_s25 + $0x4] sm:$0x3] }
  0x7f   : > { %960 = vmatmul.mubr.bf16.gmra.mrb[28].mxu0 %v5935_v63 }
  0x80   : > { %967 = vmatprep.mubr.bf16.mxu0 %v5936_v0 }
  0x87   : > { %968 = vmatmul.mubr.bf16.gmra.mrb[32].mxu0 %v5938_v1 }
  0x88   : > { %975 = vmatprep.mubr.bf16.mxu0 %v5939_v2 }
  0x8f   : > { %976 = vmatmul.mubr.bf16.gmra.mrb[36].mxu0 %v5941_v3 }
  0x90   : > { %983 = vmatprep.mubr.bf16.mxu0 %v5942_v4 }
  0x97   : > { %984 = vmatmul.mubr.bf16.gmra.mrb[40].mxu0 %v5944_v5 }
  0x98   : > { %991 = vmatprep.mubr.bf16.mxu0 %v5945_v6 }
  0x9f   : > { %992 = vmatmul.mubr.bf16.gmra.mrb[44].mxu0 %v5947_v7 }
  0xa0   : > { %999 = vmatprep.mubr.bf16.mxu0 %v5948_v8 }
  0xa7   : > { %1000 = vmatmul.mubr.bf16.gmra.mrb[48].mxu0 %v5950_v10 }
  0xa8   : > { %1007 = vmatprep.mubr.bf16.mxu0 %v5951_v11 }
  0xaf   : > { %1008 = vmatmul.mubr.bf16.gmra.mrb[52].mxu0 %v5953_v15 }
  0xb0   : > { %1015 = vmatprep.mubr.bf16.mxu0 %v5954_v16 }
  0xb7   : > { %1016 = vmatmul.mubr.bf16.gmra.mrb[56].mxu0 %v5956_v17 }
  0xb8   : > { %1023 = vmatprep.mubr.bf16.mxu0 %v5957_v18 }
  0xbf   : > { %1024 = vmatmul.mubr.bf16.gmra.mrb[60].mxu0 %v5959_v19 }
 0x11a   : > { %v4770_v21 = vpop.f32.mrb[0].mxu0 }
 0x11b   : > { %v4771_v22 = vpop.f32.mrb[1].mxu0 }
 0x11c   : > { %v4772_v23 = vadd.f32 %v4771_v22, %v4770_v21  ;;  %v4773_v24 = vpop.f32.mrb[2].mxu0 }
 0x11d   : > { %v4774_v25 = vpop.f32.mrb[3].mxu0 }
 0x11e   : > { %v4775_v26 = vadd.f32 %v4774_v25, %v4773_v24 }
 0x120   : > { %v1036_v27 = vpack.c.bf16 %v4775_v26, %v4772_v23 }
 0x122   : > { %1052 = vst.msk [vmem:[#allocation2 + $0x8] sm:$0xff] %vm1033_vm0, %v1036_v27  ;;  %v4776_v28 = vpop.f32.mrb[4].mxu0 }
 0x123   : > { %v4777_v29 = vpop.f32.mrb[5].mxu0 }
 0x124   : > { %v4778_v30 = vadd.f32 %v4777_v29, %v4776_v28  ;;  %v4779_v31 = vpop.f32.mrb[6].mxu0 }
 0x125   : > { %v4780_v32 = vpop.f32.mrb[7].mxu0 }
 0x126   : > { %v4781_v33 = vadd.f32 %v4780_v32, %v4779_v31 }
 0x128   : > { %v1037_v34 = vpack.c.bf16 %v4781_v33, %v4778_v30 }
 0x129   : > { %v6437_v36 = vld [vmem:[#allocation2 + $0x8] sm:$0xff] }
 0x12a   : > { %1053 = vst.msk [vmem:[#allocation2 + $0x10] sm:$0xff] %vm1033_vm0, %v1037_v34  ;;  %v4782_v37 = vpop.f32.mrb[8].mxu0  ;;  %5234 = vmatmul.mubr.msk.bf16.vlgmr.msra.gmra.mrb[0].mxu1 %vm1033_vm0, %v6437_v36 }
 0x12b   : > { %v4783_v38 = vpop.f32.mrb[9].mxu0  ;;  %5266 = vmatpush3.bf16.msra.mxu1 %v1344_v35 }
 0x12c   : > { %v4784_v39 = vadd.f32 %v4783_v38, %v4782_v37  ;;  %v4785_v40 = vpop.f32.mrb[10].mxu0  ;;  %5825 = vmatprep.subr.msk.bf16.mxu1 %vm1135_vm1, %v6460_v62 }
 0x12d   : > { %v4786_v41 = vpop.f32.mrb[11].mxu0 }
 0x12e   : > { %v4787_v42 = vadd.f32 %v4786_v41, %v4785_v40 }
 0x130   : > { %v1038_v43 = vpack.c.bf16 %v4787_v42, %v4784_v39 }
 0x131   : > { %v6442_v44 = vld [vmem:[#allocation2 + $0x10] sm:$0xff] }
 0x132   : > { %1054 = vst.msk [vmem:[#allocation2 + $0x18] sm:$0xff] %vm1033_vm0, %v1038_v43  ;;  %v4788_v45 = vpop.f32.mrb[12].mxu0  ;;  %5237 = vmatprep.mubr.msk.bf16.mxu1 %vm1033_vm0, %v6442_v44 }
 0x133   : > { %v4789_v46 = vpop.f32.mrb[13].mxu0 }
 0x134   : > { %v4790_v47 = vadd.f32 %v4789_v46, %v4788_v45  ;;  %v4791_v48 = vpop.f32.mrb[14].mxu0 }
 0x135   : > { %v4792_v49 = vpop.f32.mrb[15].mxu0 }
 0x136   : > { %v4793_v50 = vadd.f32 %v4792_v49, %v4791_v48 }
 0x138   : > { %v1039_v51 = vpack.c.bf16 %v4793_v50, %v4790_v47 }
 0x139   : > { %v6447_v52 = vld [vmem:[#allocation2 + $0x18] sm:$0xff] }
 0x13a   : > { %1055 = vst.msk [vmem:[#allocation2 + $0x20] sm:$0xff] %vm1033_vm0, %v1039_v51  ;;  %v4794_v53 = vpop.f32.mrb[16].mxu0  ;;  %5238 = vmatmul.mubr.msk.bf16.gmra.mrb[4].mxu1 %vm1033_vm0, %v6447_v52 }
 0x13b   : > { %v4795_v54 = vpop.f32.mrb[17].mxu0 }
 0x13c   : > { %v4796_v55 = vadd.f32 %v4795_v54, %v4794_v53  ;;  %v4797_v56 = vpop.f32.mrb[18].mxu0 }
 0x13d   : > { %v4798_v57 = vpop.f32.mrb[19].mxu0 }
 0x13e   : > { %v4799_v58 = vadd.f32 %v4798_v57, %v4797_v56 }
 0x140   : > { %v1040_v59 = vpack.c.bf16 %v4799_v58, %v4796_v55 }
 0x141   : > { %v6452_v60 = vld [vmem:[#allocation2 + $0x20] sm:$0xff] }
 0x142   : > { %1056 = vst.msk [vmem:[#allocation2 + $0x28] sm:$0xff] %vm1033_vm0, %v1040_v59  ;;  %v4800_v61 = vpop.f32.mrb[20].mxu0  ;;  %5241 = vmatprep.mubr.msk.bf16.mxu1 %vm1033_vm0, %v6452_v60 }
 0x143   : > { %v4801_v63 = vpop.f32.mrb[21].mxu0 }
 0x144   : > { %v4802_v0 = vadd.f32 %v4801_v63, %v4800_v61  ;;  %v4803_v1 = vpop.f32.mrb[22].mxu0 }
 0x145   : > { %v4804_v2 = vpop.f32.mrb[23].mxu0 }
 0x146   : > { %v4805_v3 = vadd.f32 %v4804_v2, %v4803_v1 }
 0x148   : > { %v1041_v4 = vpack.c.bf16 %v4805_v3, %v4802_v0 }
 0x149   : > { %v6464_v5 = vld [vmem:[#allocation2 + $0x28] sm:$0xff] }
 0x14a   : > { %1057 = vst.msk [vmem:[#allocation2 + $0x30] sm:$0xff] %vm1033_vm0, %v1041_v4  ;;  %v4806_v6 = vpop.f32.mrb[24].mxu0  ;;  %5242 = vmatmul.mubr.msk.bf16.gmra.mrb[8].mxu1 %vm1033_vm0, %v6464_v5 }
 0x14b   : > { %v4807_v7 = vpop.f32.mrb[25].mxu0 }
 0x14c   : > { %v4808_v8 = vadd.f32 %v4807_v7, %v4806_v6  ;;  %v4809_v10 = vpop.f32.mrb[26].mxu0 }
 0x14d   : > { %v4810_v11 = vpop.f32.mrb[27].mxu0 }
 0x14e   : > { %v4811_v12 = vadd.f32 %v4810_v11, %v4809_v10 }
 0x150   : > { %v1042_v13 = vpack.c.bf16 %v4811_v12, %v4808_v8 }
 0x151   : > { %v6469_v14 = vld [vmem:[#allocation2 + $0x30] sm:$0xff] }
 0x152   : > { %1058 = vst.msk [vmem:[#allocation2 + $0x38] sm:$0xff] %vm1033_vm0, %v1042_v13  ;;  %v4812_v15 = vpop.f32.mrb[28].mxu0  ;;  %5245 = vmatprep.mubr.msk.bf16.mxu1 %vm1033_vm0, %v6469_v14 }
 0x153   : > { %v4813_v16 = vpop.f32.mrb[29].mxu0 }
 0x154   : > { %v4814_v17 = vadd.f32 %v4813_v16, %v4812_v15  ;;  %v4815_v18 = vpop.f32.mrb[30].mxu0 }
 0x155   : > { %v4816_v19 = vpop.f32.mrb[31].mxu0 }
 0x156   : > { %v4817_v20 = vadd.f32 %v4816_v19, %v4815_v18 }
 0x158   : > { %v1043_v21 = vpack.c.bf16 %v4817_v20, %v4814_v17 }
 0x159   : > { %v6474_v22 = vld [vmem:[#allocation2 + $0x38] sm:$0xff] }
 0x15a   : > { %1059 = vst.msk [vmem:[#allocation2 + $0x40] sm:$0xff] %vm1033_vm0, %v1043_v21  ;;  %v4818_v23 = vpop.f32.mrb[32].mxu0  ;;  %5246 = vmatmul.mubr.msk.bf16.gmra.mrb[12].mxu1 %vm1033_vm0, %v6474_v22 }
 0x15b   : > { %v4819_v24 = vpop.f32.mrb[33].mxu0 }
 0x15c   : > { %v4820_v25 = vadd.f32 %v4819_v24, %v4818_v23  ;;  %v4821_v26 = vpop.f32.mrb[34].mxu0 }
 0x15d   : > { %v4822_v27 = vpop.f32.mrb[35].mxu0 }
 0x15e   : > { %v4823_v28 = vadd.f32 %v4822_v27, %v4821_v26  ;;  %v1085_v26 = vld [vmem:[#allocation2 + $0x88] sm:$0xff] }
 0x15f   : > { %4149 = vst.msk [vmem:[#allocation2 + $0x88] sm:$0xff] %vm2191_vm2, %v6123_v9 }
 0x160   : > { %v1044_v29 = vpack.c.bf16 %v4823_v28, %v4820_v25 }
 0x161   : > { %v6479_v30 = vld [vmem:[#allocation2 + $0x40] sm:$0xff] }
 0x162   : > { %1060 = vst.msk [vmem:[#allocation2 + $0x48] sm:$0xff] %vm1033_vm0, %v1044_v29  ;;  %v4824_v31 = vpop.f32.mrb[36].mxu0  ;;  %5249 = vmatprep.mubr.msk.bf16.mxu1 %vm1033_vm0, %v6479_v30 }
 0x163   : > { %v4825_v32 = vpop.f32.mrb[37].mxu0 }
 0x164   : > { %v4826_v33 = vadd.f32 %v4825_v32, %v4824_v31  ;;  %v4827_v34 = vpop.f32.mrb[38].mxu0 }
 0x165   : > { %v4828_v35 = vpop.f32.mrb[39].mxu0 }
 0x166   : > { %v4829_v37 = vadd.f32 %v4828_v35, %v4827_v34  ;;  %v1545_v34 = vsel %vm1135_vm1, %v6460_v62, 0 }
 0x168   : > { %v1045_v38 = vpack.c.bf16 %v4829_v37, %v4826_v33 }
 0x169   : > { %v6484_v39 = vld [vmem:[#allocation2 + $0x48] sm:$0xff] }
 0x16a   : > { %1061 = vst.msk [vmem:[#allocation2 + $0x50] sm:$0xff] %vm1033_vm0, %v1045_v38  ;;  %v4830_v40 = vpop.f32.mrb[40].mxu0  ;;  %5250 = vmatmul.mubr.msk.bf16.gmra.mrb[16].mxu1 %vm1033_vm0, %v6484_v39 }
 0x16b   : > { %2193 = vst.msk [vmem:[#allocation2 + $0x48] sm:$0xff] %vm2191_vm2, %v6123_v9  ;;  %v4831_v41 = vpop.f32.mrb[41].mxu0 }
 0x16c   : > { %v4832_v42 = vadd.f32 %v4831_v41, %v4830_v40  ;;  %v4833_v43 = vpop.f32.mrb[42].mxu0 }
 0x16d   : > { %v4834_v45 = vpop.f32.mrb[43].mxu0 }
 0x16e   : > { %v4835_v46 = vadd.f32 %v4834_v45, %v4833_v43 }
 0x170   : > { %v1046_v47 = vpack.c.bf16 %v4835_v46, %v4832_v42 }
 0x171   : > { %v6491_v48 = vld [vmem:[#allocation2 + $0x50] sm:$0xff] }
 0x172   : > { %1062 = vst.msk [vmem:[#allocation2 + $0x58] sm:$0xff] %vm1033_vm0, %v1046_v47  ;;  %v4836_v49 = vpop.f32.mrb[44].mxu0  ;;  %5253 = vmatprep.mubr.msk.bf16.mxu1 %vm1033_vm0, %v6491_v48 }
 0x173   : > { %v4837_v50 = vpop.f32.mrb[45].mxu0 }
 0x174   : > { %v4838_v51 = vadd.f32 %v4837_v50, %v4836_v49  ;;  %v4839_v53 = vpop.f32.mrb[46].mxu0 }
 0x175   : > { %v4840_v54 = vpop.f32.mrb[47].mxu0 }
 0x176   : > { %v4841_v55 = vadd.f32 %v4840_v54, %v4839_v53 }
 0x178   : > { %v1047_v56 = vpack.c.bf16 %v4841_v55, %v4838_v51 }
 0x179   : > { %v6496_v57 = vld [vmem:[#allocation2 + $0x58] sm:$0xff] }
 0x17a   : > { %1063 = vst.msk [vmem:[#allocation2 + $0x60] sm:$0xff] %vm1033_vm0, %v1047_v56  ;;  %v4842_v58 = vpop.f32.mrb[48].mxu0  ;;  %5254 = vmatmul.mubr.msk.bf16.gmra.mrb[20].mxu1 %vm1033_vm0, %v6496_v57 }
 0x17b   : > { %v4843_v59 = vpop.f32.mrb[49].mxu0 }
 0x17c   : > { %v4844_v61 = vadd.f32 %v4843_v59, %v4842_v58  ;;  %v4845_v63 = vpop.f32.mrb[50].mxu0 }
 0x17d   : > { %v4846_v0 = vpop.f32.mrb[51].mxu0 }
 0x17e   : > { %v4847_v1 = vadd.f32 %v4846_v0, %v4845_v63 }
 0x180   : > { %v1048_v2 = vpack.c.bf16 %v4847_v1, %v4844_v61 }
 0x181   : > { %v6501_v3 = vld [vmem:[#allocation2 + $0x60] sm:$0xff] }
 0x182   : > { %1064 = vst.msk [vmem:[#allocation2 + $0x68] sm:$0xff] %vm1033_vm0, %v1048_v2  ;;  %v4848_v4 = vpop.f32.mrb[52].mxu0  ;;  %5257 = vmatprep.mubr.msk.bf16.mxu1 %vm1033_vm0, %v6501_v3 }
 0x183   : > { %v4849_v6 = vpop.f32.mrb[53].mxu0 }
 0x184   : > { %v4850_v7 = vadd.f32 %v4849_v6, %v4848_v4  ;;  %v4851_v8 = vpop.f32.mrb[54].mxu0 }
 0x185   : > { %v4852_v10 = vpop.f32.mrb[55].mxu0 }
 0x186   : > { %v4853_v11 = vadd.f32 %v4852_v10, %v4851_v8 }
 0x188   : > { %v1049_v12 = vpack.c.bf16 %v4853_v11, %v4850_v7 }
 0x189   : > { %v1081_v13 = vld [vmem:[#allocation2 + $0x68] sm:$0xff] }
 0x18a   : > { %1065 = vst.msk [vmem:[#allocation2 + $0x70] sm:$0xff] %vm1033_vm0, %v1049_v12  ;;  %v4854_v15 = vpop.f32.mrb[56].mxu0  ;;  %5258 = vmatmul.mubr.msk.bf16.gmra.mrb[24].mxu1 %vm1033_vm0, %v1081_v13 }
 0x18b   : > { %v4855_v16 = vpop.f32.mrb[57].mxu0 }
 0x18c   : > { %v4856_v17 = vadd.f32 %v4855_v16, %v4854_v15  ;;  %v4857_v18 = vpop.f32.mrb[58].mxu0 }
 0x18d   : > { %v4858_v19 = vpop.f32.mrb[59].mxu0 }
 0x18e   : > { %v4859_v20 = vadd.f32 %v4858_v19, %v4857_v18 }
 0x190   : > { %v1050_v21 = vpack.c.bf16 %v4859_v20, %v4856_v17 }
 0x191   : > { %v1082_v23 = vld [vmem:[#allocation2 + $0x70] sm:$0xff] }
 0x192   : > { %1066 = vst.msk [vmem:[#allocation2 + $0x78] sm:$0xff] %vm1033_vm0, %v1050_v21  ;;  %5261 = vmatprep.mubr.msk.bf16.mxu1 %vm1033_vm0, %v1082_v23  ;;  %v4860_v24 = vpop.f32.mrb[60].mxu0 }
 0x193   : > { %v4861_v25 = vpop.f32.mrb[61].mxu0 }
 0x194   : > { %v4862_v27 = vadd.f32 %v4861_v25, %v4860_v24  ;;  %v4863_v28 = vpop.f32.mrb[62].mxu0 }
 0x195   : > { %v4864_v29 = vpop.f32.mrb[63].mxu0 }
 0x196   : > { %v4865_v31 = vadd.f32 %v4864_v29, %v4863_v28 }
 0x198   : > { %v1051_v32 = vpack.c.bf16 %v4865_v31, %v4862_v27 }
 0x199   : > { %v1083_v33 = vld [vmem:[#allocation2 + $0x78] sm:$0xff] }
 0x19a   : > { %5262 = vmatmul.mubr.msk.bf16.gmra.mrb[28].mxu1 %vm1033_vm0, %v1083_v33  ;;  %1067 = vst.msk [vmem:[#allocation2 + $0x80] sm:$0xff] %vm1033_vm0, %v1051_v32 }
 0x19b   : > { %5267 = vmatprep.mubr.msk.bf16.mxu1 %vm1033_vm0, %v6437_v36 }
 0x1a1   : > { %v1084_v36 = vld [vmem:[#allocation2 + $0x80] sm:$0xff] }
 0x1a2   : > { %5268 = vmatmul.mubr.msk.bf16.vlgmr.msra.gmra.mrb[0].mxu1 %vm1033_vm0, %v6442_v44 }
 0x1a3   : > { %5271 = vmatprep.mubr.msk.bf16.mxu1 %vm1033_vm0, %v6447_v52  ;;  %5300 = vmatpush3.bf16.msra.mxu1 %v1545_v34 }
 0x1aa   : > { %5272 = vmatmul.mubr.msk.bf16.gmra.mrb[4].mxu1 %vm1033_vm0, %v6452_v60 }
 0x1ab   : > { %5275 = vmatprep.mubr.msk.bf16.mxu1 %vm1033_vm0, %v6464_v5 }
 0x1b2   : > { %5276 = vmatmul.mubr.msk.bf16.gmra.mrb[8].mxu1 %vm1033_vm0, %v6469_v14 }
 0x1b3   : > { %5279 = vmatprep.mubr.msk.bf16.mxu1 %vm1033_vm0, %v6474_v22 }
 0x1ba   : > { %5280 = vmatmul.mubr.msk.bf16.gmra.mrb[12].mxu1 %vm1033_vm0, %v6479_v30 }
 0x1bb   : > { %5283 = vmatprep.mubr.msk.bf16.mxu1 %vm1033_vm0, %v6484_v39 }
 0x1c2   : > { %5284 = vmatmul.mubr.msk.bf16.gmra.mrb[16].mxu1 %vm1033_vm0, %v6491_v48 }
 0x1c3   : > { %5287 = vmatprep.mubr.msk.bf16.mxu1 %vm1033_vm0, %v6496_v57 }
 0x1ca   : > { %5288 = vmatmul.mubr.msk.bf16.gmra.mrb[20].mxu1 %vm1033_vm0, %v6501_v3 }
 0x1cb   : > { %5291 = vmatprep.mubr.msk.bf16.mxu1 %vm1033_vm0, %v1081_v13 }
 0x1d2   : > { %5292 = vmatmul.mubr.msk.bf16.gmra.mrb[24].mxu1 %vm1033_vm0, %v1082_v23 }
 0x1d3   : > { %5295 = vmatprep.mubr.msk.bf16.mxu1 %vm1033_vm0, %v1083_v33 }
 0x1da   : > { %5296 = vmatmul.mubr.msk.bf16.gmra.mrb[28].mxu1 %vm1033_vm0, %v1084_v36 }
 0x1db   : > { %5301 = vmatprep.mubr.msk.bf16.mxu1 %vm1033_vm0, %v6442_v44  ;;  %v5962_v44 = vld [vmem:[%s7252_s14 + $0x4] ss:$8 sps:$4 sm:$0xff]  }
 0x1e2   : > { %5302 = vmatmul.mubr.msk.bf16.vlgmr.msra.gmra.mrb[0].mxu1 %vm1033_vm0, %v6447_v52  ;;  %v6577_v52 = vld [vmem:[%s7253_s26] ss:$0 sm:$0xff] }
 0x1e3   : > { %5305 = vmatprep.mubr.msk.bf16.mxu1 %vm1033_vm0, %v6452_v60 }
 0x1ea   : > { %5306 = vmatmul.mubr.msk.bf16.gmra.mrb[4].mxu1 %vm1033_vm0, %v6464_v5 }
 0x1eb   : > { %5309 = vmatprep.mubr.msk.bf16.mxu1 %vm1033_vm0, %v6469_v14 }
 0x1f2   : > { %5310 = vmatmul.mubr.msk.bf16.gmra.mrb[8].mxu1 %vm1033_vm0, %v6474_v22 }
 0x1f3   : > { %5313 = vmatprep.mubr.msk.bf16.mxu1 %vm1033_vm0, %v6479_v30 }
 0x1fa   : > { %5314 = vmatmul.mubr.msk.bf16.gmra.mrb[12].mxu1 %vm1033_vm0, %v6484_v39 }
 0x1fb   : > { %5317 = vmatprep.mubr.msk.bf16.mxu1 %vm1033_vm0, %v6491_v48 }
 0x202   : > { %5318 = vmatmul.mubr.msk.bf16.gmra.mrb[16].mxu1 %vm1033_vm0, %v6496_v57 }
 0x203   : > { %5321 = vmatprep.mubr.msk.bf16.mxu1 %vm1033_vm0, %v6501_v3 }
 0x20a   : > { %5322 = vmatmul.mubr.msk.bf16.gmra.mrb[20].mxu1 %vm1033_vm0, %v1081_v13 }
 0x20b   : > { %5325 = vmatprep.mubr.msk.bf16.mxu1 %vm1033_vm0, %v1082_v23 }
 0x212   : > { %5326 = vmatmul.mubr.msk.bf16.gmra.mrb[24].mxu1 %vm1033_vm0, %v1083_v33 }
 0x213   : > { %5329 = vmatprep.mubr.msk.bf16.mxu1 %vm1033_vm0, %v1084_v36 }
 0x21a   : > { %5330 = vmatmul.mubr.msk.bf16.gmra.mrb[28].mxu1 %vm1033_vm0, %v1085_v26 }
 0x21b   : > { %1916 = vmatprep.mubr.bf16.mxu1 %v5962_v44 }
 0x2b5   : > { %v5303_v60 = vpop.f32.mrb[0].mxu1 }
 0x2b6   : > { %v5607_v62 = vadd.f32 %v5303_v60, %v6577_v52  ;;  %v1581_v5 = vpop.f32.mrb[1].mxu1 }
 0x2b7   : > { %v5608_v14 = vadd.f32 %v6577_v52, %v1581_v5  ;;  %v5304_v22 = vpop.f32.mrb[2].mxu1 }
 0x2b8   : > { %v5609_v30 = vadd.f32 %v5304_v22, %v6577_v52  ;;  %v1584_v35 = vpop.f32.mrb[3].mxu1  ;;  %v1742_v38 = vmax.f32 %v5607_v62, 0.0 }
 0x2b9   : > { %v5610_v37 = vadd.f32 %v6577_v52, %v1584_v35  ;;  %v1740_v40 = vmax.f32 %v5608_v14, 0.0 }
 0x2ba   : > { %v1743_v39 = vmax.f32 %v5609_v30, 0.0 }
 0x2bb   : > { %v1741_v41 = vmax.f32 %v5610_v37, 0.0 }
 0x2bc   : > { %v6583_v42 = vpack.c.bf16 %v1743_v39, %v1742_v38 }
 0x2bd   : > { %v6585_v43 = vpack.c.bf16 %v1741_v41, %v1740_v40  ;;  %v5307_v45 = vpop.f32.mrb[4].mxu1 }
 0x2be   : > { %v5611_v46 = vadd.f32 %v5307_v45, %v6577_v52  ;;  %v1597_v47 = vpop.f32.mrb[5].mxu1 }
 0x2bf   : > { %v5612_v48 = vadd.f32 %v6577_v52, %v1597_v47  ;;  %v5308_v49 = vpop.f32.mrb[6].mxu1 }
 0x2c0   : > { %v5613_v50 = vadd.f32 %v5308_v49, %v6577_v52  ;;  %v1600_v51 = vpop.f32.mrb[7].mxu1  ;;  %v1746_v54 = vmax.f32 %v5611_v46, 0.0 }
 0x2c1   : > { %v5614_v53 = vadd.f32 %v6577_v52, %v1600_v51  ;;  %v1744_v56 = vmax.f32 %v5612_v48, 0.0 }
 0x2c2   : > { %v1747_v55 = vmax.f32 %v5613_v50, 0.0 }
 0x2c3   : > { %v1745_v57 = vmax.f32 %v5614_v53, 0.0 }
 0x2c4   : > { %v6591_v58 = vpack.c.bf16 %v1747_v55, %v1746_v54 }
 0x2c5   : > { %v6593_v59 = vpack.c.bf16 %v1745_v57, %v1744_v56  ;;  %v5311_v61 = vpop.f32.mrb[8].mxu1 }
 0x2c6   : > { %v5615_v63 = vadd.f32 %v5311_v61, %v6577_v52  ;;  %v1613_v0 = vpop.f32.mrb[9].mxu1 }
 0x2c7   : > { %v5616_v1 = vadd.f32 %v6577_v52, %v1613_v0  ;;  %v5312_v2 = vpop.f32.mrb[10].mxu1 }
 0x2c8   : > { %v5617_v3 = vadd.f32 %v5312_v2, %v6577_v52  ;;  %v1616_v4 = vpop.f32.mrb[11].mxu1  ;;  %v1750_v7 = vmax.f32 %v5615_v63, 0.0 }
 0x2c9   : > { %v5618_v6 = vadd.f32 %v6577_v52, %v1616_v4  ;;  %v1748_v10 = vmax.f32 %v5616_v1, 0.0 }
 0x2ca   : > { %v1751_v8 = vmax.f32 %v5617_v3, 0.0 }
 0x2cb   : > { %v1749_v11 = vmax.f32 %v5618_v6, 0.0 }
 0x2cc   : > { %v6599_v12 = vpack.c.bf16 %v1751_v8, %v1750_v7 }
 0x2cd   : > { %v6601_v13 = vpack.c.bf16 %v1749_v11, %v1748_v10  ;;  %v5315_v15 = vpop.f32.mrb[12].mxu1 }
 0x2ce   : > { %v5619_v16 = vadd.f32 %v5315_v15, %v6577_v52  ;;  %v1629_v17 = vpop.f32.mrb[13].mxu1 }
 0x2cf   : > { %v5620_v18 = vadd.f32 %v6577_v52, %v1629_v17  ;;  %v5316_v19 = vpop.f32.mrb[14].mxu1 }
 0x2d0   : > { %v5621_v20 = vadd.f32 %v5316_v19, %v6577_v52  ;;  %v1632_v21 = vpop.f32.mrb[15].mxu1  ;;  %v1754_v24 = vmax.f32 %v5619_v16, 0.0 }
 0x2d1   : > { %v5622_v23 = vadd.f32 %v6577_v52, %v1632_v21  ;;  %v1752_v26 = vmax.f32 %v5620_v18, 0.0 }
 0x2d2   : > { %v1755_v25 = vmax.f32 %v5621_v20, 0.0 }
 0x2d3   : > { %v1753_v27 = vmax.f32 %v5622_v23, 0.0 }
 0x2d4   : > { %v6607_v28 = vpack.c.bf16 %v1755_v25, %v1754_v24 }
 0x2d5   : > { %v6609_v29 = vpack.c.bf16 %v1753_v27, %v1752_v26  ;;  %v5319_v31 = vpop.f32.mrb[16].mxu1 }
 0x2d6   : > { %v5623_v32 = vadd.f32 %v5319_v31, %v6577_v52  ;;  %v1645_v33 = vpop.f32.mrb[17].mxu1 }
 0x2d7   : > { %v5624_v34 = vadd.f32 %v6577_v52, %v1645_v33  ;;  %v5320_v36 = vpop.f32.mrb[18].mxu1  ;;  %v5960_v33 = vld [vmem:[%s7252_s14] ss:$8 sps:$4 sm:$0xff]  }
 0x2d8   : > { %v5625_v44 = vadd.f32 %v5320_v36, %v6577_v52  ;;  %v1648_v60 = vpop.f32.mrb[19].mxu1  ;;  %v1758_v5 = vmax.f32 %v5623_v32, 0.0  ;;  %v5966_v36 = vld [vmem:[%s7252_s14 + $0x24] ss:$8 sps:$4 sm:$0xff]  }
 0x2d9   : > { %v5626_v62 = vadd.f32 %v6577_v52, %v1648_v60  ;;  %v1756_v22 = vmax.f32 %v5624_v34, 0.0  ;;  %v5965_v34 = vld [vmem:[%s7252_s14 + $0x10] ss:$8 sps:$4 sm:$0xff]   ;;  %v5981_v60 = vld [vmem:[%s7252_s14 + $0x74] ss:$8 sps:$4 sm:$0xff]  }
 0x2da   : > { %v1759_v14 = vmax.f32 %v5625_v44, 0.0  ;;  %v5977_v44 = vld [vmem:[%s7252_s14 + $0x50] ss:$8 sps:$4 sm:$0xff]  }
 0x2db   : > { %v1757_v30 = vmax.f32 %v5626_v62, 0.0  ;;  %v5983_v62 = vld [vmem:[%s7252_s14 + $0x70] ss:$8 sps:$4 sm:$0xff]  }
 0x2dc   : > { %v6615_v35 = vpack.c.bf16 %v1759_v14, %v1758_v5  ;;  %v5986_v5 = vld [vmem:[%s7223_s15 + $0x4] ss:$8 sps:$4 sm:$0xff]   ;;  %v5984_v14 = vld [vmem:[%s7223_s15] ss:$8 sps:$4 sm:$0xff]  }
 0x2dd   : > { %v1780_v37 = vpack.c.bf16 %v1757_v30, %v1756_v22  ;;  %v5323_v38 = vpop.f32.mrb[20].mxu1  ;;  %v5987_v22 = vld [vmem:[%s7223_s15 + $0x14] ss:$8 sps:$4 sm:$0xff]   ;;  %v5989_v30 = vld [vmem:[%s7223_s15 + $0x10] ss:$8 sps:$4 sm:$0xff]  }
 0x2de   : > { %v5627_v39 = vadd.f32 %v5323_v38, %v6577_v52  ;;  %v1661_v40 = vpop.f32.mrb[21].mxu1  ;;  %v5993_v38 = vld [vmem:[%s7223_s15 + $0x34] ss:$8 sps:$4 sm:$0xff]  }
 0x2df   : > { %v5628_v41 = vadd.f32 %v6577_v52, %v1661_v40  ;;  %v5324_v45 = vpop.f32.mrb[22].mxu1  ;;  %4917 = vmatprep.subr.bf16.mxu1 %v1780_v37  ;;  %v5996_v40 = vld [vmem:[%s7223_s15 + $0x44] ss:$8 sps:$4 sm:$0xff]  }
 0x2e0   : > { %v5629_v46 = vadd.f32 %v5324_v45, %v6577_v52  ;;  %v1664_v47 = vpop.f32.mrb[23].mxu1  ;;  %4918 = vmatpush3.bf16.msra.mxu1 %v6585_v43  ;;  %v1762_v49 = vmax.f32 %v5627_v39, 0.0  ;;  %v5995_v39 = vld [vmem:[%s7223_s15 + $0x30] ss:$8 sps:$4 sm:$0xff]   ;;  %v5999_v45 = vld [vmem:[%s7223_s15 + $0x54] ss:$8 sps:$4 sm:$0xff]  }
 0x2e1   : > { %v5630_v48 = vadd.f32 %v6577_v52, %v1664_v47  ;;  %4919 = vmatprep.subr.bf16.mxu1 %v6615_v35  ;;  %v1760_v51 = vmax.f32 %v5628_v41, 0.0  ;;  %v5998_v41 = vld [vmem:[%s7223_s15 + $0x40] ss:$8 sps:$4 sm:$0xff]   ;;  %v6001_v47 = vld [vmem:[%s7223_s15 + $0x50] ss:$8 sps:$4 sm:$0xff]  }
 0x2e2   : > { %v1763_v50 = vmax.f32 %v5629_v46, 0.0 }
 0x2e3   : > { %v1761_v53 = vmax.f32 %v5630_v48, 0.0  ;;  %v6002_v48 = vld [vmem:[%s7223_s15 + $0x64] ss:$8 sps:$4 sm:$0xff]  }
 0x2e4   : > { %v1783_v54 = vpack.c.bf16 %v1763_v50, %v1762_v49  ;;  %4920 = vmatpush3.bf16.msra.mxu1 %v6583_v42  ;;  %v6004_v49 = vld [vmem:[%s7223_s15 + $0x60] ss:$8 sps:$4 sm:$0xff]   ;;  %v6005_v50 = vld [vmem:[%s7223_s15 + $0x74] ss:$8 sps:$4 sm:$0xff]  }
 0x2e5   : > { %v1782_v55 = vpack.c.bf16 %v1761_v53, %v1760_v51  ;;  %v5327_v56 = vpop.f32.mrb[24].mxu1  ;;  %v6007_v51 = vld [vmem:[%s7223_s15 + $0x70] ss:$8 sps:$4 sm:$0xff]   ;;  %v2210_v53 = vld [vmem:[#allocation2] sm:$0xff] }
 0x2e6   : > { %v5631_v57 = vadd.f32 %v5327_v56, %v6577_v52  ;;  %v1677_v61 = vpop.f32.mrb[25].mxu1  ;;  %5335 = vmatprep.mubr.msk.bf16.mxu0 %vm2191_vm2, %v2210_v53  ;;  %3381 = vst.msk [vmem:[#allocation2] sm:$0xff] %vm2865_vm3, %v6123_v9 }
 0x2e7   : > { %v5632_v63 = vadd.f32 %v6577_v52, %v1677_v61  ;;  %v5328_v0 = vpop.f32.mrb[26].mxu1  ;;  %4921 = vmatprep.subr.bf16.mxu1 %v1782_v55 }
 0x2e8   : > { %v5633_v1 = vadd.f32 %v5328_v0, %v6577_v52  ;;  %v1680_v2 = vpop.f32.mrb[27].mxu1  ;;  %4922 = vmatpush3.bf16.msra.mxu1 %v6593_v59  ;;  %v1766_v4 = vmax.f32 %v5631_v57, 0.0 }
 0x2e9   : > { %v5634_v3 = vadd.f32 %v6577_v52, %v1680_v2  ;;  %4923 = vmatprep.subr.bf16.mxu1 %v1783_v54  ;;  %v1764_v7 = vmax.f32 %v5632_v63, 0.0 }
 0x2ea   : > { %v1767_v6 = vmax.f32 %v5633_v1, 0.0 }
 0x2eb   : > { %v1765_v8 = vmax.f32 %v5634_v3, 0.0 }
 0x2ec   : > { %v1785_v10 = vpack.c.bf16 %v1767_v6, %v1766_v4  ;;  %4924 = vmatpush3.bf16.msra.mxu1 %v6591_v58 }
 0x2ed   : > { %v1784_v11 = vpack.c.bf16 %v1765_v8, %v1764_v7  ;;  %v5331_v15 = vpop.f32.mrb[28].mxu1 }
 0x2ee   : > { %v5635_v16 = vadd.f32 %v5331_v15, %v6577_v52  ;;  %v1693_v17 = vpop.f32.mrb[29].mxu1 }
 0x2ef   : > { %v5636_v18 = vadd.f32 %v6577_v52, %v1693_v17  ;;  %v5332_v19 = vpop.f32.mrb[30].mxu1  ;;  %4925 = vmatprep.subr.bf16.mxu1 %v1784_v11 }
 0x2f0   : > { %v5637_v20 = vadd.f32 %v5332_v19, %v6577_v52  ;;  %v1696_v21 = vpop.f32.mrb[31].mxu1  ;;  %4926 = vmatpush3.bf16.msra.mxu1 %v6601_v13  ;;  %v1770_v24 = vmax.f32 %v5635_v16, 0.0 }
 0x2f1   : > { %v5638_v23 = vadd.f32 %v6577_v52, %v1696_v21  ;;  %4927 = vmatprep.subr.bf16.mxu1 %v1785_v10  ;;  %v1768_v26 = vmax.f32 %v5636_v18, 0.0  ;;  %v5963_v52 = vld [vmem:[%s7252_s14 + $0x14] ss:$8 sps:$4 sm:$0xff]  }
 0x2f2   : > { %v1771_v25 = vmax.f32 %v5637_v20, 0.0 }
 0x2f3   : > { %v1769_v27 = vmax.f32 %v5638_v23, 0.0 }
 0x2f4   : > { %v1787_v31 = vpack.c.bf16 %v1771_v25, %v1770_v24  ;;  %4928 = vmatpush3.bf16.msra.mxu1 %v6599_v12 }
 0x2f5   : > { %v1786_v32 = vpack.c.bf16 %v1769_v27, %v1768_v26 }
 0x2f7   : > { %4929 = vmatprep.subr.bf16.mxu1 %v1786_v32 }
 0x2f8   : > { %4930 = vmatpush3.bf16.msra.mxu1 %v6609_v29 }
 0x2f9   : > { %4931 = vmatprep.subr.bf16.mxu1 %v1787_v31 }
 0x2fc   : > { %4932 = vmatpush3.bf16.msra.mxu1 %v6607_v28 }
 0x2fd   : > { %4981 = vmatprep.subr.bf16.mxu1 %v1780_v37  ;;  %v5992_v37 = vld [vmem:[%s7223_s15 + $0x20] ss:$8 sps:$4 sm:$0xff]  }
 0x2ff   : > { %1917 = vmatmul.mubr.bf16.vlgmr.msra.gmra.mrb[32].mxu1 %v5960_v33 }
 0x300   : > { %4982 = vmatpush3.bf16.msra.mxu1 %v6585_v43  ;;  %1924 = vmatprep.mubr.bf16.mxu1 %v5963_v52  ;;  %v5968_v43 = vld [vmem:[%s7252_s14 + $0x20] ss:$8 sps:$4 sm:$0xff]  }
 0x301   : > { %4983 = vmatprep.subr.bf16.mxu1 %v6615_v35  ;;  %v5990_v35 = vld [vmem:[%s7223_s15 + $0x24] ss:$8 sps:$4 sm:$0xff]  }
 0x304   : > { %4984 = vmatpush3.bf16.msra.mxu1 %v6583_v42  ;;  %v5969_v42 = vld [vmem:[%s7252_s14 + $0x34] ss:$8 sps:$4 sm:$0xff]  }
 0x305   : > { %4985 = vmatprep.subr.bf16.mxu1 %v1782_v55 }
 0x307   : > { %1925 = vmatmul.mubr.bf16.gmra.mrb[36].mxu1 %v5965_v34 }
 0x308   : > { %4986 = vmatpush3.bf16.msra.mxu1 %v6593_v59  ;;  %1932 = vmatprep.mubr.bf16.mxu1 %v5966_v36  ;;  %v5971_v59 = vld [vmem:[%s7252_s14 + $0x30] ss:$8 sps:$4 sm:$0xff]  }
 0x309   : > { %4987 = vmatprep.subr.bf16.mxu1 %v1783_v54 }
 0x30c   : > { %4988 = vmatpush3.bf16.msra.mxu1 %v6591_v58  ;;  %v5972_v58 = vld [vmem:[%s7252_s14 + $0x44] ss:$8 sps:$4 sm:$0xff]  }
 0x30d   : > { %4989 = vmatprep.subr.bf16.mxu1 %v1784_v11 }
 0x30f   : > { %1933 = vmatmul.mubr.bf16.gmra.mrb[40].mxu1 %v5968_v43 }
 0x310   : > { %4990 = vmatpush3.bf16.msra.mxu1 %v6601_v13  ;;  %1940 = vmatprep.mubr.bf16.mxu1 %v5969_v42  ;;  %v5974_v13 = vld [vmem:[%s7252_s14 + $0x40] ss:$8 sps:$4 sm:$0xff]  }
 0x311   : > { %4991 = vmatprep.subr.bf16.mxu1 %v1785_v10 }
 0x314   : > { %4992 = vmatpush3.bf16.msra.mxu1 %v6599_v12  ;;  %v5975_v12 = vld [vmem:[%s7252_s14 + $0x54] ss:$8 sps:$4 sm:$0xff]  }
 0x315   : > { %4993 = vmatprep.subr.bf16.mxu1 %v1786_v32 }
 0x317   : > { %1941 = vmatmul.mubr.bf16.gmra.mrb[44].mxu1 %v5971_v59 }
 0x318   : > { %4994 = vmatpush3.bf16.msra.mxu1 %v6609_v29  ;;  %1948 = vmatprep.mubr.bf16.mxu1 %v5972_v58  ;;  %v5978_v29 = vld [vmem:[%s7252_s14 + $0x64] ss:$8 sps:$4 sm:$0xff]  }
 0x319   : > { %4995 = vmatprep.subr.bf16.mxu1 %v1787_v31 }
 0x31c   : > { %4996 = vmatpush3.bf16.msra.mxu1 %v6607_v28  ;;  %v5980_v28 = vld [vmem:[%s7252_s14 + $0x60] ss:$8 sps:$4 sm:$0xff]   ;;  %s7254_s14 = sld [smem:[#allocation13_spill]] }
 0x31f   : > { %1949 = vmatmul.mubr.bf16.gmra.mrb[48].mxu1 %v5974_v13 }
 0x320   : > { %1956 = vmatprep.mubr.bf16.mxu1 %v5975_v12 }
 0x322   : > { %v6008_v46 = vld [vmem:[%s7254_s14] sm:$0xff]   ;;  %v6749_v63 = vld [vmem:[%s7254_s14 + $0x8] sm:$0xff]  }
 0x323   : > { %5333 = vmatprep.subr.bf16.mxu0 %v6008_v46 }
 0x324   : > { %5334 = vmatpush3.bf16.msra.mxu0 %v6008_v46 }
 0x325   : > { %5351 = vmatprep.subr.bf16.mxu0 %v6749_v63 }
 0x327   : > { %1957 = vmatmul.mubr.bf16.gmra.mrb[52].mxu1 %v5977_v44 }
 0x328   : > { %1964 = vmatprep.mubr.bf16.mxu1 %v5978_v29 }
 0x32f   : > { %1965 = vmatmul.mubr.bf16.gmra.mrb[56].mxu1 %v5980_v28 }
 0x330   : > { %1972 = vmatprep.mubr.bf16.mxu1 %v5981_v60 }
 0x337   : > { %1973 = vmatmul.mubr.bf16.gmra.mrb[60].mxu1 %v5983_v62 }
 0x338   : > { %2109 = vmatprep.mubr.bf16.mxu1 %v5986_v5 }
 0x33f   : > { %2110 = vmatmul.mubr.bf16.vlgmr.msra.gmra.mrb[64].mxu1 %v5984_v14 }
 0x340   : > { %2117 = vmatprep.mubr.bf16.mxu1 %v5987_v22 }
 0x347   : > { %2118 = vmatmul.mubr.bf16.gmra.mrb[68].mxu1 %v5989_v30  ;;  %v6774_v30 = vld [vmem:[#allocation2 + $0x48] sm:$0xff] }
 0x348   : > { %2125 = vmatprep.mubr.bf16.mxu1 %v5990_v35  ;;  %3382 = vst.msk [vmem:[#allocation2 + $0x48] sm:$0xff] %vm2865_vm3, %v6123_v9 }
 0x34f   : > { %2126 = vmatmul.mubr.bf16.gmra.mrb[72].mxu1 %v5992_v37 }
 0x350   : > { %2133 = vmatprep.mubr.bf16.mxu1 %v5993_v38 }
 0x357   : > { %2134 = vmatmul.mubr.bf16.gmra.mrb[76].mxu1 %v5995_v39 }
 0x358   : > { %2141 = vmatprep.mubr.bf16.mxu1 %v5996_v40 }
 0x35f   : > { %2142 = vmatmul.mubr.bf16.gmra.mrb[80].mxu1 %v5998_v41 }
 0x360   : > { %2149 = vmatprep.mubr.bf16.mxu1 %v5999_v45 }
 0x367   : > { %2150 = vmatmul.mubr.bf16.gmra.mrb[84].mxu1 %v6001_v47 }
 0x368   : > { %2157 = vmatprep.mubr.bf16.mxu1 %v6002_v48 }
 0x36f   : > { %2158 = vmatmul.mubr.bf16.gmra.mrb[88].mxu1 %v6004_v49 }
 0x370   : > { %2165 = vmatprep.mubr.bf16.mxu1 %v6005_v50 }
 0x377   : > { %2166 = vmatmul.mubr.bf16.gmra.mrb[92].mxu1 %v6007_v51 }
 0x3d2   : > { %v4933_v54 = vpop.f32.mrb[32].mxu1 }
 0x3d3   : > { %v4934_v55 = vpop.f32.mrb[33].mxu1 }
 0x3d4   : > { %v4935_v56 = vadd.f32 %v4934_v55, %v4933_v54  ;;  %v4936_v57 = vpop.f32.mrb[34].mxu1 }
 0x3d5   : > { %v4937_v61 = vpop.f32.mrb[35].mxu1 }
 0x3d6   : > { %v4938_v0 = vadd.f32 %v4937_v61, %v4936_v57 }
 0x3da   : > { %v4939_v1 = vpop.f32.mrb[36].mxu1 }
 0x3db   : > { %v4940_v2 = vpop.f32.mrb[37].mxu1 }
 0x3dc   : > { %v4941_v3 = vadd.f32 %v4940_v2, %v4939_v1  ;;  %v4942_v4 = vpop.f32.mrb[38].mxu1 }
 0x3dd   : > { %v4943_v6 = vpop.f32.mrb[39].mxu1 }
 0x3de   : > { %v4944_v7 = vadd.f32 %v4943_v6, %v4942_v4  ;;  %v6784_v4 = vld [vmem:[%s7254_s14 + $0x10] sm:$0xff]  }
 0x3e2   : > { %v4945_v8 = vpop.f32.mrb[40].mxu1 }
 0x3e3   : > { %v4946_v10 = vpop.f32.mrb[41].mxu1 }
 0x3e4   : > { %v6752_v11 = vadd.f32 %v4946_v10, %v4945_v8  ;;  %v4948_v15 = vpop.f32.mrb[42].mxu1 }
 0x3e5   : > { %v4949_v16 = vpop.f32.mrb[43].mxu1 }
 0x3e6   : > { %v6754_v17 = vadd.f32 %v4949_v16, %v4948_v15 }
 0x3ea   : > { %v4951_v18 = vpop.f32.mrb[44].mxu1 }
 0x3eb   : > { %v4952_v19 = vpop.f32.mrb[45].mxu1 }
 0x3ec   : > { %v6756_v20 = vadd.f32 %v4952_v19, %v4951_v18  ;;  %v4954_v21 = vpop.f32.mrb[46].mxu1 }
 0x3ed   : > { %v4955_v23 = vpop.f32.mrb[47].mxu1 }
 0x3ee   : > { %v6758_v24 = vadd.f32 %v4955_v23, %v4954_v21 }
 0x3f2   : > { %v4957_v25 = vpop.f32.mrb[48].mxu1 }
 0x3f3   : > { %v4958_v26 = vpop.f32.mrb[49].mxu1 }
 0x3f4   : > { %v6760_v27 = vadd.f32 %v4958_v26, %v4957_v25  ;;  %v4960_v31 = vpop.f32.mrb[50].mxu1 }
 0x3f5   : > { %v4961_v32 = vpop.f32.mrb[51].mxu1 }
 0x3f6   : > { %v6762_v33 = vadd.f32 %v4961_v32, %v4960_v31 }
 0x3fa   : > { %v4963_v52 = vpop.f32.mrb[52].mxu1 }
 0x3fb   : > { %v4964_v34 = vpop.f32.mrb[53].mxu1 }
 0x3fc   : > { %v6764_v36 = vadd.f32 %v4964_v34, %v4963_v52  ;;  %v4966_v43 = vpop.f32.mrb[54].mxu1 }
 0x3fd   : > { %v4967_v42 = vpop.f32.mrb[55].mxu1 }
 0x3fe   : > { %v6766_v59 = vadd.f32 %v4967_v42, %v4966_v43 }
 0x402   : > { %v4969_v58 = vpop.f32.mrb[56].mxu1 }
 0x403   : > { %v4970_v13 = vpop.f32.mrb[57].mxu1 }
 0x404   : > { %v6768_v12 = vadd.f32 %v4970_v13, %v4969_v58  ;;  %v4972_v44 = vpop.f32.mrb[58].mxu1 }
 0x405   : > { %v4973_v29 = vpop.f32.mrb[59].mxu1 }
 0x406   : > { %v6770_v28 = vadd.f32 %v4973_v29, %v4972_v44 }
 0x40a   : > { %v4975_v60 = vpop.f32.mrb[60].mxu1 }
 0x40b   : > { %v4976_v62 = vpop.f32.mrb[61].mxu1 }
 0x40c   : > { %v6772_v5 = vadd.f32 %v4976_v62, %v4975_v60  ;;  %v4978_v14 = vpop.f32.mrb[62].mxu1 }
 0x40d   : > { %v4979_v22 = vpop.f32.mrb[63].mxu1 }
 0x40e   : > { %v6776_v35 = vadd.f32 %v4979_v22, %v4978_v14 }
 0x412   : > { %v4997_v37 = vpop.f32.mrb[64].mxu1 }
 0x413   : > { %v4998_v38 = vpop.f32.mrb[65].mxu1 }
 0x414   : > { %v4999_v39 = vadd.f32 %v4998_v38, %v4997_v37  ;;  %v5000_v40 = vpop.f32.mrb[66].mxu1 }
 0x415   : > { %v5001_v41 = vpop.f32.mrb[67].mxu1 }
 0x416   : > { %v2174_v45 = vmax.f32 %v4935_v56, %v4999_v39  ;;  %v5002_v46 = vadd.f32 %v5001_v41, %v5000_v40 }
 0x418   : > { %v2175_v47 = vmax.f32 %v4938_v0, %v5002_v46 }
 0x41a   : > { %v2194_v48 = vpack.c.bf16 %v2175_v47, %v2174_v45  ;;  %v5003_v49 = vpop.f32.mrb[68].mxu1 }
 0x41b   : > { %v5004_v50 = vpop.f32.mrb[69].mxu1 }
 0x41c   : > { %2202 = vst.msk [vmem:[#allocation2 + $0x8] sm:$0xff] %vm2191_vm2, %v2194_v48  ;;  %v5005_v51 = vadd.f32 %v5004_v50, %v5003_v49  ;;  %v5006_v53 = vpop.f32.mrb[70].mxu1 }
 0x41d   : > { %v5007_v54 = vpop.f32.mrb[71].mxu1 }
 0x41e   : > { %v2176_v55 = vmax.f32 %v4941_v3, %v5005_v51  ;;  %v5008_v57 = vadd.f32 %v5007_v54, %v5006_v53 }
 0x420   : > { %v2177_v61 = vmax.f32 %v4944_v7, %v5008_v57 }
 0x422   : > { %v2195_v1 = vpack.c.bf16 %v2177_v61, %v2176_v55  ;;  %v5009_v2 = vpop.f32.mrb[72].mxu1 }
 0x423   : > { %v5010_v56 = vpop.f32.mrb[73].mxu1  ;;  %v6786_v0 = vld [vmem:[#allocation2 + $0x8] sm:$0xff] }
 0x424   : > { %2203 = vst.msk [vmem:[#allocation2 + $0x10] sm:$0xff] %vm2191_vm2, %v2195_v1  ;;  %v5011_v6 = vadd.f32 %v5010_v56, %v5009_v2  ;;  %v5012_v8 = vpop.f32.mrb[74].mxu1  ;;  %5336 = vmatmul.mubr.msk.bf16.vlgmr.msra.gmra.mrb[64].mxu0 %vm2191_vm2, %v6786_v0 }
 0x425   : > { %v5013_v3 = vpop.f32.mrb[75].mxu1  ;;  %5352 = vmatpush3.bf16.msra.mxu0 %v6749_v63 }
 0x426   : > { %v2178_v7 = vmax.f32 %v6752_v11, %v5011_v6  ;;  %v5014_v10 = vadd.f32 %v5013_v3, %v5012_v8  ;;  %5369 = vmatprep.subr.bf16.mxu0 %v6784_v4 }
 0x428   : > { %v2179_v15 = vmax.f32 %v6754_v17, %v5014_v10 }
 0x42a   : > { %v2196_v16 = vpack.c.bf16 %v2179_v15, %v2178_v7  ;;  %v5015_v18 = vpop.f32.mrb[76].mxu1 }
 0x42b   : > { %v5016_v19 = vpop.f32.mrb[77].mxu1  ;;  %v6795_v21 = vld [vmem:[#allocation2 + $0x10] sm:$0xff] }
 0x42c   : > { %2204 = vst.msk [vmem:[#allocation2 + $0x18] sm:$0xff] %vm2191_vm2, %v2196_v16  ;;  %v5017_v23 = vadd.f32 %v5016_v19, %v5015_v18  ;;  %v5018_v25 = vpop.f32.mrb[78].mxu1  ;;  %5339 = vmatprep.mubr.msk.bf16.mxu0 %vm2191_vm2, %v6795_v21 }
 0x42d   : > { %v5019_v63 = vpop.f32.mrb[79].mxu1 }
 0x42e   : > { %v2180_v11 = vmax.f32 %v6756_v20, %v5017_v23  ;;  %v5020_v26 = vadd.f32 %v5019_v63, %v5018_v25 }
 0x430   : > { %v2181_v31 = vmax.f32 %v6758_v24, %v5020_v26 }
 0x432   : > { %v2197_v32 = vpack.c.bf16 %v2181_v31, %v2180_v11  ;;  %v5021_v17 = vpop.f32.mrb[80].mxu1 }
 0x433   : > { %v5022_v52 = vpop.f32.mrb[81].mxu1  ;;  %v2213_v34 = vld [vmem:[#allocation2 + $0x18] sm:$0xff] }
 0x434   : > { %2205 = vst.msk [vmem:[#allocation2 + $0x20] sm:$0xff] %vm2191_vm2, %v2197_v32  ;;  %v5023_v43 = vadd.f32 %v5022_v52, %v5021_v17  ;;  %v5024_v42 = vpop.f32.mrb[82].mxu1  ;;  %5340 = vmatmul.mubr.msk.bf16.gmra.mrb[68].mxu0 %vm2191_vm2, %v2213_v34 }
 0x435   : > { %v5025_v58 = vpop.f32.mrb[83].mxu1 }
 0x436   : > { %v2182_v13 = vmax.f32 %v6760_v27, %v5023_v43  ;;  %v5026_v44 = vadd.f32 %v5025_v58, %v5024_v42 }
 0x438   : > { %v2183_v29 = vmax.f32 %v6762_v33, %v5026_v44 }
 0x43a   : > { %v2198_v20 = vpack.c.bf16 %v2183_v29, %v2182_v13  ;;  %v5027_v60 = vpop.f32.mrb[84].mxu1 }
 0x43b   : > { %v5028_v62 = vpop.f32.mrb[85].mxu1  ;;  %v2214_v24 = vld [vmem:[#allocation2 + $0x20] sm:$0xff] }
 0x43c   : > { %2206 = vst.msk [vmem:[#allocation2 + $0x28] sm:$0xff] %vm2191_vm2, %v2198_v20  ;;  %v5029_v14 = vadd.f32 %v5028_v62, %v5027_v60  ;;  %v5030_v22 = vpop.f32.mrb[86].mxu1  ;;  %5343 = vmatprep.mubr.msk.bf16.mxu0 %vm2191_vm2, %v2214_v24 }
 0x43d   : > { %v5031_v37 = vpop.f32.mrb[87].mxu1 }
 0x43e   : > { %v2184_v38 = vmax.f32 %v6764_v36, %v5029_v14  ;;  %v5032_v39 = vadd.f32 %v5031_v37, %v5030_v22 }
 0x440   : > { %v2185_v40 = vmax.f32 %v6766_v59, %v5032_v39 }
 0x442   : > { %v2199_v27 = vpack.c.bf16 %v2185_v40, %v2184_v38  ;;  %v5033_v41 = vpop.f32.mrb[88].mxu1 }
 0x443   : > { %v5034_v45 = vpop.f32.mrb[89].mxu1  ;;  %v2215_v33 = vld [vmem:[#allocation2 + $0x28] sm:$0xff] }
 0x444   : > { %2207 = vst.msk [vmem:[#allocation2 + $0x30] sm:$0xff] %vm2191_vm2, %v2199_v27  ;;  %v5035_v46 = vadd.f32 %v5034_v45, %v5033_v41  ;;  %v5036_v47 = vpop.f32.mrb[90].mxu1  ;;  %5344 = vmatmul.mubr.msk.bf16.gmra.mrb[72].mxu0 %vm2191_vm2, %v2215_v33 }
 0x445   : > { %v5037_v48 = vpop.f32.mrb[91].mxu1 }
 0x446   : > { %v2186_v49 = vmax.f32 %v6768_v12, %v5035_v46  ;;  %v5038_v50 = vadd.f32 %v5037_v48, %v5036_v47 }
 0x448   : > { %v2187_v51 = vmax.f32 %v6770_v28, %v5038_v50 }
 0x44a   : > { %v2200_v36 = vpack.c.bf16 %v2187_v51, %v2186_v49  ;;  %v5039_v53 = vpop.f32.mrb[92].mxu1 }
 0x44b   : > { %v5040_v54 = vpop.f32.mrb[93].mxu1  ;;  %v2216_v59 = vld [vmem:[#allocation2 + $0x30] sm:$0xff] }
 0x44c   : > { %2208 = vst.msk [vmem:[#allocation2 + $0x38] sm:$0xff] %vm2191_vm2, %v2200_v36  ;;  %v5041_v55 = vadd.f32 %v5040_v54, %v5039_v53  ;;  %v5042_v57 = vpop.f32.mrb[94].mxu1  ;;  %5347 = vmatprep.mubr.msk.bf16.mxu0 %vm2191_vm2, %v2216_v59 }
 0x44d   : > { %v5043_v61 = vpop.f32.mrb[95].mxu1 }
 0x44e   : > { %v2188_v1 = vmax.f32 %v6772_v5, %v5041_v55  ;;  %v5044_v2 = vadd.f32 %v5043_v61, %v5042_v57  ;;  %v6011_v5 = vld [vmem:[%s7224_s16] sm:$0xff]  }
 0x44f   : > { %5403 = vmatprep.mubr.bf16.mxu1 %v6011_v5  ;;  %v6017_v5 = vld [vmem:[%s7225_s17 + $0x10] sm:$0xff]  }
 0x450   : > { %v2189_v56 = vmax.f32 %v6776_v35, %v5044_v2  ;;  %v4612_v35 = vld [vmem:[%s7255_s30] ss:$0 sm:$0xff]  ;;  %v6012_v2 = vld [vmem:[%s7224_s16 + $0x8] sm:$0xff]   ;;  %s6127_s30 = smov 96  }
 0x452   : > { %v2201_v12 = vpack.c.bf16 %v2189_v56, %v2188_v1  ;;  %v6013_v56 = vld [vmem:[%s7224_s16 + $0x10] sm:$0xff]  }
 0x453   : > { %v2217_v6 = vld [vmem:[#allocation2 + $0x38] sm:$0xff] }
 0x454   : > { %2209 = vst.msk [vmem:[#allocation2 + $0x40] sm:$0xff] %vm2191_vm2, %v2201_v12  ;;  %5348 = vmatmul.mubr.msk.bf16.gmra.mrb[76].mxu0 %vm2191_vm2, %v2217_v6  ;;  %v6014_v12 = vld [vmem:[%s7224_s16 + $0x18] sm:$0xff]  }
 0x455   : > { %5353 = vmatprep.mubr.msk.bf16.mxu0 %vm2191_vm2, %v6786_v0 }
 0x45b   : > { %v2218_v28 = vld [vmem:[#allocation2 + $0x40] sm:$0xff] }
 0x45c   : > { %5354 = vmatmul.mubr.msk.bf16.vlgmr.msra.gmra.mrb[64].mxu0 %vm2191_vm2, %v6795_v21 }
 0x45d   : > { %5357 = vmatprep.mubr.msk.bf16.mxu0 %vm2191_vm2, %v2213_v34  ;;  %5370 = vmatpush3.bf16.msra.mxu0 %v6784_v4 }
 0x464   : > { %5358 = vmatmul.mubr.msk.bf16.gmra.mrb[68].mxu0 %vm2191_vm2, %v2214_v24 }
 0x465   : > { %5361 = vmatprep.mubr.msk.bf16.mxu0 %vm2191_vm2, %v2215_v33 }
 0x46c   : > { %5362 = vmatmul.mubr.msk.bf16.gmra.mrb[72].mxu0 %vm2191_vm2, %v2216_v59 }
 0x46d   : > { %5365 = vmatprep.mubr.msk.bf16.mxu0 %vm2191_vm2, %v2217_v6 }
 0x474   : > { %5366 = vmatmul.mubr.msk.bf16.gmra.mrb[76].mxu0 %vm2191_vm2, %v2218_v28 }
 0x475   : > { %5371 = vmatprep.mubr.msk.bf16.mxu0 %vm2191_vm2, %v6795_v21 }
 0x47c   : > { %5372 = vmatmul.mubr.msk.bf16.vlgmr.msra.gmra.mrb[64].mxu0 %vm2191_vm2, %v2213_v34 }
 0x47d   : > { %5375 = vmatprep.mubr.msk.bf16.mxu0 %vm2191_vm2, %v2214_v24 }
 0x484   : > { %5376 = vmatmul.mubr.msk.bf16.gmra.mrb[68].mxu0 %vm2191_vm2, %v2215_v33 }
 0x485   : > { %5379 = vmatprep.mubr.msk.bf16.mxu0 %vm2191_vm2, %v2216_v59 }
 0x48c   : > { %5380 = vmatmul.mubr.msk.bf16.gmra.mrb[72].mxu0 %vm2191_vm2, %v2217_v6  ;;  %v6015_v6 = vld [vmem:[%s7225_s17] sm:$0xff]  }
 0x48d   : > { %5383 = vmatprep.mubr.msk.bf16.mxu0 %vm2191_vm2, %v2218_v28  ;;  %v6016_v28 = vld [vmem:[%s7225_s17 + $0x8] sm:$0xff]  }
 0x494   : > { %5384 = vmatmul.mubr.msk.bf16.gmra.mrb[76].mxu0 %vm2191_vm2, %v6774_v30 }
 0x54f   : > { %v5373_v4 = vpop.f32.mrb[64].mxu0 }
 0x550   : > { %v5639_v0 = vadd.f32 %v5373_v4, %v4612_v35  ;;  %v2542_v8 = vpop.f32.mrb[65].mxu0  ;;  %v6019_v4 = vld [vmem:[%s7256_s5] sm:$0xff]  }
 0x551   : > { %v5640_v3 = vadd.f32 %v4612_v35, %v2542_v8  ;;  %v5374_v7 = vpop.f32.mrb[66].mxu0  ;;  %v6020_v8 = vld [vmem:[%s7256_s5 + $0x8] sm:$0xff]  }
 0x552   : > { %v5641_v10 = vadd.f32 %v5374_v7, %v4612_v35  ;;  %v2545_v15 = vpop.f32.mrb[67].mxu0  ;;  %v2623_v18 = vmax.f32 %v5639_v0, 0.0  ;;  %v6124_v0 = vmov 0.0  }
 0x553   : > { %v5642_v16 = vadd.f32 %v4612_v35, %v2545_v15  ;;  %v2621_v30 = vmax.f32 %v5640_v3, 0.0  ;;  %5467 = vmatprep.subr.bf16.mxu0 %v6124_v0  ;;  %5471 = vmatprep.mubr.msk.bf16.mxu0 %vm6125_vm4, %v6124_v0 }
 0x554   : > { %v2624_v19 = vmax.f32 %v5641_v10, 0.0 }
 0x555   : > { %v2622_v21 = vmax.f32 %v5642_v16, 0.0 }
 0x556   : > { %v6847_v23 = vpack.c.bf16 %v2624_v19, %v2623_v18 }
 0x557   : > { %v2637_v25 = vpack.c.bf16 %v2622_v21, %v2621_v30  ;;  %v5377_v63 = vpop.f32.mrb[68].mxu0 }
 0x558   : > { %v5643_v11 = vadd.f32 %v5377_v63, %v4612_v35  ;;  %v2558_v26 = vpop.f32.mrb[69].mxu0 }
 0x559   : > { %v5644_v31 = vadd.f32 %v4612_v35, %v2558_v26  ;;  %v5378_v32 = vpop.f32.mrb[70].mxu0  ;;  %5387 = vmatprep.subr.bf16.mxu1 %v2637_v25 }
 0x55a   : > { %v5645_v17 = vadd.f32 %v5378_v32, %v4612_v35  ;;  %v2561_v52 = vpop.f32.mrb[71].mxu0  ;;  %5388 = vmatpush3.bf16.msra.mxu1 %v2637_v25  ;;  %v2627_v43 = vmax.f32 %v5643_v11, 0.0 }
 0x55b   : > { %v5646_v34 = vadd.f32 %v4612_v35, %v2561_v52  ;;  %5389 = vmatprep.subr.bf16.mxu1 %v6847_v23  ;;  %v2625_v58 = vmax.f32 %v5644_v31, 0.0  ;;  %v6021_v52 = vld [vmem:[%s7256_s5 + $0x10] sm:$0xff]  }
 0x55c   : > { %v2628_v42 = vmax.f32 %v5645_v17, 0.0 }
 0x55d   : > { %v2626_v13 = vmax.f32 %v5646_v34, 0.0 }
 0x55e   : > { %v2640_v44 = vpack.c.bf16 %v2628_v42, %v2627_v43  ;;  %5390 = vmatpush3.bf16.msra.mxu1 %v6847_v23  ;;  %v6022_v42 = vld [vmem:[%s7256_s5 + $0x18] sm:$0xff]  }
 0x55f   : > { %v2639_v29 = vpack.c.bf16 %v2626_v13, %v2625_v58  ;;  %v5381_v20 = vpop.f32.mrb[72].mxu0 }
 0x560   : > { %v5647_v60 = vadd.f32 %v5381_v20, %v4612_v35  ;;  %v2574_v62 = vpop.f32.mrb[73].mxu0 }
 0x561   : > { %v5648_v24 = vadd.f32 %v4612_v35, %v2574_v62  ;;  %v5382_v14 = vpop.f32.mrb[74].mxu0  ;;  %5391 = vmatprep.subr.bf16.mxu1 %v2639_v29 }
 0x562   : > { %v5649_v22 = vadd.f32 %v5382_v14, %v4612_v35  ;;  %v2577_v37 = vpop.f32.mrb[75].mxu0  ;;  %5392 = vmatpush3.bf16.msra.mxu1 %v2639_v29  ;;  %v2631_v39 = vmax.f32 %v5647_v60, 0.0 }
 0x563   : > { %v5650_v38 = vadd.f32 %v4612_v35, %v2577_v37  ;;  %5393 = vmatprep.subr.bf16.mxu1 %v2640_v44  ;;  %v2629_v27 = vmax.f32 %v5648_v24, 0.0  ;;  %v6024_v37 = vld [vmem:[%s7256_s5 + $0x28] sm:$0xff]  }
 0x564   : > { %v2632_v40 = vmax.f32 %v5649_v22, 0.0  ;;  %v6023_v22 = vld [vmem:[%s7256_s5 + $0x20] sm:$0xff]  }
 0x565   : > { %v2630_v41 = vmax.f32 %v5650_v38, 0.0  ;;  %v6025_v38 = vld [vmem:[%s7256_s5 + $0x30] sm:$0xff]  }
 0x566   : > { %v2642_v45 = vpack.c.bf16 %v2632_v40, %v2631_v39  ;;  %5394 = vmatpush3.bf16.msra.mxu1 %v2640_v44  ;;  %v6026_v39 = vld [vmem:[%s7256_s5 + $0x38] sm:$0xff]   ;;  %v6027_v40 = vld [vmem:[%s7215_s7] sm:$0xff]  }
 0x567   : > { %v2641_v33 = vpack.c.bf16 %v2630_v41, %v2629_v27  ;;  %v5385_v46 = vpop.f32.mrb[76].mxu0  ;;  %5468 = vmatpush3.bf16.msra.mxu0 %v6027_v40  ;;  %v6028_v27 = vld [vmem:[%s7215_s7 + $0x8] sm:$0xff]   ;;  %v4646_v41 = vld [vmem:[%s7214_s6] ss:$0 sm:$0xff] }
 0x568   : > { %v5651_v47 = vadd.f32 %v5385_v46, %v4612_v35  ;;  %v2590_v48 = vpop.f32.mrb[77].mxu0  ;;  %5469 = vmatprep.subr.bf16.mxu0 %v6124_v0 }
 0x569   : > { %v5652_v49 = vadd.f32 %v4612_v35, %v2590_v48  ;;  %v5386_v50 = vpop.f32.mrb[78].mxu0  ;;  %5395 = vmatprep.subr.bf16.mxu1 %v2641_v33 }
 0x56a   : > { %v5653_v51 = vadd.f32 %v5386_v50, %v4612_v35  ;;  %v2593_v36 = vpop.f32.mrb[79].mxu0  ;;  %5396 = vmatpush3.bf16.msra.mxu1 %v2641_v33  ;;  %v2635_v54 = vmax.f32 %v5651_v47, 0.0 }
 0x56b   : > { %v5654_v53 = vadd.f32 %v4612_v35, %v2593_v36  ;;  %5397 = vmatprep.subr.bf16.mxu1 %v2642_v45  ;;  %v2633_v55 = vmax.f32 %v5652_v49, 0.0  ;;  %v6018_v35 = vld [vmem:[%s7225_s17 + $0x18] sm:$0xff]   ;;  %5470 = vmatpush3.bf16.msra.mxu0 %v6028_v27 }
 0x56c   : > { %v2636_v59 = vmax.f32 %v5653_v51, 0.0  ;;  %v4668_v51 = vld [vmem:[%s7216_s8] ss:$0 sm:$0xff] }
 0x56d   : > { %v2634_v57 = vmax.f32 %v5654_v53, 0.0 }
 0x56e   : > { %v2644_v61 = vpack.c.bf16 %v2636_v59, %v2635_v54  ;;  %5398 = vmatpush3.bf16.msra.mxu1 %v2642_v45 }
 0x56f   : > { %v2643_v1 = vpack.c.bf16 %v2634_v57, %v2633_v55 }
 0x571   : > { %5399 = vmatprep.subr.bf16.mxu1 %v2643_v1 }
 0x572   : > { %5400 = vmatpush3.bf16.msra.mxu1 %v2643_v1 }
 0x573   : > { %5401 = vmatprep.subr.bf16.mxu1 %v2644_v61 }
 0x576   : > { %5402 = vmatpush3.bf16.msra.mxu1 %v2644_v61 }
 0x577   : > { %5411 = vmatprep.subr.bf16.mxu1 %v2637_v25 }
 0x579   : > { %5404 = vmatmul.mubr.bf16.vlgmr.msra.gmra.mrb[96].mxu1 %v6012_v2  ;;  %v6029_v2 = vld [vmem:[%s7226_s18] sm:$0xff]  }
 0x57a   : > { %5412 = vmatpush3.bf16.msra.mxu1 %v2637_v25  ;;  %5407 = vmatprep.mubr.bf16.mxu1 %v6013_v56 }
 0x57b   : > { %5413 = vmatprep.subr.bf16.mxu1 %v6847_v23 }
 0x57e   : > { %5414 = vmatpush3.bf16.msra.mxu1 %v6847_v23 }
 0x57f   : > { %5415 = vmatprep.subr.bf16.mxu1 %v2639_v29 }
 0x581   : > { %5408 = vmatmul.mubr.bf16.gmra.mrb[100].mxu1 %v6014_v12 }
 0x582   : > { %5416 = vmatpush3.bf16.msra.mxu1 %v2639_v29  ;;  %5427 = vmatprep.mubr.bf16.mxu1 %v6015_v6 }
 0x583   : > { %5417 = vmatprep.subr.bf16.mxu1 %v2640_v44 }
 0x586   : > { %5418 = vmatpush3.bf16.msra.mxu1 %v2640_v44 }
 0x587   : > { %5419 = vmatprep.subr.bf16.mxu1 %v2641_v33 }
 0x58a   : > { %5420 = vmatpush3.bf16.msra.mxu1 %v2641_v33 }
 0x58b   : > { %5421 = vmatprep.subr.bf16.mxu1 %v2642_v45 }
 0x58e   : > { %5422 = vmatpush3.bf16.msra.mxu1 %v2642_v45 }
 0x58f   : > { %5423 = vmatprep.subr.bf16.mxu1 %v2643_v1 }
 0x592   : > { %5424 = vmatpush3.bf16.msra.mxu1 %v2643_v1 }
 0x593   : > { %5425 = vmatprep.subr.bf16.mxu1 %v2644_v61 }
 0x596   : > { %5426 = vmatpush3.bf16.msra.mxu1 %v2644_v61 }
 0x597   : > { %5435 = vmatprep.subr.bf16.mxu1 %v6124_v0 }
 0x599   : > { %5428 = vmatmul.mubr.bf16.vlgmr.msra.gmra.mrb[104].mxu1 %v6016_v28 }
 0x59a   : > { %5431 = vmatprep.mubr.bf16.mxu1 %v6017_v5  ;;  %5436 = vmatpush3.bf16.msra.mxu1 %v6019_v4 }
 0x59b   : > { %5437 = vmatprep.subr.bf16.mxu1 %v6124_v0 }
 0x59e   : > { %5438 = vmatpush3.bf16.msra.mxu1 %v6020_v8 }
 0x59f   : > { %5443 = vmatprep.subr.bf16.mxu1 %v6124_v0 }
 0x5a1   : > { %5432 = vmatmul.mubr.bf16.gmra.mrb[108].mxu1 %v6018_v35 }
 0x5a2   : > { %5439 = vmatprep.mubr.msk.bf16.mxu1 %vm6125_vm4, %v6124_v0 }
 0x64c   : > { %v5405_v3 = vpop.f32.mrb[96].mxu1 }
 0x64d   : > { %v2711_v7 = vpop.f32.mrb[97].mxu1 }
 0x64e   : > { %v5406_v10 = vpop.f32.mrb[98].mxu1 }
 0x64f   : > { %v2714_v15 = vpop.f32.mrb[99].mxu1 }
 0x654   : > { %v5409_v16 = vpop.f32.mrb[100].mxu1 }
 0x655   : > { %v2727_v18 = vpop.f32.mrb[101].mxu1 }
 0x656   : > { %v5410_v19 = vpop.f32.mrb[102].mxu1 }
 0x657   : > { %v2730_v30 = vpop.f32.mrb[103].mxu1 }
 0x66c   : > { %v5429_v21 = vpop.f32.mrb[104].mxu1 }
 0x66d   : > { %v2841_v23 = vmax.f32 %v5405_v3, %v5429_v21  ;;  %v2808_v25 = vpop.f32.mrb[105].mxu1  ;;  %v6035_v21 = vld [vmem:[%s7226_s18 + $0x30] sm:$0xff]  }
 0x66e   : > { %v2839_v63 = vmax.f32 %v2711_v7, %v2808_v25  ;;  %v5430_v11 = vpop.f32.mrb[106].mxu1  ;;  %v6037_v25 = vld [vmem:[%s7217_s9] sm:$0xff]  }
 0x66f   : > { %v2842_v26 = vmax.f32 %v5406_v10, %v5430_v11  ;;  %v2811_v31 = vpop.f32.mrb[107].mxu1  ;;  %v3399_v11 = vld [vmem:[#allocation2] sm:$0xff] }
 0x670   : > { %v2840_v32 = vmax.f32 %v2714_v15, %v2811_v31  ;;  %v6030_v15 = vld [vmem:[%s7226_s18 + $0x8] sm:$0xff]   ;;  %4148 = vst.msk [vmem:[#allocation2] sm:$0xff] %vm2191_vm2, %v6123_v9 }
 0x671   : > { %v2918_v17 = vpack.c.bf16 %v2842_v26, %v2841_v23  ;;  %v6036_v23 = vld [vmem:[%s7226_s18 + $0x38] sm:$0xff]   ;;  %v6039_v26 = vld [vmem:[%s7217_s9 + $0x10] sm:$0xff]  }
 0x672   : > { %v2848_v34 = vpack.c.bf16 %v2840_v32, %v2839_v63  ;;  %v6038_v63 = vld [vmem:[%s7217_s9 + $0x8] sm:$0xff]  }
 0x674   : > { %5440 = vmatmul.mubr.msk.bf16.vlgmr.msra.gmra.mrb[112].mxu1 %vm2865_vm3, %v2848_v34  ;;  %v5433_v43 = vpop.f32.mrb[108].mxu1 }
 0x675   : > { %5444 = vmatpush3.bf16.msra.mxu1 %v6021_v52  ;;  %5447 = vmatprep.mubr.msk.bf16.mxu1 %vm6125_vm4, %v6124_v0  ;;  %v2845_v58 = vmax.f32 %v5409_v16, %v5433_v43  ;;  %v2824_v13 = vpop.f32.mrb[109].mxu1  ;;  %v6031_v16 = vld [vmem:[%s7226_s18 + $0x10] sm:$0xff]  }
 0x676   : > { %5445 = vmatprep.subr.bf16.mxu1 %v6124_v0  ;;  %v2843_v44 = vmax.f32 %v2727_v18, %v2824_v13  ;;  %v5434_v29 = vpop.f32.mrb[110].mxu1  ;;  %v6032_v18 = vld [vmem:[%s7226_s18 + $0x18] sm:$0xff]  }
 0x677   : > { %v2846_v20 = vmax.f32 %v5410_v19, %v5434_v29  ;;  %v2827_v60 = vpop.f32.mrb[111].mxu1  ;;  %v6033_v19 = vld [vmem:[%s7226_s18 + $0x20] sm:$0xff]  }
 0x678   : > { %v2844_v62 = vmax.f32 %v2730_v30, %v2827_v60  ;;  %v6034_v30 = vld [vmem:[%s7226_s18 + $0x28] sm:$0xff]  }
 0x679   : > { %5446 = vmatpush3.bf16.msra.mxu1 %v6022_v42  ;;  %v3046_v24 = vpack.c.bf16 %v2846_v20, %v2845_v58  ;;  %v6040_v20 = vld [vmem:[%s7217_s9 + $0x18] sm:$0xff]  }
 0x67a   : > { %v2982_v14 = vpack.c.bf16 %v2844_v62, %v2843_v44  ;;  %5451 = vmatprep.subr.bf16.mxu1 %v6124_v0 }
 0x680   : > { %5448 = vmatmul.mubr.msk.bf16.vlgmr.msra.gmra.mrb[112].mxu1 %vm2865_vm3, %v2918_v17 }
 0x681   : > { %5452 = vmatpush3.bf16.msra.mxu1 %v6023_v22  ;;  %5455 = vmatprep.mubr.msk.bf16.mxu1 %vm6125_vm4, %v6124_v0 }
 0x682   : > { %5453 = vmatprep.subr.bf16.mxu1 %v6124_v0 }
 0x685   : > { %5454 = vmatpush3.bf16.msra.mxu1 %v6024_v37 }
 0x686   : > { %5459 = vmatprep.subr.bf16.mxu1 %v6124_v0 }
 0x68c   : > { %5456 = vmatmul.mubr.msk.bf16.vlgmr.msra.gmra.mrb[112].mxu1 %vm2865_vm3, %v2982_v14  ;;  %v6041_v14 = vld [vmem:[%s7217_s9 + $0x20] sm:$0xff]  }
 0x68d   : > { %5460 = vmatpush3.bf16.msra.mxu1 %v6025_v38  ;;  %5463 = vmatprep.mubr.msk.bf16.mxu1 %vm6125_vm4, %v6124_v0 }
 0x68e   : > { %5461 = vmatprep.subr.bf16.mxu1 %v6124_v0 }
 0x691   : > { %5462 = vmatpush3.bf16.msra.mxu1 %v6026_v39 }
 0x692   : > { %5499 = vmatprep.subr.bf16.mxu1 %v6037_v25 }
 0x698   : > { %5464 = vmatmul.mubr.msk.bf16.vlgmr.msra.gmra.mrb[112].mxu1 %vm2865_vm3, %v3046_v24 }
 0x699   : > { %5500 = vmatpush3.bf16.msra.mxu1 %v6037_v25  ;;  %5503 = vmatprep.mubr.msk.bf16.mxu1 %vm2865_vm3, %v3399_v11 }
 0x69a   : > { %5501 = vmatprep.subr.bf16.mxu1 %v6038_v63 }
 0x69d   : > { %5502 = vmatpush3.bf16.msra.mxu1 %v6038_v63 }
 0x69e   : > { %5519 = vmatprep.subr.bf16.mxu1 %v6039_v26 }
 0x76b   : > { %v3101_v45 = vpop.f32.mrb[112].mxu1 }
 0x76c   : > { %v5465_v33 = vpop.f32.mrb[113].mxu1  ;;  %v5655_v47 = vadd.f32 %v4646_v41, %v3101_v45 }
 0x76d   : > { %v3104_v46 = vpop.f32.mrb[114].mxu1 }
 0x76e   : > { %v5656_v48 = vadd.f32 %v4646_v41, %v3104_v46  ;;  %v5466_v49 = vpop.f32.mrb[115].mxu1 }
 0x770   : > { %v3110_v50 = vpack.c.bf16 %v5656_v48, %v5655_v47 }
 0x772   : > { %5472 = vmatmul.mubr.msk.bf16.vlgmr.msra.gmra.mrb[80].mxu0 %vm2865_vm3, %v3110_v50 }
 0x773   : > { %5483 = vmatprep.mubr.msk.bf16.mxu0 %vm3258_vm5, %v6029_v2 }
 0x845   : > { %v3171_v36 = vpop.f32.mrb[80].mxu0 }
 0x846   : > { %v5473_v53 = vpop.f32.mrb[81].mxu0  ;;  %v3172_v59 = vadd.f32 %v4668_v51, %v3171_v36 }
 0x847   : > { %v3174_v54 = vpop.f32.mrb[82].mxu0  ;;  %v6042_v53 = vld [vmem:[%s7217_s9 + $0x28] sm:$0xff]  }
 0x848   : > { %v3175_v55 = vadd.f32 %v4668_v51, %v3174_v54  ;;  %v5474_v57 = vpop.f32.mrb[83].mxu0 }
 0x849   : > { %v4698_v57 = vld [vmem:[%s7218_s10] ss:$0 sm:$0xff] }
 0x84a   : > { %v5905_v61 = vpack.i.bf16 %v3175_v55, %v3172_v59  ;;  %v3214_v1 = vpack.c.bf16 %v3175_v55, %v3172_v59  ;;  %v3408_v59 = vld [vmem:[#allocation2 + $0x48] sm:$0xff]  ;;  %v6043_v55 = vld [vmem:[%s7227_s19] sm:$0xff]  }
 0x84c   : > { %5906 = vrot.lane.b32.xlu1 %v5905_v61, %s6126_s28  ;;  %5896 = vrot.lane.b32.xlu0 %v5905_v61, %s6127_s30  ;;  %s7166_s28 = scalar_lea.hbm %s7228_s20, %s4753_s13  ;;  %s4408_s30 = scalar_lea.sflag [#allocation4], %s621_s29 }
 0x84d   : > { %5475 = vmatprep.subr.bf16.mxu0 %v3214_v1 }
 0x84e   : > { %5476 = vmatpush3.bf16.msra.mxu0 %v3214_v1 }
 0x850   : > { %5901 = vrot.lane.b32.xlu0 %v5905_v61, %s6128_s21  ;;  %s4485_s21 = sshll.u32 %s621_s29, 3 }
 0x851   : > { %s623_s26 = scalar_lea.vmem [#allocation3], %s4485_s21  ;;  %s6063_s21 = sshll.u32 %s6129_s2, 4  ;;  %s6064_s21 = int_to_ptr.vmem [resolvable:$false] %s6063_s21 }
 0x852   : > { %s4422_s23 = sshll.u32 %s623_s26, 4  ;;  %s6065_s5 = scalar_lea.vmem %s6064_s21, 256  ;;  %s7168_s23 = int_to_ptr.vmem [resolvable:$true] %s4422_s23 }
 0x853   : > { %s6059_s0 = scalar_lea.vmem %s7168_s23, 128  ;;  %p6066_p0 = scmp.lt.s32.totalorder %s7168_s23, %s6064_s21 }
 0x854   : > { %p6060_p11 = scmp.ne.s32.totalorder %s7168_s23, %s6059_s0  ;;  %p6067_p1 = scmp.lt.s32.totalorder %s6065_s5, %s6059_s0 }
 0x856   : > { %p6061_p12 = pnand %p6060_p11, %p6273_p5  ;;  %p6068_p2 = por %p6067_p1, %p6066_p0 }
 0x858   : > { %p6062_p13 = pneg %p6061_p12 }
 0x85a   : > { %p6069_p3 = pnand %p6068_p2, %p6062_p13 }
 0x8be   : > { %v5897_v56 = vpop.permute.xlu0 %5896  ;;  %v5907_v28 = vpop.permute.xlu1 %5906 }
 0x8bf   : > { %v5899_v12 = vunpack.i.h.bf16 %v5897_v56  ;;  %v5898_v6 = vunpack.i.l.bf16 %v5897_v56  ;;  %v5909_v4 = vunpack.i.h.bf16 %v5907_v28  ;;  %v5908_v0 = vunpack.i.l.bf16 %v5907_v28 }
 0x8c1   : > { %v3215_v5 = vpack.c.bf16 %v5899_v12, %v5898_v6  ;;  %v3217_v10 = vpack.c.bf16 %v5909_v4, %v5908_v0 }
 0x8c2   : > { %v5902_v35 = vpop.permute.xlu0 %5901 }
 0x8c3   : > { %v5904_v8 = vunpack.i.h.bf16 %v5902_v35  ;;  %v5903_v3 = vunpack.i.l.bf16 %v5902_v35  ;;  %5477 = vmatprep.subr.bf16.mxu0 %v3215_v5 }
 0x8c4   : > { %5478 = vmatpush3.bf16.msra.mxu0 %v3215_v5 }
 0x8c5   : > { %v3216_v7 = vpack.c.bf16 %v5904_v8, %v5903_v3 }
 0x8c7   : > { %5479 = vmatprep.subr.bf16.mxu0 %v3216_v7 }
 0x8c8   : > { %5480 = vmatpush3.bf16.msra.mxu0 %v3216_v7 }
 0x8c9   : > { %5481 = vmatprep.subr.bf16.mxu0 %v3217_v10 }
 0x8cc   : > { %5482 = vmatpush3.bf16.msra.mxu0 %v3217_v10 }
 0x8cf   : > { %5484 = vmatmul.mubr.msk.bf16.vlgmr.msra.gmra.mrb[84].mxu0 %vm3258_vm5, %v6030_v15 }
 0x8d0   : > { %5487 = vmatprep.mubr.msk.bf16.mxu0 %vm3258_vm5, %v6031_v16 }
 0x8d7   : > { %5488 = vmatmul.mubr.msk.bf16.gmra.mrb[88].mxu0 %vm3258_vm5, %v6032_v18 }
 0x8d8   : > { %5491 = vmatprep.mubr.msk.bf16.mxu0 %vm3258_vm5, %v6033_v19 }
 0x8df   : > { %5492 = vmatmul.mubr.msk.bf16.gmra.mrb[92].mxu0 %vm3258_vm5, %v6034_v30 }
 0x8e0   : > { %5495 = vmatprep.mubr.msk.bf16.mxu0 %vm3258_vm5, %v6035_v21 }
 0x8e7   : > { %5496 = vmatmul.mubr.msk.bf16.gmra.mrb[96].mxu0 %vm3258_vm5, %v6036_v23 }
 0x8e8   : > { %5575 = vmatprep.mubr.bf16.mxu0 %v6043_v55  ;;  %v6050_v55 = vld [vmem:[%s7227_s19 + $0x38] sm:$0xff]  }
 0x9a2   : > { %v5485_v31 = vpop.f32.mrb[84].mxu0 }
 0x9a3   : > { %v3317_v32 = vpop.f32.mrb[85].mxu0 }
 0x9a4   : > { %v5486_v17 = vpop.f32.mrb[86].mxu0 }
 0x9a5   : > { %v3384_v52 = vpack.c.bf16 %v5486_v17, %v5485_v31  ;;  %v3320_v34 = vpop.f32.mrb[87].mxu0 }
 0x9a6   : > { %v3383_v43 = vpack.c.bf16 %v3320_v34, %v3317_v32 }
 0x9a7   : > { %3392 = vst.msk [vmem:[#allocation2 + $0x10] sm:$0xff] %vm2865_vm3, %v3384_v52 }
 0x9a8   : > { %3391 = vst.msk [vmem:[#allocation2 + $0x8] sm:$0xff] %vm2865_vm3, %v3383_v43 }
 0x9aa   : > { %v5489_v42 = vpop.f32.mrb[88].mxu0 }
 0x9ab   : > { %v3333_v58 = vpop.f32.mrb[89].mxu0 }
 0x9ac   : > { %v5490_v13 = vpop.f32.mrb[90].mxu0 }
 0x9ad   : > { %v3386_v44 = vpack.c.bf16 %v5490_v13, %v5489_v42  ;;  %v3336_v9 = vpop.f32.mrb[91].mxu0 }
 0x9ae   : > { %v3385_v29 = vpack.c.bf16 %v3336_v9, %v3333_v58  ;;  %v3401_v62 = vld [vmem:[#allocation2 + $0x10] sm:$0xff] }
 0x9af   : > { %3394 = vst.msk [vmem:[#allocation2 + $0x20] sm:$0xff] %vm2865_vm3, %v3386_v44  ;;  %v3400_v60 = vld [vmem:[#allocation2 + $0x8] sm:$0xff] }
 0x9b0   : > { %3393 = vst.msk [vmem:[#allocation2 + $0x18] sm:$0xff] %vm2865_vm3, %v3385_v29  ;;  %5504 = vmatmul.mubr.msk.bf16.vlgmr.msra.gmra.mrb[116].mxu1 %vm2865_vm3, %v3400_v60 }
 0x9b1   : > { %5507 = vmatprep.mubr.msk.bf16.mxu1 %vm2865_vm3, %v3401_v62  ;;  %5520 = vmatpush3.bf16.msra.mxu1 %v6039_v26 }
 0x9b2   : > { %v5493_v24 = vpop.f32.mrb[92].mxu0  ;;  %5521 = vmatprep.subr.bf16.mxu1 %v6040_v20 }
 0x9b3   : > { %v3349_v22 = vpop.f32.mrb[93].mxu0 }
 0x9b4   : > { %v5494_v37 = vpop.f32.mrb[94].mxu0 }
 0x9b5   : > { %v3388_v38 = vpack.c.bf16 %v5494_v37, %v5493_v24  ;;  %v3352_v39 = vpop.f32.mrb[95].mxu0  ;;  %5522 = vmatpush3.bf16.msra.mxu1 %v6040_v20 }
 0x9b6   : > { %v3387_v40 = vpack.c.bf16 %v3352_v39, %v3349_v22  ;;  %5539 = vmatprep.subr.bf16.mxu1 %v6041_v14  ;;  %v3403_v41 = vld [vmem:[#allocation2 + $0x20] sm:$0xff] }
 0x9b7   : > { %3396 = vst.msk [vmem:[#allocation2 + $0x30] sm:$0xff] %vm2865_vm3, %v3388_v38  ;;  %v3402_v27 = vld [vmem:[#allocation2 + $0x18] sm:$0xff] }
 0x9b8   : > { %3395 = vst.msk [vmem:[#allocation2 + $0x28] sm:$0xff] %vm2865_vm3, %v3387_v40  ;;  %5508 = vmatmul.mubr.msk.bf16.gmra.mrb[120].mxu1 %vm2865_vm3, %v3402_v27 }
 0x9b9   : > { %5511 = vmatprep.mubr.msk.bf16.mxu1 %vm2865_vm3, %v3403_v41 }
 0x9ba   : > { %v5497_v45 = vpop.f32.mrb[96].mxu0 }
 0x9bb   : > { %v3365_v33 = vpop.f32.mrb[97].mxu0 }
 0x9bc   : > { %v5498_v46 = vpop.f32.mrb[98].mxu0 }
 0x9bd   : > { %v3390_v47 = vpack.c.bf16 %v5498_v46, %v5497_v45  ;;  %v3368_v48 = vpop.f32.mrb[99].mxu0 }
 0x9be   : > { %v3389_v49 = vpack.c.bf16 %v3368_v48, %v3365_v33  ;;  %v3405_v51 = vld [vmem:[#allocation2 + $0x30] sm:$0xff] }
 0x9bf   : > { %3398 = vst.msk [vmem:[#allocation2 + $0x40] sm:$0xff] %vm2865_vm3, %v3390_v47  ;;  %v3404_v50 = vld [vmem:[#allocation2 + $0x28] sm:$0xff] }
 0x9c0   : > { %3397 = vst.msk [vmem:[#allocation2 + $0x38] sm:$0xff] %vm2865_vm3, %v3389_v49  ;;  %5512 = vmatmul.mubr.msk.bf16.gmra.mrb[124].mxu1 %vm2865_vm3, %v3404_v50 }
 0x9c1   : > { %5515 = vmatprep.mubr.msk.bf16.mxu1 %vm2865_vm3, %v3405_v51 }
 0x9c6   : > { %v3407_v54 = vld [vmem:[#allocation2 + $0x40] sm:$0xff] }
 0x9c7   : > { %v3406_v36 = vld [vmem:[#allocation2 + $0x38] sm:$0xff] }
 0x9c8   : > { %5516 = vmatmul.mubr.msk.bf16.gmra.mrb[128].mxu1 %vm2865_vm3, %v3406_v36 }
 0x9c9   : > { %5523 = vmatprep.mubr.msk.bf16.mxu1 %vm2865_vm3, %v3400_v60 }
 0x9d0   : > { %5524 = vmatmul.mubr.msk.bf16.vlgmr.msra.gmra.mrb[116].mxu1 %vm2865_vm3, %v3401_v62 }
 0x9d1   : > { %5527 = vmatprep.mubr.msk.bf16.mxu1 %vm2865_vm3, %v3402_v27  ;;  %5540 = vmatpush3.bf16.msra.mxu1 %v6041_v14 }
 0x9d2   : > { %5541 = vmatprep.subr.bf16.mxu1 %v6042_v53 }
 0x9d5   : > { %5542 = vmatpush3.bf16.msra.mxu1 %v6042_v53  ;;  %v6047_v53 = vld [vmem:[%s7227_s19 + $0x20] sm:$0xff]  }
 0x9d8   : > { %5528 = vmatmul.mubr.msk.bf16.gmra.mrb[120].mxu1 %vm2865_vm3, %v3403_v41 }
 0x9d9   : > { %5531 = vmatprep.mubr.msk.bf16.mxu1 %vm2865_vm3, %v3404_v50 }
 0x9e0   : > { %5532 = vmatmul.mubr.msk.bf16.gmra.mrb[124].mxu1 %vm2865_vm3, %v3405_v51 }
 0x9e1   : > { %5535 = vmatprep.mubr.msk.bf16.mxu1 %vm2865_vm3, %v3406_v36 }
 0x9e8   : > { %5536 = vmatmul.mubr.msk.bf16.gmra.mrb[128].mxu1 %vm2865_vm3, %v3407_v54 }
 0x9e9   : > { %5543 = vmatprep.mubr.msk.bf16.mxu1 %vm2865_vm3, %v3401_v62 }
 0x9f0   : > { %5544 = vmatmul.mubr.msk.bf16.vlgmr.msra.gmra.mrb[116].mxu1 %vm2865_vm3, %v3402_v27 }
 0x9f1   : > { %5547 = vmatprep.mubr.msk.bf16.mxu1 %vm2865_vm3, %v3403_v41 }
 0x9f8   : > { %5548 = vmatmul.mubr.msk.bf16.gmra.mrb[120].mxu1 %vm2865_vm3, %v3404_v50  ;;  %v6044_v50 = vld [vmem:[%s7227_s19 + $0x8] sm:$0xff]  }
 0x9f9   : > { %5551 = vmatprep.mubr.msk.bf16.mxu1 %vm2865_vm3, %v3405_v51  ;;  %v6045_v51 = vld [vmem:[%s7227_s19 + $0x10] sm:$0xff]  }
 0xa00   : > { %5552 = vmatmul.mubr.msk.bf16.gmra.mrb[124].mxu1 %vm2865_vm3, %v3406_v36  ;;  %v6046_v36 = vld [vmem:[%s7227_s19 + $0x18] sm:$0xff]  }
 0xa01   : > { %5555 = vmatprep.mubr.msk.bf16.mxu1 %vm2865_vm3, %v3407_v54  ;;  %v6048_v54 = vld [vmem:[%s7227_s19 + $0x28] sm:$0xff]  }
 0xa08   : > { %5556 = vmatmul.mubr.msk.bf16.gmra.mrb[128].mxu1 %vm2865_vm3, %v3408_v59  ;;  %v6049_v59 = vld [vmem:[%s7227_s19 + $0x30] sm:$0xff]  }
 0xac3   : > { %v5545_v61 = vpop.f32.mrb[116].mxu1 }
 0xac4   : > { %v5657_v1 = vadd.f32 %v5545_v61, %v4698_v57  ;;  %v3755_v2 = vpop.f32.mrb[117].mxu1  ;;  %v6052_v61 = vld [vmem:[%s7227_s19 + $0x48] sm:$0xff]  }
 0xac5   : > { %v5658_v56 = vadd.f32 %v4698_v57, %v3755_v2  ;;  %v5546_v12 = vpop.f32.mrb[118].mxu1  ;;  %v6054_v2 = vld [vmem:[%s7227_s19 + $0x58] sm:$0xff]  }
 0xac6   : > { %v5659_v6 = vadd.f32 %v5546_v12, %v4698_v57  ;;  %v3758_v28 = vpop.f32.mrb[119].mxu1  ;;  %v3836_v35 = vmax.f32 %v5657_v1, 0.0  ;;  %v6053_v1 = vld [vmem:[%s7227_s19 + $0x50] sm:$0xff]   ;;  %v6056_v12 = vld [vmem:[%s7227_s19 + $0x68] sm:$0xff]  }
 0xac7   : > { %v5660_v5 = vadd.f32 %v4698_v57, %v3758_v28  ;;  %v3834_v0 = vmax.f32 %v5658_v56, 0.0  ;;  %v6055_v56 = vld [vmem:[%s7227_s19 + $0x60] sm:$0xff]   ;;  %v6058_v28 = vld [vmem:[%s7227_s19 + $0x78] sm:$0xff]  }
 0xac8   : > { %v3837_v4 = vmax.f32 %v5659_v6, 0.0  ;;  %v6057_v6 = vld [vmem:[%s7227_s19 + $0x70] sm:$0xff]  }
 0xac9   : > { %v3835_v8 = vmax.f32 %v5660_v5, 0.0  ;;  %v7073_v5 = vld [vmem:[%s7219_s11] sm:$0x3] }
 0xaca   : > { %v3883_v3 = vpack.c.bf16 %v3837_v4, %v3836_v35 }
 0xacb   : > { %v3882_v7 = vpack.c.bf16 %v3835_v8, %v3834_v0  ;;  %v5549_v10 = vpop.f32.mrb[120].mxu1 }
 0xacc   : > { %v5661_v15 = vadd.f32 %v5549_v10, %v4698_v57  ;;  %v3771_v16 = vpop.f32.mrb[121].mxu1 }
 0xacd   : > { %v5662_v18 = vadd.f32 %v4698_v57, %v3771_v16  ;;  %v5550_v19 = vpop.f32.mrb[122].mxu1  ;;  %5559 = vmatprep.subr.bf16.mxu0 %v3882_v7 }
 0xace   : > { %v5663_v30 = vadd.f32 %v5550_v19, %v4698_v57  ;;  %v3774_v21 = vpop.f32.mrb[123].mxu1  ;;  %5560 = vmatpush3.bf16.msra.mxu0 %v3882_v7  ;;  %v3840_v25 = vmax.f32 %v5661_v15, 0.0 }
 0xacf   : > { %v5664_v23 = vadd.f32 %v4698_v57, %v3774_v21  ;;  %5561 = vmatprep.subr.bf16.mxu0 %v3883_v3  ;;  %v3838_v11 = vmax.f32 %v5662_v18, 0.0 }
 0xad0   : > { %v3841_v63 = vmax.f32 %v5663_v30, 0.0 }
 0xad1   : > { %v3839_v26 = vmax.f32 %v5664_v23, 0.0 }
 0xad2   : > { %v3885_v31 = vpack.c.bf16 %v3841_v63, %v3840_v25  ;;  %5562 = vmatpush3.bf16.msra.mxu0 %v3883_v3 }
 0xad3   : > { %v3884_v32 = vpack.c.bf16 %v3839_v26, %v3838_v11  ;;  %v5553_v17 = vpop.f32.mrb[124].mxu1 }
 0xad4   : > { %v5665_v52 = vadd.f32 %v5553_v17, %v4698_v57  ;;  %v3787_v34 = vpop.f32.mrb[125].mxu1 }
 0xad5   : > { %v5666_v43 = vadd.f32 %v4698_v57, %v3787_v34  ;;  %v5554_v42 = vpop.f32.mrb[126].mxu1  ;;  %5563 = vmatprep.subr.bf16.mxu0 %v3884_v32 }
 0xad6   : > { %v5667_v58 = vadd.f32 %v5554_v42, %v4698_v57  ;;  %v3790_v13 = vpop.f32.mrb[127].mxu1  ;;  %5564 = vmatpush3.bf16.msra.mxu0 %v3884_v32  ;;  %v3844_v9 = vmax.f32 %v5665_v52, 0.0 }
 0xad7   : > { %v5668_v44 = vadd.f32 %v4698_v57, %v3790_v13  ;;  %5565 = vmatprep.subr.bf16.mxu0 %v3885_v31  ;;  %v3842_v20 = vmax.f32 %v5666_v43, 0.0 }
 0xad8   : > { %v3845_v29 = vmax.f32 %v5667_v58, 0.0  ;;  %v4182_v58 = vld [vmem:[#allocation2] sm:$0xff] }
 0xad9   : > { %v3843_v60 = vmax.f32 %v5668_v44, 0.0 }
 0xada   : > { %v3887_v62 = vpack.c.bf16 %v3845_v29, %v3844_v9  ;;  %5566 = vmatpush3.bf16.msra.mxu0 %v3885_v31 }
 0xadb   : > { %v3886_v24 = vpack.c.bf16 %v3843_v60, %v3842_v20  ;;  %v5557_v14 = vpop.f32.mrb[128].mxu1  ;;  %v4205_v20 = vsel %vm2191_vm2, %v4182_v58, 0 }
 0xadc   : > { %v5669_v22 = vadd.f32 %v5557_v14, %v4698_v57  ;;  %v3803_v37 = vpop.f32.mrb[129].mxu1 }
 0xadd   : > { %v5670_v38 = vadd.f32 %v4698_v57, %v3803_v37  ;;  %v5558_v39 = vpop.f32.mrb[130].mxu1  ;;  %5567 = vmatprep.subr.bf16.mxu0 %v3886_v24 }
 0xade   : > { %v5671_v40 = vadd.f32 %v5558_v39, %v4698_v57  ;;  %v3806_v27 = vpop.f32.mrb[131].mxu1  ;;  %5568 = vmatpush3.bf16.msra.mxu0 %v3886_v24  ;;  %v3848_v45 = vmax.f32 %v5669_v22, 0.0 }
 0xadf   : > { %v5672_v41 = vadd.f32 %v4698_v57, %v3806_v27  ;;  %5569 = vmatprep.subr.bf16.mxu0 %v3887_v62  ;;  %v3846_v46 = vmax.f32 %v5670_v38, 0.0  ;;  %v6051_v57 = vld [vmem:[%s7227_s19 + $0x40] sm:$0xff]  }
 0xae0   : > { %v3849_v33 = vmax.f32 %v5671_v40, 0.0 }
 0xae1   : > { %v3847_v47 = vmax.f32 %v5672_v41, 0.0 }
 0xae2   : > { %v3889_v48 = vpack.c.bf16 %v3849_v33, %v3848_v45  ;;  %5570 = vmatpush3.bf16.msra.mxu0 %v3887_v62 }
 0xae3   : > { %v3888_v49 = vpack.c.bf16 %v3847_v47, %v3846_v46 }
 0xae5   : > { %5571 = vmatprep.subr.bf16.mxu0 %v3888_v49 }
 0xae6   : > { %5572 = vmatpush3.bf16.msra.mxu0 %v3888_v49 }
 0xae7   : > { %5573 = vmatprep.subr.bf16.mxu0 %v3889_v48 }
 0xaea   : > { %5574 = vmatpush3.bf16.msra.mxu0 %v3889_v48 }
 0xaed   : > { %5576 = vmatmul.mubr.bf16.vlgmr.msra.gmra.mrb[100].mxu0 %v6044_v50 }
 0xaee   : > { %5579 = vmatprep.mubr.bf16.mxu0 %v6045_v51 }
 0xaf5   : > { %5580 = vmatmul.mubr.bf16.gmra.mrb[104].mxu0 %v6046_v36 }
 0xaf6   : > { %5583 = vmatprep.mubr.bf16.mxu0 %v6047_v53 }
 0xafd   : > { %5584 = vmatmul.mubr.bf16.gmra.mrb[108].mxu0 %v6048_v54 }
 0xafe   : > { %5587 = vmatprep.mubr.bf16.mxu0 %v6049_v59 }
 0xb05   : > { %5588 = vmatmul.mubr.bf16.gmra.mrb[112].mxu0 %v6050_v55 }
 0xb06   : > { %5591 = vmatprep.mubr.bf16.mxu0 %v6051_v57 }
 0xb0d   : > { %5592 = vmatmul.mubr.bf16.gmra.mrb[116].mxu0 %v6052_v61 }
 0xb0e   : > { %5595 = vmatprep.mubr.bf16.mxu0 %v6053_v1 }
 0xb15   : > { %5596 = vmatmul.mubr.bf16.gmra.mrb[120].mxu0 %v6054_v2 }
 0xb16   : > { %5599 = vmatprep.mubr.bf16.mxu0 %v6055_v56 }
 0xb1d   : > { %5600 = vmatmul.mubr.bf16.gmra.mrb[124].mxu0 %v6056_v12 }
 0xb1e   : > { %5603 = vmatprep.mubr.bf16.mxu0 %v6057_v6 }
 0xb25   : > { %5604 = vmatmul.mubr.bf16.gmra.mrb[128].mxu0 %v6058_v28 }
 0xb26   : > { %5193 = vmatprep.mubr.msk.bf16.mxu0 %vm2191_vm2, %v7073_v5 }
 0xbc0   : > { %v5577_v35 = vpop.f32.mrb[100].mxu0 }
 0xbc1   : > { %v4020_v4 = vpop.f32.mrb[101].mxu0 }
 0xbc2   : > { %v5578_v0 = vpop.f32.mrb[102].mxu0 }
 0xbc3   : > { %v4151_v8 = vpack.c.bf16 %v5578_v0, %v5577_v35  ;;  %v4023_v3 = vpop.f32.mrb[103].mxu0 }
 0xbc4   : > { %v4150_v7 = vpack.c.bf16 %v4023_v3, %v4020_v4 }
 0xbc5   : > { %4167 = vst.msk [vmem:[#allocation2 + $0x10] sm:$0xff] %vm2191_vm2, %v4151_v8 }
 0xbc6   : > { %4166 = vst.msk [vmem:[#allocation2 + $0x8] sm:$0xff] %vm2191_vm2, %v4150_v7 }
 0xbc8   : > { %v5581_v10 = vpop.f32.mrb[104].mxu0 }
 0xbc9   : > { %v4036_v15 = vpop.f32.mrb[105].mxu0 }
 0xbca   : > { %v5582_v16 = vpop.f32.mrb[106].mxu0 }
 0xbcb   : > { %v4153_v18 = vpack.c.bf16 %v5582_v16, %v5581_v10  ;;  %v4039_v19 = vpop.f32.mrb[107].mxu0 }
 0xbcc   : > { %v4152_v30 = vpack.c.bf16 %v4039_v19, %v4036_v15  ;;  %v4184_v48 = vld [vmem:[#allocation2 + $0x10] sm:$0xff]  ;;  %v4147_v19 = vld [vmem:[%s7220_s12] sm:$0xf] }
 0xbcd   : > { %4169 = vst.msk [vmem:[#allocation2 + $0x20] sm:$0xff] %vm2191_vm2, %v4153_v18  ;;  %v4183_v37 = vld [vmem:[#allocation2 + $0x8] sm:$0xff]  ;;  %v4211_v53 = vsel %vm2191_vm2, %v4184_v48, 0  ;;  %v4744_v18 = vld [vmem:[%s7219_s11 + $0x2] sm:$0x3]  ;;  %4295 = vperm.xlu1 %5910, %v4147_v19  }
 0xbce   : > { %4168 = vst.msk [vmem:[#allocation2 + $0x18] sm:$0xff] %vm2191_vm2, %v4152_v30  ;;  %v4208_v41 = vsel %vm2191_vm2, %v4183_v37, 0 }
 0xbd0   : > { %v5585_v21 = vpop.f32.mrb[108].mxu0 }
 0xbd1   : > { %v4052_v23 = vpop.f32.mrb[109].mxu0 }
 0xbd2   : > { %v5586_v25 = vpop.f32.mrb[110].mxu0 }
 0xbd3   : > { %v4155_v63 = vpack.c.bf16 %v5586_v25, %v5585_v21  ;;  %v4055_v11 = vpop.f32.mrb[111].mxu0  ;;  %v4746_v21 = vld [vmem:[%s7219_s11 + $0x4] sm:$0x3] }
 0xbd4   : > { %v4154_v26 = vpack.c.bf16 %v4055_v11, %v4052_v23  ;;  %v4186_v6 = vld [vmem:[#allocation2 + $0x20] sm:$0xff]  ;;  %v4199_v23 = vld [vmem:[#allocation2 + $0x88] sm:$0xff] }
 0xbd5   : > { %4171 = vst.msk [vmem:[#allocation2 + $0x30] sm:$0xff] %vm2191_vm2, %v4155_v63  ;;  %v4185_v57 = vld [vmem:[#allocation2 + $0x18] sm:$0xff]  ;;  %v4217_v35 = vsel %vm2191_vm2, %v4186_v6, 0 }
 0xbd6   : > { %4170 = vst.msk [vmem:[#allocation2 + $0x28] sm:$0xff] %vm2191_vm2, %v4154_v26  ;;  %v4214_v56 = vsel %vm2191_vm2, %v4185_v57, 0 }
 0xbd8   : > { %v5589_v31 = vpop.f32.mrb[112].mxu0 }
 0xbd9   : > { %v4068_v32 = vpop.f32.mrb[113].mxu0 }
 0xbda   : > { %v5590_v17 = vpop.f32.mrb[114].mxu0 }
 0xbdb   : > { %v4157_v52 = vpack.c.bf16 %v5590_v17, %v5589_v31  ;;  %v4071_v34 = vpop.f32.mrb[115].mxu0 }
 0xbdc   : > { %v4156_v43 = vpack.c.bf16 %v4071_v34, %v4068_v32  ;;  %v4188_v3 = vld [vmem:[#allocation2 + $0x30] sm:$0xff] }
 0xbdd   : > { %4173 = vst.msk [vmem:[#allocation2 + $0x40] sm:$0xff] %vm2191_vm2, %v4157_v52  ;;  %v4187_v4 = vld [vmem:[#allocation2 + $0x28] sm:$0xff]  ;;  %v4223_v10 = vsel %vm2191_vm2, %v4188_v3, 0 }
 0xbde   : > { %4172 = vst.msk [vmem:[#allocation2 + $0x38] sm:$0xff] %vm2191_vm2, %v4156_v43  ;;  %v4220_v0 = vsel %vm2191_vm2, %v4187_v4, 0 }
 0xbe0   : > { %v5593_v42 = vpop.f32.mrb[116].mxu0 }
 0xbe1   : > { %v4084_v13 = vpop.f32.mrb[117].mxu0 }
 0xbe2   : > { %v5594_v44 = vpop.f32.mrb[118].mxu0 }
 0xbe3   : > { %v4159_v9 = vpack.c.bf16 %v5594_v44, %v5593_v42  ;;  %v4087_v29 = vpop.f32.mrb[119].mxu0 }
 0xbe4   : > { %v4158_v60 = vpack.c.bf16 %v4087_v29, %v4084_v13  ;;  %v7086_v62 = vld [vmem:[#allocation2 + $0x40] sm:$0xff] }
 0xbe5   : > { %4175 = vst.msk [vmem:[#allocation2 + $0x50] sm:$0xff] %vm2191_vm2, %v4159_v9  ;;  %5826 = vmatprep.subr.msk.bf16.mxu0 %vm2191_vm2, %v7086_v62  ;;  %v4189_v15 = vld [vmem:[#allocation2 + $0x38] sm:$0xff]  ;;  %v4229_v30 = vsel %vm2191_vm2, %v7086_v62, 0 }
 0xbe6   : > { %4174 = vst.msk [vmem:[#allocation2 + $0x48] sm:$0xff] %vm2191_vm2, %v4158_v60  ;;  %5178 = vmatpush3.bf16.xpose.msra.mxu0 %v4205_v20  ;;  %v4226_v16 = vsel %vm2191_vm2, %v4189_v15, 0 }
 0xbe8   : > { %v5597_v24 = vpop.f32.mrb[120].mxu0 }
 0xbe9   : > { %v4100_v14 = vpop.f32.mrb[121].mxu0 }
 0xbea   : > { %v5598_v22 = vpop.f32.mrb[122].mxu0 }
 0xbeb   : > { %v4161_v38 = vpack.c.bf16 %v5598_v22, %v5597_v24  ;;  %v4103_v39 = vpop.f32.mrb[123].mxu0 }
 0xbec   : > { %v4160_v40 = vpack.c.bf16 %v4103_v39, %v4100_v14  ;;  %v7099_v45 = vld [vmem:[#allocation2 + $0x50] sm:$0xff] }
 0xbed   : > { %v7092_v27 = vld [vmem:[#allocation2 + $0x48] sm:$0xff]  ;;  %4177 = vst.msk [vmem:[#allocation2 + $0x60] sm:$0xff] %vm2191_vm2, %v4161_v38 }
 0xbee   : > { %5827 = vmatprep.subr.msk.bf16.mxu0 %vm2191_vm2, %v7092_v27  ;;  %4176 = vst.msk [vmem:[#allocation2 + $0x58] sm:$0xff] %vm2191_vm2, %v4160_v40  ;;  %v4232_v25 = vsel %vm2191_vm2, %v7092_v27, 0 }
 0xbef   : > { %5180 = vmatpush3.bf16.xpose.msra.mxu0 %v4208_v41 }
 0xbf0   : > { %5828 = vmatprep.subr.msk.bf16.mxu0 %vm2191_vm2, %v7099_v45  ;;  %v5601_v33 = vpop.f32.mrb[124].mxu0 }
 0xbf1   : > { %v4116_v46 = vpop.f32.mrb[125].mxu0 }
 0xbf2   : > { %v5602_v47 = vpop.f32.mrb[126].mxu0 }
 0xbf3   : > { %v4163_v49 = vpack.c.bf16 %v5602_v47, %v5601_v33  ;;  %v4119_v50 = vpop.f32.mrb[127].mxu0 }
 0xbf4   : > { %v4162_v51 = vpack.c.bf16 %v4119_v50, %v4116_v46  ;;  %v4194_v12 = vld [vmem:[#allocation2 + $0x60] sm:$0xff] }
 0xbf5   : > { %v7103_v36 = vld [vmem:[#allocation2 + $0x58] sm:$0xff]  ;;  %4179 = vst.msk [vmem:[#allocation2 + $0x70] sm:$0xff] %vm2191_vm2, %v4163_v49 }
 0xbf6   : > { %4178 = vst.msk [vmem:[#allocation2 + $0x68] sm:$0xff] %vm2191_vm2, %v4162_v51 }
 0xbf7   : > { %5182 = vmatpush3.bf16.xpose.msra.mxu0 %v4211_v53 }
 0xbf8   : > { %5829 = vmatprep.subr.msk.bf16.mxu0 %vm2191_vm2, %v7103_v36  ;;  %v5605_v54 = vpop.f32.mrb[128].mxu0 }
 0xbf9   : > { %v4132_v59 = vpop.f32.mrb[129].mxu0 }
 0xbfa   : > { %v5606_v55 = vpop.f32.mrb[130].mxu0 }
 0xbfb   : > { %v4165_v61 = vpack.c.bf16 %v5606_v55, %v5605_v54  ;;  %v4135_v1 = vpop.f32.mrb[131].mxu0 }
 0xbfc   : > { %v4164_v2 = vpack.c.bf16 %v4135_v1, %v4132_v59  ;;  %v4196_v8 = vld [vmem:[#allocation2 + $0x70] sm:$0xff] }
 0xbfd   : > { %4181 = vst.msk [vmem:[#allocation2 + $0x80] sm:$0xff] %vm2191_vm2, %v4165_v61  ;;  %v4195_v28 = vld [vmem:[#allocation2 + $0x68] sm:$0xff] }
 0xbfe   : > { %4180 = vst.msk [vmem:[#allocation2 + $0x78] sm:$0xff] %vm2191_vm2, %v4164_v2 }
 0xbff   : > { %5184 = vmatpush3.bf16.xpose.msra.mxu0 %v4214_v56 }
 0xc00   : > { %5830 = vmatprep.subr.msk.bf16.mxu0 %vm2191_vm2, %v4194_v12 }
 0xc05   : > { %v4197_v7 = vld [vmem:[#allocation2 + $0x78] sm:$0xff] }
 0xc07   : > { %5186 = vmatpush3.bf16.xpose.msra.mxu0 %v4217_v35 }
 0xc08   : > { %5831 = vmatprep.subr.msk.bf16.mxu0 %vm2191_vm2, %v4195_v28 }
 0xc0f   : > { %5188 = vmatpush3.bf16.xpose.msra.mxu0 %v4220_v0 }
 0xc10   : > { %5832 = vmatprep.subr.msk.bf16.mxu0 %vm2191_vm2, %v4196_v8 }
 0xc17   : > { %5190 = vmatpush3.bf16.xpose.msra.mxu0 %v4223_v10 }
 0xc18   : > { %5833 = vmatprep.subr.msk.bf16.mxu0 %vm2191_vm2, %v4197_v7 }
 0xc1f   : > { %5192 = vmatpush3.bf16.xpose.msra.mxu0 %v4226_v16 }
 0xc20   : > { %5834 = vmatprep.subr.msk.bf16.mxu0 %vm2191_vm2, %v7092_v27 }
 0xc26   : > { %5194 = vmatmul.mubr.msk.bf16.vlgmr.msra.gmra.mrb[132].mxu0 %vm2191_vm2, %v7073_v5  ;;  %v4198_v5 = vld [vmem:[#allocation2 + $0x80] sm:$0xff] }
 0xc27   : > { %5196 = vmatpush3.bf16.xpose.msra.mxu0 %v4208_v41  ;;  %5211 = vmatprep.mubr.msk.bf16.mxu0 %vm2191_vm2, %v4744_v18 }
 0xc28   : > { %5835 = vmatprep.subr.msk.bf16.mxu0 %vm2191_vm2, %v7099_v45 }
 0xc2f   : > { %5198 = vmatpush3.bf16.xpose.msra.mxu0 %v4211_v53 }
 0xc30   : > { %5836 = vmatprep.subr.msk.bf16.mxu0 %vm2191_vm2, %v7103_v36 }
 0xc37   : > { %5200 = vmatpush3.bf16.xpose.msra.mxu0 %v4214_v56 }
 0xc38   : > { %5837 = vmatprep.subr.msk.bf16.mxu0 %vm2191_vm2, %v4194_v12 }
 0xc3f   : > { %5202 = vmatpush3.bf16.xpose.msra.mxu0 %v4217_v35 }
 0xc40   : > { %5838 = vmatprep.subr.msk.bf16.mxu0 %vm2191_vm2, %v4195_v28 }
 0xc47   : > { %5204 = vmatpush3.bf16.xpose.msra.mxu0 %v4220_v0 }
 0xc48   : > { %5839 = vmatprep.subr.msk.bf16.mxu0 %vm2191_vm2, %v4196_v8 }
 0xc4c   : > { %v4296_v63 = vpop.permute.xlu1 %4295 }
 0xc4f   : > { %5206 = vmatpush3.bf16.xpose.msra.mxu0 %v4223_v10 }
 0xc50   : > { %5840 = vmatprep.subr.msk.bf16.mxu0 %vm2191_vm2, %v4197_v7 }
 0xc57   : > { %5208 = vmatpush3.bf16.xpose.msra.mxu0 %v4226_v16 }
 0xc58   : > { %5841 = vmatprep.subr.msk.bf16.mxu0 %vm2191_vm2, %v4198_v5 }
 0xc5f   : > { %5210 = vmatpush3.bf16.xpose.msra.mxu0 %v4229_v30 }
 0xc60   : > { %5842 = vmatprep.subr.msk.bf16.mxu0 %vm2191_vm2, %v7099_v45 }
 0xc66   : > { %5212 = vmatmul.mubr.msk.bf16.vlgmr.msra.gmra.mrb[132].mxu0 %vm2191_vm2, %v4744_v18 }
 0xc67   : > { %5214 = vmatpush3.bf16.xpose.msra.mxu0 %v4211_v53  ;;  %5229 = vmatprep.mubr.msk.bf16.mxu0 %vm2191_vm2, %v4746_v21 }
 0xc68   : > { %5843 = vmatprep.subr.msk.bf16.mxu0 %vm2191_vm2, %v7103_v36 }
 0xc6f   : > { %5216 = vmatpush3.bf16.xpose.msra.mxu0 %v4214_v56 }
 0xc70   : > { %5844 = vmatprep.subr.msk.bf16.mxu0 %vm2191_vm2, %v4194_v12 }
 0xc77   : > { %5218 = vmatpush3.bf16.xpose.msra.mxu0 %v4217_v35 }
 0xc78   : > { %5845 = vmatprep.subr.msk.bf16.mxu0 %vm2191_vm2, %v4195_v28 }
 0xc7f   : > { %5220 = vmatpush3.bf16.xpose.msra.mxu0 %v4220_v0 }
 0xc80   : > { %5846 = vmatprep.subr.msk.bf16.mxu0 %vm2191_vm2, %v4196_v8 }
 0xc87   : > { %5222 = vmatpush3.bf16.xpose.msra.mxu0 %v4223_v10 }
 0xc88   : > { %5847 = vmatprep.subr.msk.bf16.mxu0 %vm2191_vm2, %v4197_v7 }
 0xc8f   : > { %5224 = vmatpush3.bf16.xpose.msra.mxu0 %v4226_v16 }
 0xc90   : > { %5848 = vmatprep.subr.msk.bf16.mxu0 %vm2191_vm2, %v4198_v5 }
 0xc97   : > { %5226 = vmatpush3.bf16.xpose.msra.mxu0 %v4229_v30 }
 0xc98   : > { %5849 = vmatprep.subr.msk.bf16.mxu0 %vm2191_vm2, %v4199_v23 }
 0xc9f   : > { %5228 = vmatpush3.bf16.xpose.msra.mxu0 %v4232_v25 }
 0xca6   : > { %5230 = vmatmul.mubr.msk.bf16.vlgmr.msra.gmra.mrb[132].mxu0 %vm2191_vm2, %v4746_v21 }
 0xd79   : > { %v4393_v11 = vpop.f32.mrb[132].mxu0 }
 0xd7a   : > { %v5673_v26 = vadd.f32 %v4393_v11, %v4296_v63  ;;  %v4395_v31 = vpop.f32.mrb[133].mxu0 }
 0xd7b   : > { %v5674_v32 = vadd.f32 %v4395_v31, %v4296_v63  ;;  %v4397_v17 = vpop.f32.mrb[134].mxu0 }
 0xd7c   : > { %v4398_v52 = vpop.f32.mrb[135].mxu0 }
 0xd7d   : > { %v4404_v34 = vcombine.low %v5673_v26, %v5674_v32 }
 0xd7f   : > { %4406 = vst [vmem:[%s623_s26] sm:$0xff] %v4404_v34 }
 0xd80   : > { %6072 = shalt.err (!%p6069_p3)
}
 0xd81   : > { %s6073_s29 = scalar_lea.hbm %s7166_s28, 128  ;;  %s6077_s27 = scalar_lea.hbm %s7228_s20, 512 }
 0xd82   : > { %p6074_p4 = scmp.ne.s32.totalorder %s7166_s28, %s6073_s29  ;;  %p6078_p9 = scmp.lt.u32.totalorder %s7166_s28, %s7228_s20 }
 0xd83   : > { %p6079_p10 = scmp.lt.u32.totalorder %s6077_s27, %s6073_s29  ;;  %p6081_p12 = scmp.lt.u32.totalorder %s6073_s29, %s7166_s28 }
 0xd84   : > { %p6075_p7 = pnand %p6074_p4, %p6273_p5 }
 0xd85   : > { %p6080_p11 = por %p6079_p10, %p6078_p9 }
 0xd86   : > { %p6076_p8 = pneg %p6075_p7 }
 0xd87   : > { %p6082_p13 = por %p6081_p12, %p6080_p11 }
 0xd89   : > { %p6083_p0 = pnand %p6082_p13, %p6076_p8 }
 0xd8b   : > { %6086 = shalt.err (!%p6083_p0)
}
 0xd8c   : > { %5850 = dma.vmem_to_hbm [thread:$0]  (%p6273_p5), %s7168_s23, 128, %s7166_s28, %s4408_s30  }
 0xd8d PF: > { %p5856_p1 = scmp.ge.s32.totalorder %s6121_s24, 2  ;;  %s4434_s0 = sand.u32 1, %s6109_s1  }
 0xd8e   : > { %s4435_s21 = scalar_lea.sflag [#allocation4], %s4434_s0 }
 0xd8f   : > { %p5853_p2 = pnand %p5856_p1, %p6277_p6 }
 0xd91   : > { %6104 = dma.done.wait (!%p5853_p2), %s4435_s21, 128  }
 0xd92   : > { %6106 = vsyncadd (!%p5853_p2), %s4435_s21, 4294967168  ;;  %s7258_s24 = sld [smem:[#allocation7_spill]]  ;;  %s7259_s29 = sld [smem:[#allocation6_spill]] }
 0xd93   : > { %s7260_s23 = sld [smem:[#allocation8_spill]]  ;;  %s7261_s1 = smov %s6113_s22 }
 0xd98   : > { %p30_p3 = scmp.ge.s32.totalorder %s7258_s24, 6   ;;  %s7262_s22 = smov %s7259_s29 }
 0xd9a   :  { %32 = sbr.rel (!%p30_p3) target bundleno = 12 (0xc), region = 146 }
 0xda1   :  { %4440 = vsyncpa [#allocation4], 1 }
 0xda2   :  { %4442 = vsyncpa [#allocation4 + $0x1], 1 }

</bundles_post_ra>
